<compile_context>
chip_gen: v5e
topology: v5e:2x2
jax: 0.10.0
libtpu: 0.0.40
codegen_flags: <defaults>
</compile_context>

<pallas_src>
import functools

import jax
import jax.numpy as jnp
from jax import lax
from jax.experimental import pallas as pl
from jax.experimental.pallas import tpu as pltpu


# (out_channels, kernel, stride) of DuelingDQNModel's CNN.
_CONV_CFG = ((32, 8, 4), (64, 4, 2), (64, 3, 1))
_QPAD = 128            # lane-dense padded width of the head output (>= 1 + A)


def _round_up(x, m):
    return (x + m - 1) // m * m


# ---------------------------------------------------------------------------
# Fused kernel: conv1 -> conv2 -> conv3 -> dueling head, one batch tile.
# ---------------------------------------------------------------------------

def _fused_forward_kernel(sc_ref, w1_ref, w23_ref, wh_ref, b_ref, q_ref, *,
                          tb, n_pos2, n_tap2, c1, c2, c3, hidden, action_size):
    """One batch tile of the Dueling DQN forward.

    sc_ref : (n_tap2*n_pos2*tb, K1) conv1 input patches for this batch tile,
             rows ordered (conv2 tap t, conv2 position p, batch row b).
    w1_ref : (K1, c1)                 conv1 weight, (kh,kw,ic,oc) matmul layout
    w23_ref: (n_tap2*c1 + n_pos2*c2, c2/c3) conv2 rows then conv3 rows
    wh_ref : (c3 + 2H, max(2H,_QPAD)) rows [0,c3)=Wh1=[Wv1|Wa1];
             rows [c3,c3+2H) cols [0,_QPAD) = block_diag(Wv2,Wa2) zero-padded
    b_ref  : (8, width) f32 bias slab: rows 0..4 = b1,b2,b3,bh1,bh2
    q_ref  : (tb, _QPAD) f32; cols [1, 1+A) hold the Q values.
    """
    f32 = jnp.float32
    cdt = w1_ref.dtype                       # MXU input dtype (bf16 or f32)
    rows2 = n_pos2 * tb                      # conv2-output rows per tap

    # ---- conv1: ONE long-M matmul over all (tap, pos, batch) rows; bias add
    # and ReLU happen exactly once (hoisted out of the old per-tap loop).
    z1 = jnp.dot(sc_ref[...], w1_ref[...], preferred_element_type=f32)
    a1 = jnp.maximum(z1 + b_ref[0:1, 0:c1], 0.0).astype(cdt)

    # ---- conv2: 16 back-to-back tap dots, single f32 accumulator.  The tap
    # weights are sliced from the Ref per iteration (8 KiB each) instead of
    # loading the whole w2 slab into vregs.
    z2 = None
    for t in range(n_tap2):                  # static unroll (16)
        lhs = a1[t * rows2:(t + 1) * rows2, :]
        rhs = w23_ref[t * c1:(t + 1) * c1, :]
        contrib = jnp.dot(lhs, rhs, preferred_element_type=f32)
        z2 = contrib if z2 is None else z2 + contrib
    x2 = jnp.maximum(z2 + b_ref[1:2, 0:c2], 0.0).astype(cdt)   # (rows2, c2)

    # ---- conv3: spatial output is 1x1 -> reduce over the 9 conv2 positions.
    w3_off = n_tap2 * c1
    zf = None
    for p in range(n_pos2):                  # static unroll (9)
        lhs = x2[p * tb:(p + 1) * tb, :]
        rhs = w23_ref[w3_off + p * c2: w3_off + (p + 1) * c2, :]
        contrib = jnp.dot(lhs, rhs, preferred_element_type=f32)
        zf = contrib if zf is None else zf + contrib
    feat = jnp.maximum(zf + b_ref[2:3, 0:c3], 0.0).astype(cdt)  # (tb, c3)

    # ---- dueling head: value & advantage streams merged into two matmuls,
    # writing a lane-dense (tb, 128) slab.
    two_h = 2 * hidden
    h = jnp.maximum(
        jnp.dot(feat, wh_ref[0:c3, 0:two_h], preferred_element_type=f32)
        + b_ref[3:4, 0:two_h], 0.0).astype(cdt)                 # (tb, 2H)
    qpad = q_ref.shape[1]
    va = (jnp.dot(h, wh_ref[c3:c3 + two_h, 0:qpad],
                  preferred_element_type=f32)
          + b_ref[4:5, 0:qpad])                                 # (tb, qpad)

    value = va[:, 0:1]                                          # col 0 = V(s)
    col = lax.broadcasted_iota(jnp.int32, va.shape, 1)
    adv_mask = (col >= 1) & (col < 1 + action_size)
    adv_mean = jnp.sum(jnp.where(adv_mask, va, 0.0), axis=1,
                       keepdims=True) * (1.0 / action_size)
    # cols [1, 1+A) of the written slab are exactly V + (A - mean(A)).
    q_ref[...] = value + va - adv_mean


# ---------------------------------------------------------------------------
# Host-side input plumbing: im2col for conv1 + per-conv2-tap "supercols",
# built directly in the compute dtype (bf16 by default) with a leading
# batch-tile axis so the kernel grid can tile / double-buffer it.
# ---------------------------------------------------------------------------

def _conv1_patches(x_nhwc, k, s):
    B, H, W, C = x_nhwc.shape
    oh = (H - k) // s + 1
    ow = (W - k) // s + 1
    cols = []
    for kh in range(k):
        for kw in range(k):
            cols.append(x_nhwc[:, kh:kh + s * (oh - 1) + 1:s,
                                  kw:kw + s * (ow - 1) + 1:s, :])
    # (B, oh, ow, k*k*C); feature order (kh, kw, c) matches the packed weights.
    return jnp.concatenate(cols, axis=-1), oh, ow


def _supercols_tiled(patches, k2, s2, n_tiles, tile):
    """(B, OH1, OW1, K1) -> (n_tiles, k2*k2 * OH2*OW2 * tile, K1).

    Row order inside a tile: (conv2 tap t, conv2 position p, batch row b),
    so every kernel slice is sublane(8)-aligned.  conv1 work is recomputed
    ~2.25x (negligible FLOPs) in exchange for a reshape-free fused kernel.
    """
    B, oh1, ow1, K1 = patches.shape
    oh2 = (oh1 - k2) // s2 + 1
    ow2 = (ow1 - k2) // s2 + 1
    G = n_tiles * tile
    taps = []
    for kh in range(k2):
        for kw in range(k2):
            sub = patches[:, kh:kh + s2 * (oh2 - 1) + 1:s2,
                             kw:kw + s2 * (ow2 - 1) + 1:s2, :]   # (B,oh2,ow2,K1)
            sub = sub.reshape(B, oh2 * ow2, K1)
            sub = jnp.pad(sub, ((0, G - B), (0, 0), (0, 0)))
            sub = jnp.transpose(sub, (1, 0, 2))                  # (P2, G, K1)
            sub = sub.reshape(oh2 * ow2, n_tiles, tile, K1)
            taps.append(jnp.transpose(sub, (1, 0, 2, 3)))        # (nt,P2,tb,K1)
    sc = jnp.stack(taps, axis=1)                  # (nt, T2, P2, tb, K1)
    return sc.reshape(n_tiles, k2 * k2 * oh2 * ow2 * tile, K1), oh2, ow2


# ---------------------------------------------------------------------------
# Parameters: PyTorch layouts in init, one-time repack into packed VMEM slabs.
# ---------------------------------------------------------------------------

def init_raw_params(key, state_shape, action_size, hidden_dim):
    """Parameters in PyTorch layouts (Conv2d OIHW, Linear (out, in))."""
    C, H, W = state_shape
    (c1, k1, s1), (c2, k2, s2), (c3, k3, s3) = _CONV_CFG
    oh, ow = (H - k1) // s1 + 1, (W - k1) // s1 + 1
    oh, ow = (oh - k2) // s2 + 1, (ow - k2) // s2 + 1
    oh, ow = (oh - k3) // s3 + 1, (ow - k3) // s3 + 1
    feat = c3 * oh * ow

    ks = jax.random.split(key, 14)
    scale = 0.05
    n = lambda k, shp: jax.random.normal(k, shp, jnp.float32) * scale
    return {
        "conv1_w": n(ks[0], (c1, C, k1, k1)), "conv1_b": n(ks[1], (c1,)),
        "conv2_w": n(ks[2], (c2, c1, k2, k2)), "conv2_b": n(ks[3], (c2,)),
        "conv3_w": n(ks[4], (c3, c2, k3, k3)), "conv3_b": n(ks[5], (c3,)),
        "v1_w": n(ks[6], (hidden_dim, feat)), "v1_b": n(ks[7], (hidden_dim,)),
        "v2_w": n(ks[8], (1, hidden_dim)), "v2_b": n(ks[9], (1,)),
        "a1_w": n(ks[10], (hidden_dim, feat)), "a1_b": n(ks[11], (hidden_dim,)),
        "a2_w": n(ks[12], (action_size, hidden_dim)),
        "a2_b": n(ks[13], (action_size,)),
    }


def pack_params(raw, compute_dtype=jnp.bfloat16):
    """One-time layout hoist: conv weights to matmul layout, head merged,
    everything coalesced into 4 slabs (w1, w2|w3, head, biases)."""
    def conv_mat(w):   # (OC, IC, KH, KW) -> (KH*KW*IC, OC)
        oc, ic, kh, kw = w.shape
        return jnp.transpose(w, (2, 3, 1, 0)).reshape(kh * kw * ic, oc)

    f32 = jnp.float32
    cd = compute_dtype
    hidden = raw["v1_w"].shape[0]
    feat = raw["v1_w"].shape[1]
    a = raw["a2_w"].shape[0]
    assert 1 + a <= _QPAD

    w1 = conv_mat(raw["conv1_w"])                                 # (K1, 32)
    w23 = jnp.concatenate([conv_mat(raw["conv2_w"]),              # (512, 64)
                           conv_mat(raw["conv3_w"])], axis=0)     # +(576, 64)

    two_h = 2 * hidden
    width = max(two_h, _QPAD)
    wh1 = jnp.concatenate([raw["v1_w"].T, raw["a1_w"].T], axis=1)  # (feat, 2H)
    wh2 = jnp.zeros((two_h, _QPAD), f32)
    wh2 = wh2.at[:hidden, 0:1].set(raw["v2_w"].T)                  # value col 0
    wh2 = wh2.at[hidden:, 1:1 + a].set(raw["a2_w"].T)              # adv cols
    whead = jnp.zeros((feat + two_h, width), f32)
    whead = whead.at[:feat, :two_h].set(wh1)
    whead = whead.at[feat:, :_QPAD].set(wh2)

    biases = jnp.zeros((8, width), f32)                            # f32 epilogues
    biases = biases.at[0, :raw["conv1_b"].shape[0]].set(raw["conv1_b"])
    biases = biases.at[1, :raw["conv2_b"].shape[0]].set(raw["conv2_b"])
    biases = biases.at[2, :raw["conv3_b"].shape[0]].set(raw["conv3_b"])
    biases = biases.at[3, :two_h].set(jnp.concatenate([raw["v1_b"],
                                                       raw["a1_b"]]))
    biases = biases.at[4, 0:1].set(raw["v2_b"])
    biases = biases.at[4, 1:1 + a].set(raw["a2_b"])

    return {"w1": w1.astype(cd), "w23": w23.astype(cd),
            "whead": whead.astype(cd), "biases": biases}


# ---------------------------------------------------------------------------
# Forward pass
# ---------------------------------------------------------------------------

def dueling_dqn_forward(packed, state_nchw, *, action_size, batch_tile=128):
    """Forward; NCHW input like PyTorch, output (B, action_size) float32."""
    (c1, k1, s1), (c2, k2, s2), (c3, k3, s3) = _CONV_CFG
    B = state_nchw.shape[0]
    # Compute dtype is taken from the packed weights -> no pack/forward
    # precision mismatch is possible.
    cdt = packed["w1"].dtype

    assert batch_tile >= 8 and batch_tile % 8 == 0
    tb = min(_round_up(B, 8), batch_tile)      # sublane-aligned batch tile
    n_tiles = pl.cdiv(B, tb)
    group_total = n_tiles * tb

    # Input cast once to the compute dtype BEFORE patch expansion, so all the
    # supercol slabs (the dominant input traffic) are half-width in bf16.
    x = jnp.transpose(state_nchw, (0, 2, 3, 1)).astype(cdt)       # NCHW->NHWC
    patches1, _, _ = _conv1_patches(x, k1, s1)
    sc, oh2, ow2 = _supercols_tiled(patches1, k2, s2, n_tiles, tb)

    # The fused kernel assumes conv3 collapses conv2's output to 1x1 (true for
    # the 8/4, 4/2, 3/1 stack on 36x36 inputs).
    # TODO(synk): generalize to inputs where conv3's spatial output is > 1x1.
    assert (oh2 - k3) // s3 + 1 == 1 and (ow2 - k3) // s3 + 1 == 1, (oh2, ow2)
    n_pos2, n_tap2 = oh2 * ow2, k2 * k2
    rows, K1 = sc.shape[1], sc.shape[2]
    hidden = (packed["whead"].shape[0] - c3) // 2

    kernel = functools.partial(
        _fused_forward_kernel, tb=tb, n_pos2=n_pos2, n_tap2=n_tap2,
        c1=c1, c2=c2, c3=c3, hidden=hidden, action_size=action_size)

    out = pl.pallas_call(
        kernel,
        out_shape=jax.ShapeDtypeStruct((group_total, _QPAD), jnp.float32),
        grid=(n_tiles,),
        in_specs=[
            # sc: one batch tile per grid step -> double-buffered by Pallas.
            pl.BlockSpec((None, rows, K1), lambda b: (b, 0, 0)),
            # Weights / biases: grid-invariant blocks (fetched once).
            pl.BlockSpec(packed["w1"].shape, lambda b: (0, 0)),
            pl.BlockSpec(packed["w23"].shape, lambda b: (0, 0)),
            pl.BlockSpec(packed["whead"].shape, lambda b: (0, 0)),
            pl.BlockSpec(packed["biases"].shape, lambda b: (0, 0)),
        ],
        # Lane/sublane-dense output slab; sliced to (B, A) below.
        out_specs=pl.BlockSpec((tb, _QPAD), lambda b: (b, 0)),
        compiler_params=pltpu.CompilerParams(
            # Batch tiles are independent -> shard across TCs on v7x.
            dimension_semantics=("parallel",),
            # Covers the f32 path at tb=128 (>32 MiB default scoped limit on
            # v5e/v6e) while staying below v7x's 64 MiB physical VMEM.
            vmem_limit_bytes=48 * 1024 * 1024),
    )(sc, packed["w1"], packed["w23"], packed["whead"], packed["biases"])

    # Head columns: 0 = value, [1, 1+A) = Q values, rest = padding.
    return out[:B, 1:1 + action_size]


# ---------------------------------------------------------------------------
# Pure-JAX reference (correctness check only; mirrors the PyTorch module)
# ---------------------------------------------------------------------------

def reference_forward(raw, state):
    hp = lax.Precision.HIGHEST
    dn = ("NCHW", "OIHW", "NCHW")
    x = state
    for w, b, s in ((raw["conv1_w"], raw["conv1_b"], 4),
                    (raw["conv2_w"], raw["conv2_b"], 2),
                    (raw["conv3_w"], raw["conv3_b"], 1)):
        x = lax.conv_general_dilated(x, w, (s, s), "VALID",
                                     dimension_numbers=dn, precision=hp)
        x = jax.nn.relu(x + b[None, :, None, None])
    feats = x.reshape(x.shape[0], -1)
    hv = jax.nn.relu(jnp.dot(feats, raw["v1_w"].T, precision=hp) + raw["v1_b"])
    v = jnp.dot(hv, raw["v2_w"].T, precision=hp) + raw["v2_b"]
    ha = jax.nn.relu(jnp.dot(feats, raw["a1_w"].T, precision=hp) + raw["a1_b"])
    adv = jnp.dot(ha, raw["a2_w"].T, precision=hp) + raw["a2_b"]
    return v + (adv - adv.mean(axis=1, keepdims=True))


# ---------------------------------------------------------------------------
# Main
# ---------------------------------------------------------------------------

if __name__ == "__main__":
    state_shape = (4, 36, 36)     # (C, H, W): smallest valid for this CNN
    action_size = 6
    hidden_dim = 128
    batch = 2

    key = jax.random.PRNGKey(0)
    key_p, key_x = jax.random.split(key)
    raw = init_raw_params(key_p, state_shape, action_size, hidden_dim)
    x = jax.random.normal(key_x, (batch,) + state_shape, jnp.float32)   # NCHW
    q_expected = reference_forward(raw, x)

    fwd = jax.jit(functools.partial(dueling_dqn_forward,
                                    action_size=action_size))

    # Default bf16 compute path (f32 accumulation / epilogues).
    packed_bf16 = pack_params(raw, jnp.bfloat16)
    q = fwd(packed_bf16, x)
    jax.block_until_ready(q)
    assert q.shape == (batch, action_size), q.shape
    assert q.dtype == jnp.float32
    assert jnp.allclose(q, q_expected, rtol=3e-2, atol=3e-2), (q, q_expected)

    # f32 compute path: tight check against the PyTorch-equivalent reference.
    packed_f32 = pack_params(raw, jnp.float32)
    q32 = fwd(packed_f32, x)
    jax.block_until_ready(q32)
    assert jnp.allclose(q32, q_expected, rtol=1e-2, atol=1e-2), (q32, q_expected)

    print("KERNEL_OK")
</pallas_src>

<mosaic_0001>
module attributes {stable_mosaic.version = 11 : i64} {
  func.func @_fused_forward_kernel(%arg0: i32, %arg1: memref<1x1152x256xbf16, #tpu.memory_space<vmem>>, %arg2: memref<256x32xbf16, #tpu.memory_space<vmem>>, %arg3: memref<1088x64xbf16, #tpu.memory_space<vmem>>, %arg4: memref<320x256xbf16, #tpu.memory_space<vmem>>, %arg5: memref<8x256xf32, #tpu.memory_space<vmem>>, %arg6: memref<8x128xf32, #tpu.memory_space<vmem>>) attributes {dimension_semantics = [#tpu.dimension_semantics<parallel>], iteration_bounds = array<i64: 1>, scalar_prefetch = 0 : i64, scratch_operands = 0 : i64, tpu.core_type = #tpu.core_type<tc>, window_params = [{transform_indices = @transform_0, window_bounds = array<i64: 1, 1152, 256>}, {pipeline_mode = #tpu.pipeline_mode<synchronous>, transform_indices = @transform_1, window_bounds = array<i64: 256, 32>}, {pipeline_mode = #tpu.pipeline_mode<synchronous>, transform_indices = @transform_2, window_bounds = array<i64: 1088, 64>}, {pipeline_mode = #tpu.pipeline_mode<synchronous>, transform_indices = @transform_3, window_bounds = array<i64: 320, 256>}, {pipeline_mode = #tpu.pipeline_mode<synchronous>, transform_indices = @transform_4, window_bounds = array<i64: 8, 256>}, {transform_indices = @transform_5, window_bounds = array<i64: 8, 128>}]} {
    %c0 = arith.constant 0 : index
    %c0_0 = arith.constant 0 : index
    %c0_1 = arith.constant 0 : index
    %0 = vector.load %arg1[%c0, %c0_0, %c0_1] : memref<1x1152x256xbf16, #tpu.memory_space<vmem>>, vector<1x1152x256xbf16>
    %1 = vector.shape_cast %0 : vector<1x1152x256xbf16> to vector<1152x256xbf16>
    %c0_2 = arith.constant 0 : index
    %c0_3 = arith.constant 0 : index
    %2 = vector.load %arg2[%c0_2, %c0_3] : memref<256x32xbf16, #tpu.memory_space<vmem>>, vector<256x32xbf16>
    %cst = arith.constant dense<0.000000e+00> : vector<1152x32xf32>
    %3 = tpu.matmul %1, %2, %cst {dimension_numbers = #tpu.dot_dimension_numbers<[1], [0], [0], [1], [0, 0, 1, 1], [], []>} : vector<1152x256xbf16>, vector<256x32xbf16>, vector<1152x32xf32> -> vector<1152x32xf32>
    %c0_4 = arith.constant 0 : index
    %c0_5 = arith.constant 0 : index
    %4 = vector.load %arg5[%c0_4, %c0_5] : memref<8x256xf32, #tpu.memory_space<vmem>>, vector<1x32xf32>
    %5 = vector.broadcast %4 : vector<1x32xf32> to vector<1152x32xf32>
    %6 = arith.addf %3, %5 : vector<1152x32xf32>
    %cst_6 = arith.constant 0.000000e+00 : f32
    %7 = vector.broadcast %cst_6 : f32 to vector<1152x32xf32>
    %8 = arith.maximumf %6, %7 : vector<1152x32xf32>
    %9 = arith.truncf %8 : vector<1152x32xf32> to vector<1152x32xbf16>
    %10 = vector.extract_strided_slice %9 {offsets = [0, 0], sizes = [72, 32], strides = [1, 1]} : vector<1152x32xbf16> to vector<72x32xbf16>
    %c0_7 = arith.constant 0 : index
    %c0_8 = arith.constant 0 : index
    %11 = vector.load %arg3[%c0_7, %c0_8] : memref<1088x64xbf16, #tpu.memory_space<vmem>>, vector<32x64xbf16>
    %cst_9 = arith.constant dense<0.000000e+00> : vector<72x64xf32>
    %12 = tpu.matmul %10, %11, %cst_9 {dimension_numbers = #tpu.dot_dimension_numbers<[1], [0], [0], [1], [0, 0, 1, 1], [], []>} : vector<72x32xbf16>, vector<32x64xbf16>, vector<72x64xf32> -> vector<72x64xf32>
    %13 = vector.extract_strided_slice %9 {offsets = [72, 0], sizes = [72, 32], strides = [1, 1]} : vector<1152x32xbf16> to vector<72x32xbf16>
    %c32 = arith.constant 32 : index
    %c0_10 = arith.constant 0 : index
    %14 = vector.load %arg3[%c32, %c0_10] : memref<1088x64xbf16, #tpu.memory_space<vmem>>, vector<32x64xbf16>
    %cst_11 = arith.constant dense<0.000000e+00> : vector<72x64xf32>
    %15 = tpu.matmul %13, %14, %cst_11 {dimension_numbers = #tpu.dot_dimension_numbers<[1], [0], [0], [1], [0, 0, 1, 1], [], []>} : vector<72x32xbf16>, vector<32x64xbf16>, vector<72x64xf32> -> vector<72x64xf32>
    %16 = arith.addf %12, %15 : vector<72x64xf32>
    %17 = vector.extract_strided_slice %9 {offsets = [144, 0], sizes = [72, 32], strides = [1, 1]} : vector<1152x32xbf16> to vector<72x32xbf16>
    %c64 = arith.constant 64 : index
    %c0_12 = arith.constant 0 : index
    %18 = vector.load %arg3[%c64, %c0_12] : memref<1088x64xbf16, #tpu.memory_space<vmem>>, vector<32x64xbf16>
    %cst_13 = arith.constant dense<0.000000e+00> : vector<72x64xf32>
    %19 = tpu.matmul %17, %18, %cst_13 {dimension_numbers = #tpu.dot_dimension_numbers<[1], [0], [0], [1], [0, 0, 1, 1], [], []>} : vector<72x32xbf16>, vector<32x64xbf16>, vector<72x64xf32> -> vector<72x64xf32>
    %20 = arith.addf %16, %19 : vector<72x64xf32>
    %21 = vector.extract_strided_slice %9 {offsets = [216, 0], sizes = [72, 32], strides = [1, 1]} : vector<1152x32xbf16> to vector<72x32xbf16>
    %c96 = arith.constant 96 : index
    %c0_14 = arith.constant 0 : index
    %22 = vector.load %arg3[%c96, %c0_14] : memref<1088x64xbf16, #tpu.memory_space<vmem>>, vector<32x64xbf16>
    %cst_15 = arith.constant dense<0.000000e+00> : vector<72x64xf32>
    %23 = tpu.matmul %21, %22, %cst_15 {dimension_numbers = #tpu.dot_dimension_numbers<[1], [0], [0], [1], [0, 0, 1, 1], [], []>} : vector<72x32xbf16>, vector<32x64xbf16>, vector<72x64xf32> -> vector<72x64xf32>
    %24 = arith.addf %20, %23 : vector<72x64xf32>
    %25 = vector.extract_strided_slice %9 {offsets = [288, 0], sizes = [72, 32], strides = [1, 1]} : vector<1152x32xbf16> to vector<72x32xbf16>
    %c128 = arith.constant 128 : index
    %c0_16 = arith.constant 0 : index
    %26 = vector.load %arg3[%c128, %c0_16] : memref<1088x64xbf16, #tpu.memory_space<vmem>>, vector<32x64xbf16>
    %cst_17 = arith.constant dense<0.000000e+00> : vector<72x64xf32>
    %27 = tpu.matmul %25, %26, %cst_17 {dimension_numbers = #tpu.dot_dimension_numbers<[1], [0], [0], [1], [0, 0, 1, 1], [], []>} : vector<72x32xbf16>, vector<32x64xbf16>, vector<72x64xf32> -> vector<72x64xf32>
    %28 = arith.addf %24, %27 : vector<72x64xf32>
    %29 = vector.extract_strided_slice %9 {offsets = [360, 0], sizes = [72, 32], strides = [1, 1]} : vector<1152x32xbf16> to vector<72x32xbf16>
    %c160 = arith.constant 160 : index
    %c0_18 = arith.constant 0 : index
    %30 = vector.load %arg3[%c160, %c0_18] : memref<1088x64xbf16, #tpu.memory_space<vmem>>, vector<32x64xbf16>
    %cst_19 = arith.constant dense<0.000000e+00> : vector<72x64xf32>
    %31 = tpu.matmul %29, %30, %cst_19 {dimension_numbers = #tpu.dot_dimension_numbers<[1], [0], [0], [1], [0, 0, 1, 1], [], []>} : vector<72x32xbf16>, vector<32x64xbf16>, vector<72x64xf32> -> vector<72x64xf32>
    %32 = arith.addf %28, %31 : vector<72x64xf32>
    %33 = vector.extract_strided_slice %9 {offsets = [432, 0], sizes = [72, 32], strides = [1, 1]} : vector<1152x32xbf16> to vector<72x32xbf16>
    %c192 = arith.constant 192 : index
    %c0_20 = arith.constant 0 : index
    %34 = vector.load %arg3[%c192, %c0_20] : memref<1088x64xbf16, #tpu.memory_space<vmem>>, vector<32x64xbf16>
    %cst_21 = arith.constant dense<0.000000e+00> : vector<72x64xf32>
    %35 = tpu.matmul %33, %34, %cst_21 {dimension_numbers = #tpu.dot_dimension_numbers<[1], [0], [0], [1], [0, 0, 1, 1], [], []>} : vector<72x32xbf16>, vector<32x64xbf16>, vector<72x64xf32> -> vector<72x64xf32>
    %36 = arith.addf %32, %35 : vector<72x64xf32>
    %37 = vector.extract_strided_slice %9 {offsets = [504, 0], sizes = [72, 32], strides = [1, 1]} : vector<1152x32xbf16> to vector<72x32xbf16>
    %c224 = arith.constant 224 : index
    %c0_22 = arith.constant 0 : index
    %38 = vector.load %arg3[%c224, %c0_22] : memref<1088x64xbf16, #tpu.memory_space<vmem>>, vector<32x64xbf16>
    %cst_23 = arith.constant dense<0.000000e+00> : vector<72x64xf32>
    %39 = tpu.matmul %37, %38, %cst_23 {dimension_numbers = #tpu.dot_dimension_numbers<[1], [0], [0], [1], [0, 0, 1, 1], [], []>} : vector<72x32xbf16>, vector<32x64xbf16>, vector<72x64xf32> -> vector<72x64xf32>
    %40 = arith.addf %36, %39 : vector<72x64xf32>
    %41 = vector.extract_strided_slice %9 {offsets = [576, 0], sizes = [72, 32], strides = [1, 1]} : vector<1152x32xbf16> to vector<72x32xbf16>
    %c256 = arith.constant 256 : index
    %c0_24 = arith.constant 0 : index
    %42 = vector.load %arg3[%c256, %c0_24] : memref<1088x64xbf16, #tpu.memory_space<vmem>>, vector<32x64xbf16>
    %cst_25 = arith.constant dense<0.000000e+00> : vector<72x64xf32>
    %43 = tpu.matmul %41, %42, %cst_25 {dimension_numbers = #tpu.dot_dimension_numbers<[1], [0], [0], [1], [0, 0, 1, 1], [], []>} : vector<72x32xbf16>, vector<32x64xbf16>, vector<72x64xf32> -> vector<72x64xf32>
    %44 = arith.addf %40, %43 : vector<72x64xf32>
    %45 = vector.extract_strided_slice %9 {offsets = [648, 0], sizes = [72, 32], strides = [1, 1]} : vector<1152x32xbf16> to vector<72x32xbf16>
    %c288 = arith.constant 288 : index
    %c0_26 = arith.constant 0 : index
    %46 = vector.load %arg3[%c288, %c0_26] : memref<1088x64xbf16, #tpu.memory_space<vmem>>, vector<32x64xbf16>
    %cst_27 = arith.constant dense<0.000000e+00> : vector<72x64xf32>
    %47 = tpu.matmul %45, %46, %cst_27 {dimension_numbers = #tpu.dot_dimension_numbers<[1], [0], [0], [1], [0, 0, 1, 1], [], []>} : vector<72x32xbf16>, vector<32x64xbf16>, vector<72x64xf32> -> vector<72x64xf32>
    %48 = arith.addf %44, %47 : vector<72x64xf32>
    %49 = vector.extract_strided_slice %9 {offsets = [720, 0], sizes = [72, 32], strides = [1, 1]} : vector<1152x32xbf16> to vector<72x32xbf16>
    %c320 = arith.constant 320 : index
    %c0_28 = arith.constant 0 : index
    %50 = vector.load %arg3[%c320, %c0_28] : memref<1088x64xbf16, #tpu.memory_space<vmem>>, vector<32x64xbf16>
    %cst_29 = arith.constant dense<0.000000e+00> : vector<72x64xf32>
    %51 = tpu.matmul %49, %50, %cst_29 {dimension_numbers = #tpu.dot_dimension_numbers<[1], [0], [0], [1], [0, 0, 1, 1], [], []>} : vector<72x32xbf16>, vector<32x64xbf16>, vector<72x64xf32> -> vector<72x64xf32>
    %52 = arith.addf %48, %51 : vector<72x64xf32>
    %53 = vector.extract_strided_slice %9 {offsets = [792, 0], sizes = [72, 32], strides = [1, 1]} : vector<1152x32xbf16> to vector<72x32xbf16>
    %c352 = arith.constant 352 : index
    %c0_30 = arith.constant 0 : index
    %54 = vector.load %arg3[%c352, %c0_30] : memref<1088x64xbf16, #tpu.memory_space<vmem>>, vector<32x64xbf16>
    %cst_31 = arith.constant dense<0.000000e+00> : vector<72x64xf32>
    %55 = tpu.matmul %53, %54, %cst_31 {dimension_numbers = #tpu.dot_dimension_numbers<[1], [0], [0], [1], [0, 0, 1, 1], [], []>} : vector<72x32xbf16>, vector<32x64xbf16>, vector<72x64xf32> -> vector<72x64xf32>
    %56 = arith.addf %52, %55 : vector<72x64xf32>
    %57 = vector.extract_strided_slice %9 {offsets = [864, 0], sizes = [72, 32], strides = [1, 1]} : vector<1152x32xbf16> to vector<72x32xbf16>
    %c384 = arith.constant 384 : index
    %c0_32 = arith.constant 0 : index
    %58 = vector.load %arg3[%c384, %c0_32] : memref<1088x64xbf16, #tpu.memory_space<vmem>>, vector<32x64xbf16>
    %cst_33 = arith.constant dense<0.000000e+00> : vector<72x64xf32>
    %59 = tpu.matmul %57, %58, %cst_33 {dimension_numbers = #tpu.dot_dimension_numbers<[1], [0], [0], [1], [0, 0, 1, 1], [], []>} : vector<72x32xbf16>, vector<32x64xbf16>, vector<72x64xf32> -> vector<72x64xf32>
    %60 = arith.addf %56, %59 : vector<72x64xf32>
    %61 = vector.extract_strided_slice %9 {offsets = [936, 0], sizes = [72, 32], strides = [1, 1]} : vector<1152x32xbf16> to vector<72x32xbf16>
    %c416 = arith.constant 416 : index
    %c0_34 = arith.constant 0 : index
    %62 = vector.load %arg3[%c416, %c0_34] : memref<1088x64xbf16, #tpu.memory_space<vmem>>, vector<32x64xbf16>
    %cst_35 = arith.constant dense<0.000000e+00> : vector<72x64xf32>
    %63 = tpu.matmul %61, %62, %cst_35 {dimension_numbers = #tpu.dot_dimension_numbers<[1], [0], [0], [1], [0, 0, 1, 1], [], []>} : vector<72x32xbf16>, vector<32x64xbf16>, vector<72x64xf32> -> vector<72x64xf32>
    %64 = arith.addf %60, %63 : vector<72x64xf32>
    %65 = vector.extract_strided_slice %9 {offsets = [1008, 0], sizes = [72, 32], strides = [1, 1]} : vector<1152x32xbf16> to vector<72x32xbf16>
    %c448 = arith.constant 448 : index
    %c0_36 = arith.constant 0 : index
    %66 = vector.load %arg3[%c448, %c0_36] : memref<1088x64xbf16, #tpu.memory_space<vmem>>, vector<32x64xbf16>
    %cst_37 = arith.constant dense<0.000000e+00> : vector<72x64xf32>
    %67 = tpu.matmul %65, %66, %cst_37 {dimension_numbers = #tpu.dot_dimension_numbers<[1], [0], [0], [1], [0, 0, 1, 1], [], []>} : vector<72x32xbf16>, vector<32x64xbf16>, vector<72x64xf32> -> vector<72x64xf32>
    %68 = arith.addf %64, %67 : vector<72x64xf32>
    %69 = vector.extract_strided_slice %9 {offsets = [1080, 0], sizes = [72, 32], strides = [1, 1]} : vector<1152x32xbf16> to vector<72x32xbf16>
    %c480 = arith.constant 480 : index
    %c0_38 = arith.constant 0 : index
    %70 = vector.load %arg3[%c480, %c0_38] : memref<1088x64xbf16, #tpu.memory_space<vmem>>, vector<32x64xbf16>
    %cst_39 = arith.constant dense<0.000000e+00> : vector<72x64xf32>
    %71 = tpu.matmul %69, %70, %cst_39 {dimension_numbers = #tpu.dot_dimension_numbers<[1], [0], [0], [1], [0, 0, 1, 1], [], []>} : vector<72x32xbf16>, vector<32x64xbf16>, vector<72x64xf32> -> vector<72x64xf32>
    %72 = arith.addf %68, %71 : vector<72x64xf32>
    %c1 = arith.constant 1 : index
    %c0_40 = arith.constant 0 : index
    %73 = vector.load %arg5[%c1, %c0_40] : memref<8x256xf32, #tpu.memory_space<vmem>>, vector<1x64xf32>
    %74 = vector.broadcast %73 : vector<1x64xf32> to vector<72x64xf32>
    %75 = arith.addf %72, %74 : vector<72x64xf32>
    %cst_41 = arith.constant 0.000000e+00 : f32
    %76 = vector.broadcast %cst_41 : f32 to vector<72x64xf32>
    %77 = arith.maximumf %75, %76 : vector<72x64xf32>
    %78 = arith.truncf %77 : vector<72x64xf32> to vector<72x64xbf16>
    %79 = vector.extract_strided_slice %78 {offsets = [0, 0], sizes = [8, 64], strides = [1, 1]} : vector<72x64xbf16> to vector<8x64xbf16>
    %c512 = arith.constant 512 : index
    %c0_42 = arith.constant 0 : index
    %80 = vector.load %arg3[%c512, %c0_42] : memref<1088x64xbf16, #tpu.memory_space<vmem>>, vector<64x64xbf16>
    %cst_43 = arith.constant dense<0.000000e+00> : vector<8x64xf32>
    %81 = tpu.matmul %79, %80, %cst_43 {dimension_numbers = #tpu.dot_dimension_numbers<[1], [0], [0], [1], [0, 0, 1, 1], [], []>} : vector<8x64xbf16>, vector<64x64xbf16>, vector<8x64xf32> -> vector<8x64xf32>
    %82 = vector.extract_strided_slice %78 {offsets = [8, 0], sizes = [8, 64], strides = [1, 1]} : vector<72x64xbf16> to vector<8x64xbf16>
    %c576 = arith.constant 576 : index
    %c0_44 = arith.constant 0 : index
    %83 = vector.load %arg3[%c576, %c0_44] : memref<1088x64xbf16, #tpu.memory_space<vmem>>, vector<64x64xbf16>
    %cst_45 = arith.constant dense<0.000000e+00> : vector<8x64xf32>
    %84 = tpu.matmul %82, %83, %cst_45 {dimension_numbers = #tpu.dot_dimension_numbers<[1], [0], [0], [1], [0, 0, 1, 1], [], []>} : vector<8x64xbf16>, vector<64x64xbf16>, vector<8x64xf32> -> vector<8x64xf32>
    %85 = arith.addf %81, %84 : vector<8x64xf32>
    %86 = vector.extract_strided_slice %78 {offsets = [16, 0], sizes = [8, 64], strides = [1, 1]} : vector<72x64xbf16> to vector<8x64xbf16>
    %c640 = arith.constant 640 : index
    %c0_46 = arith.constant 0 : index
    %87 = vector.load %arg3[%c640, %c0_46] : memref<1088x64xbf16, #tpu.memory_space<vmem>>, vector<64x64xbf16>
    %cst_47 = arith.constant dense<0.000000e+00> : vector<8x64xf32>
    %88 = tpu.matmul %86, %87, %cst_47 {dimension_numbers = #tpu.dot_dimension_numbers<[1], [0], [0], [1], [0, 0, 1, 1], [], []>} : vector<8x64xbf16>, vector<64x64xbf16>, vector<8x64xf32> -> vector<8x64xf32>
    %89 = arith.addf %85, %88 : vector<8x64xf32>
    %90 = vector.extract_strided_slice %78 {offsets = [24, 0], sizes = [8, 64], strides = [1, 1]} : vector<72x64xbf16> to vector<8x64xbf16>
    %c704 = arith.constant 704 : index
    %c0_48 = arith.constant 0 : index
    %91 = vector.load %arg3[%c704, %c0_48] : memref<1088x64xbf16, #tpu.memory_space<vmem>>, vector<64x64xbf16>
    %cst_49 = arith.constant dense<0.000000e+00> : vector<8x64xf32>
    %92 = tpu.matmul %90, %91, %cst_49 {dimension_numbers = #tpu.dot_dimension_numbers<[1], [0], [0], [1], [0, 0, 1, 1], [], []>} : vector<8x64xbf16>, vector<64x64xbf16>, vector<8x64xf32> -> vector<8x64xf32>
    %93 = arith.addf %89, %92 : vector<8x64xf32>
    %94 = vector.extract_strided_slice %78 {offsets = [32, 0], sizes = [8, 64], strides = [1, 1]} : vector<72x64xbf16> to vector<8x64xbf16>
    %c768 = arith.constant 768 : index
    %c0_50 = arith.constant 0 : index
    %95 = vector.load %arg3[%c768, %c0_50] : memref<1088x64xbf16, #tpu.memory_space<vmem>>, vector<64x64xbf16>
    %cst_51 = arith.constant dense<0.000000e+00> : vector<8x64xf32>
    %96 = tpu.matmul %94, %95, %cst_51 {dimension_numbers = #tpu.dot_dimension_numbers<[1], [0], [0], [1], [0, 0, 1, 1], [], []>} : vector<8x64xbf16>, vector<64x64xbf16>, vector<8x64xf32> -> vector<8x64xf32>
    %97 = arith.addf %93, %96 : vector<8x64xf32>
    %98 = vector.extract_strided_slice %78 {offsets = [40, 0], sizes = [8, 64], strides = [1, 1]} : vector<72x64xbf16> to vector<8x64xbf16>
    %c832 = arith.constant 832 : index
    %c0_52 = arith.constant 0 : index
    %99 = vector.load %arg3[%c832, %c0_52] : memref<1088x64xbf16, #tpu.memory_space<vmem>>, vector<64x64xbf16>
    %cst_53 = arith.constant dense<0.000000e+00> : vector<8x64xf32>
    %100 = tpu.matmul %98, %99, %cst_53 {dimension_numbers = #tpu.dot_dimension_numbers<[1], [0], [0], [1], [0, 0, 1, 1], [], []>} : vector<8x64xbf16>, vector<64x64xbf16>, vector<8x64xf32> -> vector<8x64xf32>
    %101 = arith.addf %97, %100 : vector<8x64xf32>
    %102 = vector.extract_strided_slice %78 {offsets = [48, 0], sizes = [8, 64], strides = [1, 1]} : vector<72x64xbf16> to vector<8x64xbf16>
    %c896 = arith.constant 896 : index
    %c0_54 = arith.constant 0 : index
    %103 = vector.load %arg3[%c896, %c0_54] : memref<1088x64xbf16, #tpu.memory_space<vmem>>, vector<64x64xbf16>
    %cst_55 = arith.constant dense<0.000000e+00> : vector<8x64xf32>
    %104 = tpu.matmul %102, %103, %cst_55 {dimension_numbers = #tpu.dot_dimension_numbers<[1], [0], [0], [1], [0, 0, 1, 1], [], []>} : vector<8x64xbf16>, vector<64x64xbf16>, vector<8x64xf32> -> vector<8x64xf32>
    %105 = arith.addf %101, %104 : vector<8x64xf32>
    %106 = vector.extract_strided_slice %78 {offsets = [56, 0], sizes = [8, 64], strides = [1, 1]} : vector<72x64xbf16> to vector<8x64xbf16>
    %c960 = arith.constant 960 : index
    %c0_56 = arith.constant 0 : index
    %107 = vector.load %arg3[%c960, %c0_56] : memref<1088x64xbf16, #tpu.memory_space<vmem>>, vector<64x64xbf16>
    %cst_57 = arith.constant dense<0.000000e+00> : vector<8x64xf32>
    %108 = tpu.matmul %106, %107, %cst_57 {dimension_numbers = #tpu.dot_dimension_numbers<[1], [0], [0], [1], [0, 0, 1, 1], [], []>} : vector<8x64xbf16>, vector<64x64xbf16>, vector<8x64xf32> -> vector<8x64xf32>
    %109 = arith.addf %105, %108 : vector<8x64xf32>
    %110 = vector.extract_strided_slice %78 {offsets = [64, 0], sizes = [8, 64], strides = [1, 1]} : vector<72x64xbf16> to vector<8x64xbf16>
    %c1024 = arith.constant 1024 : index
    %c0_58 = arith.constant 0 : index
    %111 = vector.load %arg3[%c1024, %c0_58] : memref<1088x64xbf16, #tpu.memory_space<vmem>>, vector<64x64xbf16>
    %cst_59 = arith.constant dense<0.000000e+00> : vector<8x64xf32>
    %112 = tpu.matmul %110, %111, %cst_59 {dimension_numbers = #tpu.dot_dimension_numbers<[1], [0], [0], [1], [0, 0, 1, 1], [], []>} : vector<8x64xbf16>, vector<64x64xbf16>, vector<8x64xf32> -> vector<8x64xf32>
    %113 = arith.addf %109, %112 : vector<8x64xf32>
    %c2 = arith.constant 2 : index
    %c0_60 = arith.constant 0 : index
    %114 = vector.load %arg5[%c2, %c0_60] : memref<8x256xf32, #tpu.memory_space<vmem>>, vector<1x64xf32>
    %115 = vector.broadcast %114 : vector<1x64xf32> to vector<8x64xf32>
    %116 = arith.addf %113, %115 : vector<8x64xf32>
    %cst_61 = arith.constant 0.000000e+00 : f32
    %117 = vector.broadcast %cst_61 : f32 to vector<8x64xf32>
    %118 = arith.maximumf %116, %117 : vector<8x64xf32>
    %119 = arith.truncf %118 : vector<8x64xf32> to vector<8x64xbf16>
    %c0_62 = arith.constant 0 : index
    %c0_63 = arith.constant 0 : index
    %120 = vector.load %arg4[%c0_62, %c0_63] : memref<320x256xbf16, #tpu.memory_space<vmem>>, vector<64x256xbf16>
    %cst_64 = arith.constant dense<0.000000e+00> : vector<8x256xf32>
    %121 = tpu.matmul %119, %120, %cst_64 {dimension_numbers = #tpu.dot_dimension_numbers<[1], [0], [0], [1], [0, 0, 1, 1], [], []>} : vector<8x64xbf16>, vector<64x256xbf16>, vector<8x256xf32> -> vector<8x256xf32>
    %c3 = arith.constant 3 : index
    %c0_65 = arith.constant 0 : index
    %122 = vector.load %arg5[%c3, %c0_65] : memref<8x256xf32, #tpu.memory_space<vmem>>, vector<1x256xf32>
    %123 = vector.broadcast %122 : vector<1x256xf32> to vector<8x256xf32>
    %124 = arith.addf %121, %123 : vector<8x256xf32>
    %cst_66 = arith.constant 0.000000e+00 : f32
    %125 = vector.broadcast %cst_66 : f32 to vector<8x256xf32>
    %126 = arith.maximumf %124, %125 : vector<8x256xf32>
    %127 = arith.truncf %126 : vector<8x256xf32> to vector<8x256xbf16>
    %c64_67 = arith.constant 64 : index
    %c0_68 = arith.constant 0 : index
    %128 = vector.load %arg4[%c64_67, %c0_68] : memref<320x256xbf16, #tpu.memory_space<vmem>>, vector<256x128xbf16>
    %cst_69 = arith.constant dense<0.000000e+00> : vector<8x128xf32>
    %129 = tpu.matmul %127, %128, %cst_69 {dimension_numbers = #tpu.dot_dimension_numbers<[1], [0], [0], [1], [0, 0, 1, 1], [], []>} : vector<8x256xbf16>, vector<256x128xbf16>, vector<8x128xf32> -> vector<8x128xf32>
    %c4 = arith.constant 4 : index
    %c0_70 = arith.constant 0 : index
    %130 = vector.load %arg5[%c4, %c0_70] : memref<8x256xf32, #tpu.memory_space<vmem>>, vector<1x128xf32>
    %131 = vector.broadcast %130 : vector<1x128xf32> to vector<8x128xf32>
    %132 = arith.addf %129, %131 : vector<8x128xf32>
    %133 = vector.extract_strided_slice %132 {offsets = [0, 0], sizes = [8, 1], strides = [1, 1]} : vector<8x128xf32> to vector<8x1xf32>
    %134 = tpu.iota {dimensions = array<i32: 1>} : vector<8x128xi32>
    %c1_i32 = arith.constant 1 : i32
    %135 = vector.broadcast %c1_i32 : i32 to vector<8x128xi32>
    %136 = arith.cmpi sge, %134, %135 : vector<8x128xi32>
    %c7_i32 = arith.constant 7 : i32
    %137 = vector.broadcast %c7_i32 : i32 to vector<8x128xi32>
    %138 = arith.cmpi slt, %134, %137 : vector<8x128xi32>
    %139 = arith.andi %136, %138 : vector<8x128xi1>
    %cst_71 = arith.constant 0.000000e+00 : f32
    %140 = vector.broadcast %cst_71 : f32 to vector<8x128xf32>
    %141 = arith.select %139, %132, %140 : vector<8x128xi1>, vector<8x128xf32>
    %cst_72 = arith.constant dense<0.000000e+00> : vector<8xf32>
    %142 = vector.multi_reduction <add>, %141, %cst_72 [1] : vector<8x128xf32> to vector<8xf32>
    %143 = vector.shape_cast %142 : vector<8xf32> to vector<8x1xf32>
    %cst_73 = arith.constant 0.166666672 : f32
    %144 = vector.broadcast %cst_73 : f32 to vector<8x1xf32>
    %145 = arith.mulf %143, %144 : vector<8x1xf32>
    %146 = vector.broadcast %133 : vector<8x1xf32> to vector<8x128xf32>
    %147 = arith.addf %146, %132 : vector<8x128xf32>
    %148 = vector.broadcast %145 : vector<8x1xf32> to vector<8x128xf32>
    %149 = arith.subf %147, %148 : vector<8x128xf32>
    %c0_74 = arith.constant 0 : index
    %c0_75 = arith.constant 0 : index
    %150 = vector.load %arg6[%c0_74, %c0_75] : memref<8x128xf32, #tpu.memory_space<vmem>>, vector<8x128xf32>
    tpu.vector_store %arg6[%c0_74, %c0_75], %149 {strides = array<i32>} : memref<8x128xf32, #tpu.memory_space<vmem>>, vector<8x128xf32>,
    return
  }
  func.func @transform_0(%arg0: i32) -> (i32, i32, i32) {
    %c0_i32 = arith.constant 0 : i32
    %c0_i32_0 = arith.constant 0 : i32
    %c0_i32_1 = arith.constant 0 : i32
    return %arg0, %c0_i32, %c0_i32_0 : i32, i32, i32
  }
  func.func @transform_1(%arg0: i32) -> (i32, i32) {
    %c0_i32 = arith.constant 0 : i32
    %c0_i32_0 = arith.constant 0 : i32
    %c0_i32_1 = arith.constant 0 : i32
    return %c0_i32, %c0_i32_0 : i32, i32
  }
  func.func @transform_2(%arg0: i32) -> (i32, i32) {
    %c0_i32 = arith.constant 0 : i32
    %c0_i32_0 = arith.constant 0 : i32
    %c0_i32_1 = arith.constant 0 : i32
    return %c0_i32, %c0_i32_0 : i32, i32
  }
  func.func @transform_3(%arg0: i32) -> (i32, i32) {
    %c0_i32 = arith.constant 0 : i32
    %c0_i32_0 = arith.constant 0 : i32
    %c0_i32_1 = arith.constant 0 : i32
    return %c0_i32, %c0_i32_0 : i32, i32
  }
  func.func @transform_4(%arg0: i32) -> (i32, i32) {
    %c0_i32 = arith.constant 0 : i32
    %c0_i32_0 = arith.constant 0 : i32
    %c0_i32_1 = arith.constant 0 : i32
    return %c0_i32, %c0_i32_0 : i32, i32
  }
  func.func @transform_5(%arg0: i32) -> (i32, i32) {
    %c0_i32 = arith.constant 0 : i32
    %c0_i32_0 = arith.constant 0 : i32
    return %arg0, %c0_i32 : i32, i32
  }
}

</mosaic_0001>

<bundles_post_ra>
// kernel: dueling_dqn_forward.1
= control target key start
LH: loop header
LB: loop body
LE: loop exit
PB: predicated region body
PF: predicated region fallthrough
CT: control target
= control target key end

     0   :  { %vm2083_vm0 = vcmask 261120   ;;  %vm3627_vm1 = vcmask 523264   ;;  %s7747_s1 = inlined_call_operand.vmem [shape: bf16[256,32], index: 1, kind: input, shape index: {}]   ;;  %s7748_s0 = inlined_call_operand.vmem [shape: bf16[1,1152,256], index: 0, kind: input, shape index: {}]   ;;  %s7749_s4 = inlined_call_operand.vmem [shape: f32[8,256], index: 4, kind: input, shape index: {}]   ;;  %s7750_s2 = inlined_call_operand.vmem [shape: bf16[1088,64], index: 2, kind: input, shape index: {}]   ;;  %s7751_s3 = inlined_call_operand.vmem [shape: bf16[320,256], index: 3, kind: input, shape index: {}]   ;;  %s7752_s5 = inlined_call_operand.vmem [shape: f32[8,128], index: 5, kind: output, shape index: {}]  }
   0x1   :  { %v5546_v0 = vld [vmem:[%s7747_s1 + $0x38] sm:$0xff]  ;;  %v5545_v2 = vld [vmem:[%s7747_s1 + $0x30] sm:$0xff]  ;;  %v5544_v4 = vld [vmem:[%s7747_s1 + $0x28] sm:$0xff] }
   0x2   :  { %v5554_v1 = vld [vmem:[%s7747_s1 + $0x78] sm:$0xff]  ;;  %1014 = vmatpush.bf16.msra.mxu0 %v5546_v0  ;;  %5647 = vmatpush.bf16.msra.mxu3 %v5546_v0  ;;  %v5553_v3 = vld [vmem:[%s7747_s1 + $0x70] sm:$0xff]  ;;  %v5552_v5 = vld [vmem:[%s7747_s1 + $0x68] sm:$0xff] }
   0x3   :  { %1383 = vmatpush.bf16.msra.mxu1 %v5554_v1  ;;  %5655 = vmatpush.bf16.msra.mxu2 %v5554_v1  ;;  %v5543_v6 = vld [vmem:[%s7747_s1 + $0x20] sm:$0xff]  ;;  %v5542_v8 = vld [vmem:[%s7747_s1 + $0x18] sm:$0xff]  ;;  %v5541_v10 = vld [vmem:[%s7747_s1 + $0x10] sm:$0xff] }
   0x4   :  { %v5551_v7 = vld [vmem:[%s7747_s1 + $0x60] sm:$0xff]  ;;  %v5550_v9 = vld [vmem:[%s7747_s1 + $0x58] sm:$0xff]  ;;  %v5549_v11 = vld [vmem:[%s7747_s1 + $0x50] sm:$0xff] }
   0x5   :  { %v5540_v12 = vld [vmem:[%s7747_s1 + $0x8] sm:$0xff]  ;;  %v5539_v14 = vld [vmem:[%s7747_s1] sm:$0xff]  ;;  %v4305_v28 = vld [vmem:[%s7748_s0 + $0x10] sm:$0xf] }
   0x6   :  { %1015 = vmatpush.bf16.msra.mxu0 %v5545_v2  ;;  %5648 = vmatpush.bf16.msra.mxu3 %v5545_v2  ;;  %v5548_v13 = vld [vmem:[%s7747_s1 + $0x48] sm:$0xff]  ;;  %v5547_v15 = vld [vmem:[%s7747_s1 + $0x40] sm:$0xff]  ;;  %v5398_v29 = vld [vmem:[%s7748_s0 + $0x14] sm:$0xf0] }
   0x7   :  { %1384 = vmatpush.bf16.msra.mxu1 %v5553_v3  ;;  %5656 = vmatpush.bf16.msra.mxu2 %v5553_v3  ;;  %v4297_v16 = vld [vmem:[%s7748_s0] sm:$0xf]  ;;  %v5396_v17 = vld [vmem:[%s7748_s0 + $0x4] sm:$0xf0]  ;;  %v5395_v20 = vld [vmem:[%s7748_s0 + $0x4] sm:$0xf]  ;;  %v4306_v36 = vor.u32 %v5398_v29, %v4305_v28 }
   0x8   :  { %v4777_v18 = vld [vmem:[%s7748_s0 + $0x3c0] sm:$0xf]  ;;  %v5516_v19 = vld [vmem:[%s7748_s0 + $0x3c4] sm:$0xf0]  ;;  %v4299_v21 = vld [vmem:[%s7748_s0 + $0x8] sm:$0xf0]  ;;  %v4298_v24 = vor.u32 %v5396_v17, %v4297_v16 }
   0x9   :  { %v5515_v22 = vld [vmem:[%s7748_s0 + $0x3c4] sm:$0xf]  ;;  %v4779_v23 = vld [vmem:[%s7748_s0 + $0x3c8] sm:$0xf0]  ;;  %v4778_v25 = vor.u32 %v5516_v19, %v4777_v18  ;;  %v4302_v26 = vor.u32 %v5395_v20, %v4299_v21  ;;  %v4785_v30 = vld [vmem:[%s7748_s0 + $0x3d0] sm:$0xf] }
   0xa   :  { %1016 = vmatpush.bf16.msra.mxu0 %v5544_v4  ;;  %5649 = vmatpush.bf16.msra.mxu3 %v5544_v4  ;;  %v4782_v27 = vor.u32 %v5515_v22, %v4779_v23  ;;  %v5518_v31 = vld [vmem:[%s7748_s0 + $0x3d4] sm:$0xf0]  ;;  %v5397_v32 = vld [vmem:[%s7748_s0 + $0x14] sm:$0xf]  ;;  %v4307_v33 = vld [vmem:[%s7748_s0 + $0x18] sm:$0xf0] }
   0xb   :  { %1385 = vmatpush.bf16.msra.mxu1 %v5552_v5  ;;  %5657 = vmatpush.bf16.msra.mxu2 %v5552_v5  ;;  %v5517_v34 = vld [vmem:[%s7748_s0 + $0x3d4] sm:$0xf]  ;;  %v4787_v35 = vld [vmem:[%s7748_s0 + $0x3d8] sm:$0xf0]  ;;  %v4786_v37 = vor.u32 %v5518_v31, %v4785_v30  ;;  %v4310_v38 = vor.u32 %v5397_v32, %v4307_v33  ;;  %v4313_v40 = vld [vmem:[%s7748_s0 + $0x20] sm:$0xf] }
   0xc   :  { %v4790_v39 = vor.u32 %v5517_v34, %v4787_v35  ;;  %v5400_v41 = vld [vmem:[%s7748_s0 + $0x24] sm:$0xf0]  ;;  %v4793_v42 = vld [vmem:[%s7748_s0 + $0x3e0] sm:$0xf]  ;;  %v5399_v44 = vld [vmem:[%s7748_s0 + $0x24] sm:$0xf] }
   0xd   :  { %v5520_v43 = vld [vmem:[%s7748_s0 + $0x3e4] sm:$0xf0]  ;;  %v4315_v45 = vld [vmem:[%s7748_s0 + $0x28] sm:$0xf0]  ;;  %v5519_v46 = vld [vmem:[%s7748_s0 + $0x3e4] sm:$0xf]  ;;  %v4314_v48 = vor.u32 %v5400_v41, %v4313_v40 }
   0xe   :  { %1017 = vmatpush.bf16.msra.mxu0 %v5543_v6  ;;  %5650 = vmatpush.bf16.msra.mxu3 %v5543_v6  ;;  %v4795_v47 = vld [vmem:[%s7748_s0 + $0x3e8] sm:$0xf0]  ;;  %v4794_v49 = vor.u32 %v5520_v43, %v4793_v42  ;;  %v4318_v50 = vor.u32 %v5399_v44, %v4315_v45  ;;  %v4321_v52 = vld [vmem:[%s7748_s0 + $0x30] sm:$0xf]  ;;  %v5402_v53 = vld [vmem:[%s7748_s0 + $0x34] sm:$0xf0] }
   0xf   :  { %1386 = vmatpush.bf16.msra.mxu1 %v5551_v7  ;;  %5658 = vmatpush.bf16.msra.mxu2 %v5551_v7  ;;  %v4798_v51 = vor.u32 %v5519_v46, %v4795_v47  ;;  %v4801_v54 = vld [vmem:[%s7748_s0 + $0x3f0] sm:$0xf]  ;;  %v5522_v55 = vld [vmem:[%s7748_s0 + $0x3f4] sm:$0xf0]  ;;  %v5401_v56 = vld [vmem:[%s7748_s0 + $0x34] sm:$0xf]  ;;  %v4322_v60 = vor.u32 %v5402_v53, %v4321_v52 }
  0x10   :  { %v4323_v57 = vld [vmem:[%s7748_s0 + $0x38] sm:$0xf0]  ;;  %v5521_v58 = vld [vmem:[%s7748_s0 + $0x3f4] sm:$0xf]  ;;  %v4802_v61 = vor.u32 %v5522_v55, %v4801_v54  ;;  %v4329_v0 = vld [vmem:[%s7748_s0 + $0x40] sm:$0xf] }
  0x11   :  { %v4803_v59 = vld [vmem:[%s7748_s0 + $0x3f8] sm:$0xf0]  ;;  %v4326_v62 = vor.u32 %v5401_v56, %v4323_v57  ;;  %v5404_v1 = vld [vmem:[%s7748_s0 + $0x44] sm:$0xf0]  ;;  %v4809_v2 = vld [vmem:[%s7748_s0 + $0x400] sm:$0xf] }
  0x12   :  { %1018 = vmatpush.bf16.msra.mxu0 %v5542_v8  ;;  %5651 = vmatpush.bf16.msra.mxu3 %v5542_v8  ;;  %v4806_v63 = vor.u32 %v5521_v58, %v4803_v59  ;;  %v5524_v3 = vld [vmem:[%s7748_s0 + $0x404] sm:$0xf0]  ;;  %v5403_v4 = vld [vmem:[%s7748_s0 + $0x44] sm:$0xf]  ;;  %v4331_v5 = vld [vmem:[%s7748_s0 + $0x48] sm:$0xf0]  ;;  %v4330_v8 = vor.u32 %v5404_v1, %v4329_v0 }
  0x13   :  { %1387 = vmatpush.bf16.msra.mxu1 %v5550_v9  ;;  %5659 = vmatpush.bf16.msra.mxu2 %v5550_v9  ;;  %v5523_v6 = vld [vmem:[%s7748_s0 + $0x404] sm:$0xf]  ;;  %v4811_v7 = vld [vmem:[%s7748_s0 + $0x408] sm:$0xf0]  ;;  %v4810_v9 = vor.u32 %v5524_v3, %v4809_v2  ;;  %v5405_v16 = vld [vmem:[%s7748_s0 + $0x54] sm:$0xf] }
  0x14   :  { %v4339_v17 = vld [vmem:[%s7748_s0 + $0x58] sm:$0xf0]  ;;  %v5525_v18 = vld [vmem:[%s7748_s0 + $0x414] sm:$0xf]  ;;  %v5407_v28 = vld [vmem:[%s7748_s0 + $0x64] sm:$0xf] }
  0x15   :  { %v4819_v19 = vld [vmem:[%s7748_s0 + $0x418] sm:$0xf0]  ;;  %v4342_v22 = vor.u32 %v5405_v16, %v4339_v17  ;;  %v4347_v29 = vld [vmem:[%s7748_s0 + $0x68] sm:$0xf0]  ;;  %v5527_v30 = vld [vmem:[%s7748_s0 + $0x424] sm:$0xf] }
  0x16   :  { %1019 = vmatpush.bf16.msra.mxu0 %v5541_v10  ;;  %5652 = vmatpush.bf16.msra.mxu3 %v5541_v10  ;;  %v4334_v10 = vor.u32 %v5403_v4, %v4331_v5  ;;  %v4822_v23 = vor.u32 %v5525_v18, %v4819_v19  ;;  %v4827_v31 = vld [vmem:[%s7748_s0 + $0x428] sm:$0xf0]  ;;  %v4350_v34 = vor.u32 %v5407_v28, %v4347_v29  ;;  %v5409_v40 = vld [vmem:[%s7748_s0 + $0x74] sm:$0xf]  ;;  %v4355_v41 = vld [vmem:[%s7748_s0 + $0x78] sm:$0xf0] }
  0x17   :  { %1388 = vmatpush.bf16.msra.mxu1 %v5549_v11  ;;  %5660 = vmatpush.bf16.msra.mxu2 %v5549_v11  ;;  %v4814_v11 = vor.u32 %v5523_v6, %v4811_v7  ;;  %v4830_v35 = vor.u32 %v5527_v30, %v4827_v31  ;;  %v5529_v42 = vld [vmem:[%s7748_s0 + $0x434] sm:$0xf]  ;;  %v4835_v43 = vld [vmem:[%s7748_s0 + $0x438] sm:$0xf0]  ;;  %v4358_v46 = vor.u32 %v5409_v40, %v4355_v41  ;;  %v5411_v52 = vld [vmem:[%s7748_s0 + $0x84] sm:$0xf] }
  0x18   :  { %v4838_v47 = vor.u32 %v5529_v42, %v4835_v43  ;;  %v4363_v53 = vld [vmem:[%s7748_s0 + $0x88] sm:$0xf0]  ;;  %v5531_v54 = vld [vmem:[%s7748_s0 + $0x444] sm:$0xf]  ;;  %v4369_v5 = vld [vmem:[%s7748_s0 + $0x90] sm:$0xf] }
  0x19   :  { %v4843_v55 = vld [vmem:[%s7748_s0 + $0x448] sm:$0xf0]  ;;  %v4366_v59 = vor.u32 %v5411_v52, %v4363_v53  ;;  %v5414_v6 = vld [vmem:[%s7748_s0 + $0x94] sm:$0xf0]  ;;  %v4849_v7 = vld [vmem:[%s7748_s0 + $0x450] sm:$0xf] }
  0x1a   :  { %1020 = vmatpush.bf16.msra.mxu0 %v5540_v12  ;;  %5653 = vmatpush.bf16.msra.mxu3 %v5540_v12  ;;  %v4337_v12 = vld [vmem:[%s7748_s0 + $0x50] sm:$0xf]  ;;  %v4377_v31 = vld [vmem:[%s7748_s0 + $0xa0] sm:$0xf]  ;;  %v5535_v41 = vld [vmem:[%s7748_s0 + $0x464] sm:$0xf] }
  0x1b   :  { %1389 = vmatpush.bf16.msra.mxu1 %v5548_v13  ;;  %5661 = vmatpush.bf16.msra.mxu2 %v5548_v13  ;;  %v5406_v13 = vld [vmem:[%s7748_s0 + $0x54] sm:$0xf0]  ;;  %v4859_v42 = vld [vmem:[%s7748_s0 + $0x468] sm:$0xf0] }
  0x1c   :  { %v4338_v20 = vor.u32 %v5406_v13, %v4337_v12  ;;  %v4851_v12 = vld [vmem:[%s7748_s0 + $0x458] sm:$0xf0]  ;;  %v4862_v52 = vor.u32 %v5535_v41, %v4859_v42 }
  0x1e   :  { %1021 = vmatpush.bf16.msra.mxu0 %v5539_v14  ;;  %5654 = vmatpush.bf16.msra.mxu3 %v5539_v14  ;;  %v4817_v14 = vld [vmem:[%s7748_s0 + $0x410] sm:$0xf] }
  0x1f   :  { %1390 = vmatpush.bf16.msra.mxu1 %v5547_v15  ;;  %5662 = vmatpush.bf16.msra.mxu2 %v5547_v15  ;;  %v5526_v15 = vld [vmem:[%s7748_s0 + $0x414] sm:$0xf0] }
  0x20   :  { %v4818_v21 = vor.u32 %v5526_v15, %v4817_v14  ;;  %v4370_v15 = vor.u32 %v5414_v6, %v4369_v5  ;;  %v5418_v5 = vld [vmem:[%s7748_s0 + $0xb4] sm:$0xf0]  ;;  %v4865_v6 = vld [vmem:[%s7748_s0 + $0x470] sm:$0xf] }
  0x21   :  { %1022 = vmatmul.bf16.vlgmr.msra.gmra.mxu0 %v4298_v24  ;;  %1322 = vmatmul.bf16.vlgmr.msra.gmra.mxu3 %v4778_v25  ;;  %v4345_v24 = vld [vmem:[%s7748_s0 + $0x60] sm:$0xf]  ;;  %v5408_v25 = vld [vmem:[%s7748_s0 + $0x64] sm:$0xf0] }
  0x22   :  { %1391 = vmatmul.bf16.vlgmr.msra.gmra.mxu1 %v4302_v26  ;;  %1691 = vmatmul.bf16.vlgmr.msra.gmra.mxu2 %v4782_v27  ;;  %v4825_v26 = vld [vmem:[%s7748_s0 + $0x420] sm:$0xf]  ;;  %v5528_v27 = vld [vmem:[%s7748_s0 + $0x424] sm:$0xf0]  ;;  %v4346_v32 = vor.u32 %v5408_v25, %v4345_v24 }
  0x23   :  { %v4826_v33 = vor.u32 %v5528_v27, %v4825_v26 }
  0x31   :  { %1027 = vmatmul.bf16.gmra.mxu0 %v4306_v36  ;;  %1327 = vmatmul.bf16.gmra.mxu3 %v4786_v37  ;;  %v4353_v36 = vld [vmem:[%s7748_s0 + $0x70] sm:$0xf]  ;;  %v5410_v37 = vld [vmem:[%s7748_s0 + $0x74] sm:$0xf0] }
  0x32   :  { %1396 = vmatmul.bf16.gmra.mxu1 %v4310_v38  ;;  %1696 = vmatmul.bf16.gmra.mxu2 %v4790_v39  ;;  %v4833_v38 = vld [vmem:[%s7748_s0 + $0x430] sm:$0xf]  ;;  %v5530_v39 = vld [vmem:[%s7748_s0 + $0x434] sm:$0xf0]  ;;  %v4354_v44 = vor.u32 %v5410_v37, %v4353_v36  ;;  %v5536_v36 = vld [vmem:[%s7748_s0 + $0x464] sm:$0xf0] }
  0x33   :  { %v4834_v45 = vor.u32 %v5530_v39, %v4833_v38  ;;  %v5415_v37 = vld [vmem:[%s7748_s0 + $0xa4] sm:$0xf]  ;;  %v4379_v38 = vld [vmem:[%s7748_s0 + $0xa8] sm:$0xf0] }
  0x41   :  { %1032 = vmatmul.bf16.gmra.mxu0 %v4314_v48  ;;  %1332 = vmatmul.bf16.gmra.mxu3 %v4794_v49  ;;  %v4361_v48 = vld [vmem:[%s7748_s0 + $0x80] sm:$0xf]  ;;  %v5412_v49 = vld [vmem:[%s7748_s0 + $0x84] sm:$0xf0] }
  0x42   :  { %1401 = vmatmul.bf16.gmra.mxu1 %v4318_v50  ;;  %1701 = vmatmul.bf16.gmra.mxu2 %v4798_v51  ;;  %v4841_v50 = vld [vmem:[%s7748_s0 + $0x440] sm:$0xf]  ;;  %v5532_v51 = vld [vmem:[%s7748_s0 + $0x444] sm:$0xf0]  ;;  %v4362_v56 = vor.u32 %v5412_v49, %v4361_v48 }
  0x43   :  { %v4842_v57 = vor.u32 %v5532_v51, %v4841_v50  ;;  %v5555_v49 = vld [vmem:[%s7750_s2] sm:$0xff]  ;;  %v4382_v51 = vor.u32 %v5415_v37, %v4379_v38 }
  0x51   :  { %1037 = vmatmul.bf16.gmra.mxu0 %v4322_v60  ;;  %1337 = vmatmul.bf16.gmra.mxu3 %v4802_v61  ;;  %v4846_v60 = vor.u32 %v5531_v54, %v4843_v55 }
  0x52   :  { %1406 = vmatmul.bf16.gmra.mxu1 %v4326_v62  ;;  %1706 = vmatmul.bf16.gmra.mxu2 %v4806_v63  ;;  %v5970_v62 = vld [vmem:[%s7749_s4] ss:$0 sm:$0xff] }
  0x61   :  { %1042 = vmatmul.bf16.gmra.mxu0 %v4330_v8  ;;  %1342 = vmatmul.bf16.gmra.mxu3 %v4810_v9  ;;  %v5534_v8 = vld [vmem:[%s7748_s0 + $0x454] sm:$0xf0]  ;;  %v5413_v9 = vld [vmem:[%s7748_s0 + $0x94] sm:$0xf] }
  0x62   :  { %1411 = vmatmul.bf16.gmra.mxu1 %v4334_v10  ;;  %1711 = vmatmul.bf16.gmra.mxu2 %v4814_v11  ;;  %v4371_v10 = vld [vmem:[%s7748_s0 + $0x98] sm:$0xf0]  ;;  %v5533_v11 = vld [vmem:[%s7748_s0 + $0x454] sm:$0xf]  ;;  %v4850_v16 = vor.u32 %v5534_v8, %v4849_v7 }
  0x63   :  { %v4374_v19 = vor.u32 %v5413_v9, %v4371_v10  ;;  %v5538_v9 = vld [vmem:[%s7748_s0 + $0x474] sm:$0xf0]  ;;  %v5417_v10 = vld [vmem:[%s7748_s0 + $0xb4] sm:$0xf] }
  0x71   :  { %1047 = vmatmul.bf16.gmra.mxu0 %v4338_v20  ;;  %1347 = vmatmul.bf16.gmra.mxu3 %v4818_v21  ;;  %v4854_v20 = vor.u32 %v5533_v11, %v4851_v12  ;;  %v4387_v11 = vld [vmem:[%s7748_s0 + $0xb8] sm:$0xf0] }
  0x72   :  { %1416 = vmatmul.bf16.gmra.mxu1 %v4342_v22  ;;  %1716 = vmatmul.bf16.gmra.mxu2 %v4822_v23 }
  0x81   :  { %1052 = vmatmul.bf16.gmra.mxu0 %v4346_v32  ;;  %1352 = vmatmul.bf16.gmra.mxu3 %v4826_v33  ;;  %v5416_v32 = vld [vmem:[%s7748_s0 + $0xa4] sm:$0xf0] }
  0x82   :  { %1421 = vmatmul.bf16.gmra.mxu1 %v4350_v34  ;;  %1721 = vmatmul.bf16.gmra.mxu2 %v4830_v35  ;;  %v5556_v34 = vld [vmem:[%s7750_s2 + $0x8] sm:$0xff]  ;;  %v4857_v35 = vld [vmem:[%s7748_s0 + $0x460] sm:$0xf] }
  0x83   :  { %2188 = vmatpush.bf16.msrb.mxu3 %v5556_v34  ;;  %v5558_v34 = vld [vmem:[%s7750_s2 + $0x18] sm:$0xff] }
  0x84   :  { %2105 = vmatpush.bf16.msrb.mxu2 %v5558_v34 }
  0x87   :  { %2189 = vmatpush.bf16.msrb.mxu3 %v5555_v49 }
  0x91   :  { %1057 = vmatmul.bf16.gmra.mxu0 %v4354_v44  ;;  %1357 = vmatmul.bf16.gmra.mxu3 %v4834_v45  ;;  %v4378_v45 = vor.u32 %v5416_v32, %v4377_v31 }
  0x92   :  { %1426 = vmatmul.bf16.gmra.mxu1 %v4358_v46  ;;  %1726 = vmatmul.bf16.gmra.mxu2 %v4838_v47  ;;  %v4858_v46 = vor.u32 %v5536_v36, %v4857_v35 }
  0x9e   :  { %v5963_v58 = vpop.f32.mrf.mxu0 }
  0x9f   :  { %v5965_v61 = vpop.f32.mrf.mxu1 }
  0xa1   :  { %1062 = vmatmul.bf16.gmra.mxu0 %v4362_v56  ;;  %1362 = vmatmul.bf16.gmra.mxu3 %v4842_v57 }
  0xa2   :  { %1431 = vmatmul.bf16.gmra.mxu1 %v4366_v59  ;;  %1731 = vmatmul.bf16.gmra.mxu2 %v4846_v60 }
  0xa4   :  { %v1323_v63 = vpop.f32.mrf.mxu3 }
  0xa5   :  { %v1324_v0 = vadd.f32 %v1323_v63, %v5970_v62  ;;  %v1692_v1 = vpop.f32.mrf.mxu2 }
  0xa6   :  { %v5973_v2 = vpop.f32.mrf.mxu0 }
  0xa7   :  { %v5975_v3 = vpop.f32.mrf.mxu1  ;;  %v5977_v4 = vadd.f32 %v1692_v1, %v1324_v0  ;;  %v4385_v1 = vld [vmem:[%s7748_s0 + $0xb0] sm:$0xf]  ;;  %v1026_v12 = vadd.f32 %v5973_v2, %v5970_v62 }
  0xac   :  { %v1325_v13 = vpop.f32.mrf.mxu3 }
  0xad   :  { %v1326_v14 = vadd.f32 %v1325_v13, %v5970_v62  ;;  %v1694_v17 = vpop.f32.mrf.mxu2 }
  0xae   :  { %v6004_v18 = vpop.f32.mrf.mxu0 }
  0xaf   :  { %v6006_v21 = vpop.f32.mrf.mxu1  ;;  %v1695_v22 = vadd.f32 %v1694_v17, %v1326_v14  ;;  %v5537_v14 = vld [vmem:[%s7748_s0 + $0x474] sm:$0xf] }
  0xb1   :  { %1067 = vmatmul.bf16.gmra.mxu0 %v4370_v15  ;;  %1367 = vmatmul.bf16.gmra.mxu3 %v4850_v16  ;;  %v1873_v23 = vmax.f32 %v1695_v22, 0.0  ;;  %v4867_v15 = vld [vmem:[%s7748_s0 + $0x478] sm:$0xf0]  ;;  %v1024_v16 = vadd.f32 %v5963_v58, %v5970_v62 }
  0xb2   :  { %1436 = vmatmul.bf16.gmra.mxu1 %v4374_v19  ;;  %1736 = vmatmul.bf16.gmra.mxu2 %v4854_v20  ;;  %v4386_v19 = vor.u32 %v5418_v5, %v4385_v1  ;;  %v4866_v20 = vor.u32 %v5538_v9, %v4865_v6 }
  0xb3   :  { %v2017_v29 = vpack.c.bf16 %v1873_v23, %v1873_v23  ;;  %v1393_v32 = vadd.f32 %v5965_v61, %v1024_v16 }
  0xb4   :  { %v1328_v24 = vpop.f32.mrf.mxu3 }
  0xb5   :  { %v1329_v25 = vadd.f32 %v1328_v24, %v5970_v62  ;;  %v1697_v26 = vpop.f32.mrf.mxu2  ;;  %v3288_v39 = vunpack.c.l.b16 %v2017_v29  ;;  %v1395_v29 = vadd.f32 %v5975_v3, %v1026_v12  ;;  %v1752_v36 = vmax.f32 %v1393_v32, 0.0  ;;  %v4401_v32 = vld [vmem:[%s7748_s0 + $0xd0] sm:$0xf] }
  0xb6   :  { %v6009_v27 = vpop.f32.mrf.mxu0 }
  0xb7   :  { %v6011_v28 = vpop.f32.mrf.mxu1  ;;  %v1698_v30 = vadd.f32 %v1697_v26, %v1329_v25  ;;  %v4390_v25 = vor.u32 %v5417_v10, %v4387_v11  ;;  %v4870_v26 = vor.u32 %v5537_v14, %v4867_v15  ;;  %v1896_v41 = vpack.c.bf16 %v1752_v36, %v1752_v36  ;;  %v4403_v36 = vld [vmem:[%s7748_s0 + $0xd8] sm:$0xf0] }
  0xb9   :  { %v1874_v33 = vmax.f32 %v1698_v30, 0.0 }
  0xbb   :  { %v2018_v40 = vpack.c.bf16 %v1874_v33, %v1874_v33  ;;  %v1753_v33 = vmax.f32 %v1395_v29, 0.0 }
  0xbc   :  { %v1330_v43 = vpop.f32.mrf.mxu3 }
  0xbd   :  { %v1331_v44 = vadd.f32 %v1330_v43, %v5970_v62  ;;  %v3289_v47 = vunpack.c.l.b16 %v2018_v40  ;;  %v1699_v48 = vpop.f32.mrf.mxu2  ;;  %v1897_v61 = vpack.c.bf16 %v1753_v33, %v1753_v33  ;;  %v5557_v40 = vld [vmem:[%s7750_s2 + $0x10] sm:$0xff]  ;;  %v1031_v43 = vadd.f32 %v6009_v27, %v5970_v62  ;;  %v5422_v33 = vld [vmem:[%s7748_s0 + $0xd4] sm:$0xf0] }
  0xbe   :  { %v6044_v50 = vpop.f32.mrf.mxu0  ;;  %2106 = vmatpush.bf16.msrb.mxu2 %v5557_v40  ;;  %v1029_v27 = vadd.f32 %v6004_v18, %v5970_v62 }
  0xbf   :  { %v6046_v53 = vpop.f32.mrf.mxu1  ;;  %v6048_v54 = vpack.c.b16 %v3289_v47, %v3288_v39  ;;  %v1700_v55 = vadd.f32 %v1699_v48, %v1331_v44  ;;  %v4393_v44 = vld [vmem:[%s7748_s0 + $0xc0] sm:$0xf]  ;;  %v5419_v47 = vld [vmem:[%s7748_s0 + $0xc4] sm:$0xf]  ;;  %v4395_v48 = vld [vmem:[%s7748_s0 + $0xc8] sm:$0xf0] }
  0xc0   :  { %v4398_v1 = vor.u32 %v5419_v47, %v4395_v48  ;;  %v1398_v9 = vadd.f32 %v6006_v21, %v1029_v27 }
  0xc1   :  { %1072 = vmatmul.bf16.gmra.mxu0 %v4378_v45  ;;  %1372 = vmatmul.bf16.gmra.mxu3 %v4858_v46  ;;  %v1875_v59 = vmax.f32 %v1700_v55, 0.0  ;;  %v5420_v45 = vld [vmem:[%s7748_s0 + $0xc4] sm:$0xf0]  ;;  %v2142_v46 = vunpack.c.l.b16 %v1897_v61  ;;  %v1034_v61 = vadd.f32 %v6044_v50, %v5970_v62 }
  0xc2   :  { %1441 = vmatmul.bf16.gmra.mxu1 %v4382_v51  ;;  %1741 = vmatmul.bf16.gmra.mxu2 %v4862_v52  ;;  %v2141_v52 = vunpack.c.l.b16 %v1896_v41  ;;  %v4402_v41 = vor.u32 %v5422_v33, %v4401_v32  ;;  %v4411_v32 = vld [vmem:[%s7748_s0 + $0xe8] sm:$0xf0] }
  0xc3   :  { %v2019_v7 = vpack.c.bf16 %v1875_v59, %v1875_v59  ;;  %v1400_v59 = vadd.f32 %v6011_v28, %v1031_v43  ;;  %v1754_v28 = vmax.f32 %v1398_v9, 0.0 }
  0xc4   :  { %v1333_v56 = vpop.f32.mrf.mxu3  ;;  %v2150_v5 = vpack.c.b16 %v2142_v46, %v2141_v52  ;;  %v1403_v52 = vadd.f32 %v6046_v53, %v1034_v61 }
  0xc5   :  { %v1334_v57 = vadd.f32 %v1333_v56, %v5970_v62  ;;  %v1702_v60 = vpop.f32.mrf.mxu2  ;;  %v3290_v22 = vunpack.c.l.b16 %v2019_v7  ;;  %v4394_v56 = vor.u32 %v5420_v45, %v4393_v44  ;;  %v1755_v10 = vmax.f32 %v1400_v59, 0.0 }
  0xc6   :  { %v6051_v63 = vpop.f32.mrf.mxu0 }
  0xc7   :  { %v6053_v0 = vpop.f32.mrf.mxu1  ;;  %v1703_v8 = vadd.f32 %v1702_v60, %v1334_v57 }
  0xc9   :  { %v1876_v13 = vmax.f32 %v1703_v8, 0.0 }
  0xcb   :  { %v2020_v23 = vpack.c.bf16 %v1876_v13, %v1876_v13 }
  0xcc   :  { %v6083_v17 = vpop.f32.mrf.mxu3 }
  0xcd   :  { %v6085_v24 = vpop.f32.mrf.mxu2  ;;  %v3291_v31 = vunpack.c.l.b16 %v2020_v23 }
  0xce   :  { %v6087_v2 = vpop.f32.mrf.mxu0 }
  0xcf   :  { %v6090_v30 = vpop.f32.mrf.mxu1  ;;  %v6093_v58 = vpack.c.b16 %v3291_v31, %v3290_v22  ;;  %v1036_v31 = vadd.f32 %v6051_v63, %v5970_v62 }
  0xd1   :  { %1077 = vmatmul.bf16.gmra.mxu0 %v4386_v19  ;;  %1377 = vmatmul.bf16.gmra.mxu3 %v4866_v20  ;;  %v1899_v19 = vpack.c.bf16 %v1755_v10, %v1755_v10  ;;  %v1405_v44 = vadd.f32 %v6053_v0, %v1036_v31  ;;  %v5423_v31 = vld [vmem:[%s7748_s0 + $0xe4] sm:$0xf] }
  0xd2   :  { %1446 = vmatmul.bf16.gmra.mxu1 %v4390_v25  ;;  %1746 = vmatmul.bf16.gmra.mxu2 %v4870_v26  ;;  %v1898_v25 = vpack.c.bf16 %v1754_v28, %v1754_v28 }
  0xd3   :  { %v2144_v29 = vunpack.c.l.b16 %v1899_v19 }
  0xd4   :  { %v1338_v35 = vpop.f32.mrf.mxu3 }
  0xd5   :  { %v1339_v3 = vadd.f32 %v1338_v35, %v5970_v62  ;;  %v1707_v37 = vpop.f32.mrf.mxu2  ;;  %v5421_v35 = vld [vmem:[%s7748_s0 + $0xd4] sm:$0xf] }
  0xd6   :  { %v6099_v38 = vpop.f32.mrf.mxu0  ;;  %v4406_v46 = vor.u32 %v5421_v35, %v4403_v36  ;;  %v1039_v35 = vadd.f32 %v6087_v2, %v5970_v62 }
  0xd7   :  { %v6101_v39 = vpop.f32.mrf.mxu1  ;;  %v1708_v42 = vadd.f32 %v1707_v37, %v1339_v3  ;;  %v2143_v37 = vunpack.c.l.b16 %v1898_v25 }
  0xd9   :  { %v1878_v49 = vmax.f32 %v1708_v42, 0.0  ;;  %v2151_v43 = vpack.c.b16 %v2144_v29, %v2143_v37  ;;  %v4414_v37 = vor.u32 %v5423_v31, %v4411_v32 }
  0xdb   :  { %v2022_v7 = vpack.c.bf16 %v1878_v49, %v1878_v49 }
  0xdc   :  { %v1340_v51 = vpop.f32.mrf.mxu3 }
  0xdd   :  { %v1341_v55 = vadd.f32 %v1340_v51, %v5970_v62  ;;  %v1709_v57 = vpop.f32.mrf.mxu2  ;;  %v3380_v11 = vunpack.c.l.b16 %v2022_v7  ;;  %v1756_v7 = vmax.f32 %v1403_v52, 0.0 }
  0xde   :  { %v6124_v60 = vpop.f32.mrf.mxu0 }
  0xdf   :  { %v6126_v6 = vpop.f32.mrf.mxu1  ;;  %v1710_v8 = vadd.f32 %v1709_v57, %v1341_v55 }
  0xe1   :  { %1082 = vmatmul.bf16.gmra.mxu0 %v4394_v56  ;;  %4956 = vmatmul.msk.bf16.vlgmr.msrb.gmra.mxu3 %vm2083_vm0, %v2150_v5  ;;  %v1879_v18 = vmax.f32 %v1710_v8, 0.0  ;;  %v1757_v56 = vmax.f32 %v1405_v44, 0.0 }
  0xe2   :  { %1451 = vmatmul.bf16.gmra.mxu1 %v4398_v1 }
  0xe3   :  { %v2023_v12 = vpack.c.bf16 %v1879_v18, %v1879_v18 }
  0xe4   :  { %v1343_v13 = vpop.f32.mrf.mxu3 }
  0xe5   :  { %v1344_v14 = vadd.f32 %v1343_v13, %v5970_v62  ;;  %v3381_v15 = vunpack.c.l.b16 %v2023_v12  ;;  %v1712_v16 = vpop.f32.mrf.mxu2 }
  0xe6   :  { %v1045_v20 = vpop.f32.mrf.mxu0 }
  0xe7   :  { %v1046_v22 = vadd.f32 %v1045_v20, %v5970_v62  ;;  %v1414_v23 = vpop.f32.mrf.mxu1  ;;  %v6132_v21 = vpack.c.b16 %v3381_v15, %v3380_v11  ;;  %v1713_v26 = vadd.f32 %v1712_v16, %v1344_v14  ;;  %v1901_v11 = vpack.c.bf16 %v1757_v56, %v1757_v56 }
  0xe8   :  { %v1900_v16 = vpack.c.bf16 %v1756_v7, %v1756_v7  ;;  %v5426_v7 = vld [vmem:[%s7748_s0 + $0xf4] sm:$0xf0] }
  0xe9   :  { %v1415_v34 = vadd.f32 %v1414_v23, %v1046_v22  ;;  %v1880_v3 = vmax.f32 %v1713_v26, 0.0  ;;  %v4409_v22 = vld [vmem:[%s7748_s0 + $0xe0] sm:$0xf]  ;;  %v5424_v23 = vld [vmem:[%s7748_s0 + $0xe4] sm:$0xf0]  ;;  %v2146_v25 = vunpack.c.l.b16 %v1901_v11  ;;  %v1041_v26 = vadd.f32 %v6099_v38, %v5970_v62 }
  0xea   :  { %v4410_v36 = vor.u32 %v5424_v23, %v4409_v22 }
  0xeb   :  { %v1761_v47 = vmax.f32 %v1415_v34, 0.0  ;;  %v2024_v27 = vpack.c.bf16 %v1880_v3, %v1880_v3  ;;  %v2145_v34 = vunpack.c.l.b16 %v1900_v16  ;;  %v1410_v61 = vadd.f32 %v6101_v39, %v1041_v26 }
  0xec   :  { %v1345_v63 = vpop.f32.mrf.mxu3 }
  0xed   :  { %v1346_v40 = vadd.f32 %v1345_v63, %v5970_v62  ;;  %v1714_v42 = vpop.f32.mrf.mxu2  ;;  %v1905_v57 = vpack.c.bf16 %v1761_v47, %v1761_v47  ;;  %v3382_v0 = vunpack.c.l.b16 %v2024_v27  ;;  %v2152_v63 = vpack.c.b16 %v2146_v25, %v2145_v34 }
  0xee   :  { %v1048_v45 = vpop.f32.mrf.mxu0  ;;  %v1759_v2 = vmax.f32 %v1410_v61, 0.0 }
  0xef   :  { %v1049_v48 = vadd.f32 %v1048_v45, %v5970_v62  ;;  %v1417_v49 = vpop.f32.mrf.mxu1  ;;  %v1715_v51 = vadd.f32 %v1714_v42, %v1346_v40  ;;  %v2057_v12 = vunpack.c.l.b16 %v1905_v57 }
  0xf0   :  { %v1903_v52 = vpack.c.bf16 %v1759_v2, %v1759_v2 }
  0xf1   :  { %v1418_v55 = vadd.f32 %v1417_v49, %v1049_v48  ;;  %1087 = vmatmul.bf16.gmra.mxu0 %v4402_v41  ;;  %4957 = vmatmul.msk.bf16.gmra.mxu3 %vm2083_vm0, %v2151_v43  ;;  %v1881_v50 = vmax.f32 %v1715_v51, 0.0  ;;  %v1408_v43 = vadd.f32 %v6090_v30, %v1039_v35 }
  0xf2   :  { %1456 = vmatmul.bf16.gmra.mxu1 %v4406_v46 }
  0xf3   :  { %v1762_v59 = vmax.f32 %v1418_v55, 0.0  ;;  %v2025_v1 = vpack.c.bf16 %v1881_v50, %v1881_v50  ;;  %v1758_v48 = vmax.f32 %v1408_v43, 0.0  ;;  %v4425_v43 = vld [vmem:[%s7748_s0 + $0x100] sm:$0xf] }
  0xf4   :  { %v1348_v5 = vpop.f32.mrf.mxu3 }
  0xf5   :  { %v1906_v8 = vpack.c.bf16 %v1762_v59, %v1762_v59  ;;  %v1349_v9 = vadd.f32 %v1348_v5, %v5970_v62  ;;  %v3383_v18 = vunpack.c.l.b16 %v2025_v1  ;;  %v1717_v10 = vpop.f32.mrf.mxu2  ;;  %v1902_v57 = vpack.c.bf16 %v1758_v48, %v1758_v48  ;;  %v4417_v5 = vld [vmem:[%s7748_s0 + $0xf0] sm:$0xf] }
  0xf6   :  { %v1050_v53 = vpop.f32.mrf.mxu0  ;;  %v1044_v1 = vadd.f32 %v6124_v60, %v5970_v62  ;;  %v4419_v60 = vld [vmem:[%s7748_s0 + $0xf8] sm:$0xf0] }
  0xf7   :  { %v2058_v28 = vunpack.c.l.b16 %v1906_v8  ;;  %v1051_v13 = vadd.f32 %v1050_v53, %v5970_v62  ;;  %v1419_v14 = vpop.f32.mrf.mxu1  ;;  %v6157_v15 = vpack.c.b16 %v3383_v18, %v3382_v0  ;;  %v6159_v20 = vadd.f32 %v1717_v10, %v1349_v9  ;;  %v5425_v18 = vld [vmem:[%s7748_s0 + $0xf4] sm:$0xf] }
  0xf8   :  { %v2148_v8 = vunpack.c.l.b16 %v1903_v52  ;;  %v2147_v11 = vunpack.c.l.b16 %v1902_v57  ;;  %v4418_v53 = vor.u32 %v5426_v7, %v4417_v5 }
  0xf9   :  { %v2066_v19 = vpack.c.b16 %v2058_v28, %v2057_v12  ;;  %v1420_v29 = vadd.f32 %v1419_v14, %v1051_v13  ;;  %v1413_v28 = vadd.f32 %v6126_v6, %v1044_v1  ;;  %v4422_v14 = vor.u32 %v5425_v18, %v4419_v60  ;;  %v5560_v1 = vld [vmem:[%s7750_s2 + $0x28] sm:$0xff] }
  0xfa   :  { %v2153_v16 = vpack.c.b16 %v2148_v8, %v2147_v11  ;;  %2275 = vmatpush.bf16.msra.mxu2 %v5560_v1 }
  0xfb   :  { %4943 = vmatmul.msk.bf16.vlgmr.msrb.gmra.mxu2 %vm2083_vm0, %v2066_v19  ;;  %v1763_v40 = vmax.f32 %v1420_v29, 0.0  ;;  %v1760_v26 = vmax.f32 %v1413_v28, 0.0 }
  0xfc   :  { %v6176_v33 = vpop.f32.mrf.mxu3 }
  0xfd   :  { %v6180_v3 = vpop.f32.mrf.mxu2  ;;  %v1907_v45 = vpack.c.bf16 %v1763_v40, %v1763_v40 }
  0xfe   :  { %v1053_v38 = vpop.f32.mrf.mxu0 }
  0xff   :  { %v1054_v41 = vadd.f32 %v1053_v38, %v5970_v62  ;;  %v1422_v42 = vpop.f32.mrf.mxu1  ;;  %v2059_v55 = vunpack.c.l.b16 %v1907_v45 }
 0x101   :  { %v1423_v44 = vadd.f32 %v1422_v42, %v1054_v41  ;;  %1092 = vmatmul.bf16.gmra.mxu0 %v4410_v36  ;;  %4958 = vmatmul.msk.bf16.gmra.mxu3 %vm2083_vm0, %v2152_v63  ;;  %v1904_v36 = vpack.c.bf16 %v1760_v26, %v1760_v26  ;;  %v4435_v26 = vld [vmem:[%s7748_s0 + $0x118] sm:$0xf0] }
 0x102   :  { %1461 = vmatmul.bf16.gmra.mxu1 %v4414_v37 }
 0x103   :  { %v1764_v46 = vmax.f32 %v1423_v44, 0.0  ;;  %v5428_v44 = vld [vmem:[%s7748_s0 + $0x104] sm:$0xf0]  ;;  %v2149_v2 = vunpack.c.l.b16 %v1904_v36 }
 0x104   :  { %v1353_v47 = vpop.f32.mrf.mxu3 }
 0x105   :  { %v1908_v49 = vpack.c.bf16 %v1764_v46, %v1764_v46  ;;  %v1354_v27 = vadd.f32 %v1353_v47, %v5970_v62  ;;  %v1722_v39 = vpop.f32.mrf.mxu2  ;;  %v5427_v46 = vld [vmem:[%s7748_s0 + $0x104] sm:$0xf]  ;;  %v4427_v47 = vld [vmem:[%s7748_s0 + $0x108] sm:$0xf0]  ;;  %v2154_v52 = vpack.c.b16 %v2149_v2, %v2149_v2 }
 0x106   :  { %v1055_v51 = vpop.f32.mrf.mxu0 }
 0x107   :  { %v2060_v50 = vunpack.c.l.b16 %v1908_v49  ;;  %v1056_v30 = vadd.f32 %v1055_v51, %v5970_v62  ;;  %v1424_v56 = vpop.f32.mrf.mxu1  ;;  %v6188_v0 = vadd.f32 %v1722_v39, %v1354_v27  ;;  %v4426_v49 = vor.u32 %v5428_v44, %v4425_v43 }
 0x108   :  { %v4430_v51 = vor.u32 %v5427_v46, %v4427_v47 }
 0x109   :  { %v2067_v59 = vpack.c.b16 %v2060_v50, %v2059_v55  ;;  %v1425_v9 = vadd.f32 %v1424_v56, %v1056_v30 }
 0x10b   :  { %4944 = vmatmul.msk.bf16.gmra.mxu2 %vm2083_vm0, %v2067_v59  ;;  %v1765_v19 = vmax.f32 %v1425_v9, 0.0 }
 0x10c   :  { %v6205_v10 = vpop.f32.mrf.mxu3 }
 0x10d   :  { %v6207_v12 = vpop.f32.mrf.mxu2  ;;  %v1909_v29 = vpack.c.bf16 %v1765_v19, %v1765_v19 }
 0x10e   :  { %v1058_v13 = vpop.f32.mrf.mxu0 }
 0x10f   :  { %v1059_v22 = vadd.f32 %v1058_v13, %v5970_v62  ;;  %v1427_v23 = vpop.f32.mrf.mxu1  ;;  %v2061_v37 = vunpack.c.l.b16 %v1909_v29 }
 0x111   :  { %v1428_v25 = vadd.f32 %v1427_v23, %v1059_v22  ;;  %1097 = vmatmul.bf16.gmra.mxu0 %v4418_v53  ;;  %4959 = vmatmul.msk.bf16.gmra.mxu3 %vm2083_vm0, %v2153_v16  ;;  %v4433_v22 = vld [vmem:[%s7748_s0 + $0x110] sm:$0xf]  ;;  %v5430_v23 = vld [vmem:[%s7748_s0 + $0x114] sm:$0xf0] }
 0x112   :  { %1466 = vmatmul.bf16.gmra.mxu1 %v4422_v14  ;;  %v5559_v14 = vld [vmem:[%s7750_s2 + $0x20] sm:$0xff] }
 0x113   :  { %v1766_v31 = vmax.f32 %v1428_v25, 0.0  ;;  %2276 = vmatpush.bf16.msra.mxu2 %v5559_v14  ;;  %v5429_v25 = vld [vmem:[%s7748_s0 + $0x114] sm:$0xf] }
 0x114   :  { %v1358_v32 = vpop.f32.mrf.mxu3 }
 0x115   :  { %v1910_v34 = vpack.c.bf16 %v1766_v31, %v1766_v31  ;;  %v1359_v35 = vadd.f32 %v1358_v32, %v5970_v62  ;;  %v1727_v6 = vpop.f32.mrf.mxu2  ;;  %v4434_v32 = vor.u32 %v5430_v23, %v4433_v22 }
 0x116   :  { %v1060_v38 = vpop.f32.mrf.mxu0 }
 0x117   :  { %v2062_v63 = vunpack.c.l.b16 %v1910_v34  ;;  %v1061_v61 = vadd.f32 %v1060_v38, %v5970_v62  ;;  %v1429_v40 = vpop.f32.mrf.mxu1  ;;  %v6214_v41 = vadd.f32 %v1727_v6, %v1359_v35  ;;  %v4438_v6 = vor.u32 %v5429_v25, %v4435_v26 }
 0x119   :  { %v2068_v42 = vpack.c.b16 %v2062_v63, %v2061_v37  ;;  %v1430_v45 = vadd.f32 %v1429_v40, %v1061_v61 }
 0x11b   :  { %4945 = vmatmul.msk.bf16.gmra.mxu2 %vm2083_vm0, %v2068_v42  ;;  %v1767_v55 = vmax.f32 %v1430_v45, 0.0 }
 0x11c   :  { %v6229_v48 = vpop.f32.mrf.mxu3 }
 0x11d   :  { %v6231_v27 = vpop.f32.mrf.mxu2  ;;  %v1911_v57 = vpack.c.bf16 %v1767_v55, %v1767_v55  ;;  %v4443_v55 = vld [vmem:[%s7748_s0 + $0x128] sm:$0xf0] }
 0x11e   :  { %v1063_v39 = vpop.f32.mrf.mxu0 }
 0x11f   :  { %v1064_v50 = vadd.f32 %v1063_v39, %v5970_v62  ;;  %v1432_v30 = vpop.f32.mrf.mxu1  ;;  %v2063_v60 = vunpack.c.l.b16 %v1911_v57  ;;  %v5432_v39 = vld [vmem:[%s7748_s0 + $0x124] sm:$0xf0] }
 0x121   :  { %v1433_v56 = vadd.f32 %v1432_v30, %v1064_v50  ;;  %1102 = vmatmul.bf16.gmra.mxu0 %v4426_v49  ;;  %4960 = vmatmul.msk.bf16.gmra.mxu3 %vm2083_vm0, %v2154_v52  ;;  %v4441_v49 = vld [vmem:[%s7748_s0 + $0x120] sm:$0xf]  ;;  %v5431_v52 = vld [vmem:[%s7748_s0 + $0x124] sm:$0xf] }
 0x122   :  { %1471 = vmatmul.bf16.gmra.mxu1 %v4430_v51  ;;  %v4446_v1 = vor.u32 %v5431_v52, %v4443_v55 }
 0x123   :  { %v1768_v59 = vmax.f32 %v1433_v56, 0.0  ;;  %v4442_v56 = vor.u32 %v5432_v39, %v4441_v49 }
 0x124   :  { %v1363_v5 = vpop.f32.mrf.mxu3 }
 0x125   :  { %v1912_v7 = vpack.c.bf16 %v1768_v59, %v1768_v59  ;;  %v1364_v8 = vadd.f32 %v1363_v5, %v5970_v62  ;;  %v1732_v9 = vpop.f32.mrf.mxu2 }
 0x126   :  { %v1065_v18 = vpop.f32.mrf.mxu0 }
 0x127   :  { %v2064_v11 = vunpack.c.l.b16 %v1912_v7  ;;  %v1066_v53 = vadd.f32 %v1065_v18, %v5970_v62  ;;  %v1434_v28 = vpop.f32.mrf.mxu1  ;;  %v6240_v13 = vadd.f32 %v1732_v9, %v1364_v8 }
 0x129   :  { %v2069_v16 = vpack.c.b16 %v2064_v11, %v2063_v60  ;;  %v1435_v19 = vadd.f32 %v1434_v28, %v1066_v53 }
 0x12b   :  { %4946 = vmatmul.msk.bf16.gmra.mxu2 %vm2083_vm0, %v2069_v16  ;;  %v1769_v31 = vmax.f32 %v1435_v19, 0.0 }
 0x12c   :  { %v6258_v29 = vpop.f32.mrf.mxu3 }
 0x12d   :  { %v6260_v34 = vpop.f32.mrf.mxu2  ;;  %v1913_v38 = vpack.c.bf16 %v1769_v31, %v1769_v31  ;;  %v4449_v31 = vld [vmem:[%s7748_s0 + $0x130] sm:$0xf] }
 0x12e   :  { %v1068_v35 = vpop.f32.mrf.mxu0 }
 0x12f   :  { %v1437_v36 = vpop.f32.mrf.mxu1  ;;  %v2065_v63 = vunpack.c.l.b16 %v1913_v38  ;;  %v1069_v43 = vadd.f32 %v1068_v35, %v5970_v62 }
 0x131   :  { %1107 = vmatmul.bf16.gmra.mxu0 %v4434_v32  ;;  %v2070_v46 = vpack.c.b16 %v2065_v63, %v2065_v63  ;;  %v1438_v51 = vadd.f32 %v1437_v36, %v1069_v43  ;;  %v5434_v32 = vld [vmem:[%s7748_s0 + $0x134] sm:$0xf0]  ;;  %v4451_v36 = vld [vmem:[%s7748_s0 + $0x138] sm:$0xf0] }
 0x132   :  { %1476 = vmatmul.bf16.gmra.mxu1 %v4438_v6  ;;  %v5433_v6 = vld [vmem:[%s7748_s0 + $0x134] sm:$0xf]  ;;  %v4450_v63 = vor.u32 %v5434_v32, %v4449_v31  ;;  %v5562_v32 = vld [vmem:[%s7750_s2 + $0x38] sm:$0xff] }
 0x133   :  { %v1770_v5 = vmax.f32 %v1438_v51, 0.0  ;;  %2371 = vmatpush.bf16.msra.mxu3 %v5562_v32  ;;  %v5440_v32 = vld [vmem:[%s7748_s0 + $0x164] sm:$0xf0] }
 0x134   :  { %v1368_v37 = vpop.f32.mrf.mxu3 }
 0x135   :  { %v1369_v61 = vadd.f32 %v1368_v37, %v5970_v62  ;;  %v1737_v40 = vpop.f32.mrf.mxu2  ;;  %v1914_v9 = vpack.c.bf16 %v1770_v5, %v1770_v5 }
 0x136   :  { %v1070_v42 = vpop.f32.mrf.mxu0 }
 0x137   :  { %v1071_v44 = vadd.f32 %v1070_v42, %v5970_v62  ;;  %v1439_v2 = vpop.f32.mrf.mxu1  ;;  %v6265_v45 = vadd.f32 %v1737_v40, %v1369_v61  ;;  %v2228_v14 = vunpack.c.l.b16 %v1914_v9  ;;  %v4454_v40 = vor.u32 %v5433_v6, %v4451_v36  ;;  %v5436_v9 = vld [vmem:[%s7748_s0 + $0x144] sm:$0xf0] }
 0x139   :  { %v1440_v47 = vadd.f32 %v1439_v2, %v1071_v44 }
 0x13b   :  { %4947 = vmatmul.msk.bf16.gmra.mxu2 %vm2083_vm0, %v2070_v46  ;;  %v1771_v30 = vmax.f32 %v1440_v47, 0.0 }
 0x13c   :  { %v6280_v50 = vpop.f32.mrf.mxu3 }
 0x13d   :  { %v6282_v57 = vpop.f32.mrf.mxu2  ;;  %v1915_v8 = vpack.c.bf16 %v1771_v30, %v1771_v30 }
 0x13e   :  { %v1073_v59 = vpop.f32.mrf.mxu0 }
 0x13f   :  { %v1442_v7 = vpop.f32.mrf.mxu1  ;;  %v2229_v60 = vunpack.c.l.b16 %v1915_v8  ;;  %v1074_v16 = vadd.f32 %v1073_v59, %v5970_v62  ;;  %v4457_v8 = vld [vmem:[%s7748_s0 + $0x140] sm:$0xf] }
 0x141   :  { %1112 = vmatmul.bf16.gmra.mxu0 %v4442_v56  ;;  %v2237_v25 = vpack.c.b16 %v2229_v60, %v2228_v14  ;;  %v1443_v35 = vadd.f32 %v1442_v7, %v1074_v16  ;;  %v5435_v60 = vld [vmem:[%s7748_s0 + $0x144] sm:$0xf]  ;;  %v4458_v14 = vor.u32 %v5436_v9, %v4457_v8 }
 0x142   :  { %1481 = vmatmul.bf16.gmra.mxu1 %v4446_v1 }
 0x143   :  { %v1772_v43 = vmax.f32 %v1443_v35, 0.0 }
 0x144   :  { %v1373_v18 = vpop.f32.mrf.mxu3 }
 0x145   :  { %v1374_v11 = vadd.f32 %v1373_v18, %v5970_v62  ;;  %v1742_v53 = vpop.f32.mrf.mxu2  ;;  %v1916_v46 = vpack.c.bf16 %v1772_v43, %v1772_v43  ;;  %v5561_v43 = vld [vmem:[%s7750_s2 + $0x30] sm:$0xff] }
 0x146   :  { %v1075_v28 = vpop.f32.mrf.mxu0  ;;  %2372 = vmatpush.bf16.msra.mxu3 %v5561_v43 }
 0x147   :  { %v1076_v19 = vadd.f32 %v1075_v28, %v5970_v62  ;;  %v1444_v22 = vpop.f32.mrf.mxu1  ;;  %v6287_v23 = vadd.f32 %v1742_v53, %v1374_v11  ;;  %v2230_v52 = vunpack.c.l.b16 %v1916_v46  ;;  %v4459_v11 = vld [vmem:[%s7748_s0 + $0x148] sm:$0xf0]  ;;  %v4465_v46 = vld [vmem:[%s7748_s0 + $0x150] sm:$0xf] }
 0x149   :  { %v1445_v26 = vadd.f32 %v1444_v22, %v1076_v19  ;;  %v4462_v19 = vor.u32 %v5435_v60, %v4459_v11 }
 0x14b   :  { %4969 = vmatmul.msk.bf16.vlgmr.msra.gmra.mxu2 %vm2083_vm0, %v2237_v25  ;;  %v1773_v37 = vmax.f32 %v1445_v26, 0.0 }
 0x14c   :  { %v6302_v38 = vpop.f32.mrf.mxu3 }
 0x14d   :  { %v6304_v42 = vpop.f32.mrf.mxu2  ;;  %v1917_v2 = vpack.c.bf16 %v1773_v37, %v1773_v37 }
 0x14e   :  { %v1078_v61 = vpop.f32.mrf.mxu0 }
 0x14f   :  { %v1447_v44 = vpop.f32.mrf.mxu1  ;;  %v2231_v49 = vunpack.c.l.b16 %v1917_v2  ;;  %v1079_v55 = vadd.f32 %v1078_v61, %v5970_v62 }
 0x151   :  { %1117 = vmatmul.bf16.gmra.mxu0 %v4450_v63  ;;  %v2238_v1 = vpack.c.b16 %v2231_v49, %v2230_v52  ;;  %v1448_v18 = vadd.f32 %v1447_v44, %v1079_v55 }
 0x152   :  { %1486 = vmatmul.bf16.gmra.mxu1 %v4454_v40 }
 0x153   :  { %v1774_v22 = vmax.f32 %v1448_v18, 0.0 }
 0x154   :  { %v1378_v47 = vpop.f32.mrf.mxu3 }
 0x155   :  { %v1379_v39 = vadd.f32 %v1378_v47, %v5970_v62  ;;  %v1747_v59 = vpop.f32.mrf.mxu2  ;;  %v1918_v31 = vpack.c.bf16 %v1774_v22, %v1774_v22  ;;  %v5438_v47 = vld [vmem:[%s7748_s0 + $0x154] sm:$0xf0] }
 0x156   :  { %v1080_v51 = vpop.f32.mrf.mxu0 }
 0x157   :  { %v1081_v30 = vadd.f32 %v1080_v51, %v5970_v62  ;;  %v1449_v56 = vpop.f32.mrf.mxu1  ;;  %v6309_v7 = vadd.f32 %v1747_v59, %v1379_v39  ;;  %v2232_v37 = vunpack.c.l.b16 %v1918_v31  ;;  %v5437_v39 = vld [vmem:[%s7748_s0 + $0x154] sm:$0xf]  ;;  %v4467_v51 = vld [vmem:[%s7748_s0 + $0x158] sm:$0xf0]  ;;  %v4473_v31 = vld [vmem:[%s7748_s0 + $0x160] sm:$0xf] }
 0x158   :  { %v4470_v59 = vor.u32 %v5437_v39, %v4467_v51 }
 0x159   :  { %v1450_v5 = vadd.f32 %v1449_v56, %v1081_v30  ;;  %v4466_v30 = vor.u32 %v5438_v47, %v4465_v46 }
 0x15b   :  { %4970 = vmatmul.msk.bf16.gmra.mxu2 %vm2083_vm0, %v2238_v1  ;;  %v1775_v28 = vmax.f32 %v1450_v5, 0.0 }
 0x15c   :  { %v6324_v53 = vpop.f32.mrf.mxu3 }
 0x15d   :  { %v1919_v26 = vpack.c.bf16 %v1775_v28, %v1775_v28  ;;  %v6349_v60 = vpop.f32.mrf.mxu2 }
 0x15e   :  { %v1083_v16 = vpop.f32.mrf.mxu0 }
 0x15f   :  { %v1452_v25 = vpop.f32.mrf.mxu1  ;;  %v2233_v6 = vunpack.c.l.b16 %v1919_v26  ;;  %v1084_v63 = vadd.f32 %v1083_v16, %v5970_v62 }
 0x161   :  { %1122 = vmatmul.bf16.gmra.mxu0 %v4458_v14  ;;  %v2239_v44 = vpack.c.b16 %v2233_v6, %v2232_v37  ;;  %v1453_v49 = vadd.f32 %v1452_v25, %v1084_v63  ;;  %v4475_v37 = vld [vmem:[%s7748_s0 + $0x168] sm:$0xf0] }
 0x162   :  { %1491 = vmatmul.bf16.gmra.mxu1 %v4462_v19 }
 0x163   :  { %v1776_v1 = vmax.f32 %v1453_v49, 0.0 }
 0x164   :  { %v2191_v35 = vpop.f32.mrf.mxu3 }
 0x165   :  { %v1920_v9 = vpack.c.bf16 %v1776_v1, %v1776_v1 }
 0x166   :  { %v1085_v36 = vpop.f32.mrf.mxu0 }
 0x167   :  { %v1086_v61 = vadd.f32 %v1085_v36, %v5970_v62  ;;  %v1454_v40 = vpop.f32.mrf.mxu1  ;;  %v2234_v16 = vunpack.c.l.b16 %v1920_v9  ;;  %v5439_v36 = vld [vmem:[%s7748_s0 + $0x164] sm:$0xf] }
 0x169   :  { %v1455_v2 = vadd.f32 %v1454_v40, %v1086_v61  ;;  %v4474_v40 = vor.u32 %v5440_v32, %v4473_v31  ;;  %v4483_v31 = vld [vmem:[%s7748_s0 + $0x178] sm:$0xf0] }
 0x16b   :  { %4971 = vmatmul.msk.bf16.gmra.mxu2 %vm2083_vm0, %v2239_v44  ;;  %v1777_v55 = vmax.f32 %v1455_v2, 0.0  ;;  %v4478_v2 = vor.u32 %v5439_v36, %v4475_v37 }
 0x16c   :  { %v6347_v52 = vpop.f32.mrf.mxu3 }
 0x16d   :  { %v1921_v8 = vpack.c.bf16 %v1777_v55, %v1777_v55 }
 0x16e   :  { %v1088_v56 = vpop.f32.mrf.mxu0 }
 0x16f   :  { %v1457_v5 = vpop.f32.mrf.mxu1  ;;  %v2235_v11 = vunpack.c.l.b16 %v1921_v8  ;;  %v1089_v28 = vadd.f32 %v1088_v56, %v5970_v62 }
 0x171   :  { %1127 = vmatmul.bf16.gmra.mxu0 %v4466_v30  ;;  %v2240_v25 = vpack.c.b16 %v2235_v11, %v2234_v16  ;;  %v1458_v26 = vadd.f32 %v1457_v5, %v1089_v28 }
 0x172   :  { %1496 = vmatmul.bf16.gmra.mxu1 %v4470_v59 }
 0x173   :  { %v1778_v61 = vmax.f32 %v1458_v26, 0.0 }
 0x174   :  { %v2196_v18 = vpop.f32.mrf.mxu3 }
 0x175   :  { %v1922_v51 = vpack.c.bf16 %v1778_v61, %v1778_v61 }
 0x176   :  { %v1090_v14 = vpop.f32.mrf.mxu0 }
 0x177   :  { %v1091_v19 = vadd.f32 %v1090_v14, %v5970_v62  ;;  %v1459_v22 = vpop.f32.mrf.mxu1  ;;  %v2236_v1 = vunpack.c.l.b16 %v1922_v51 }
 0x179   :  { %v1460_v6 = vadd.f32 %v1459_v22, %v1091_v19  ;;  %v2241_v19 = vpack.c.b16 %v2236_v1, %v2236_v1  ;;  %v4481_v22 = vld [vmem:[%s7748_s0 + $0x170] sm:$0xf] }
 0x17b   :  { %4972 = vmatmul.msk.bf16.gmra.mxu2 %vm2083_vm0, %v2240_v25  ;;  %v1779_v46 = vmax.f32 %v1460_v6, 0.0  ;;  %v5442_v25 = vld [vmem:[%s7748_s0 + $0x174] sm:$0xf0] }
 0x17c   :  { %v6366_v63 = vpop.f32.mrf.mxu3  ;;  %v4482_v6 = vor.u32 %v5442_v25, %v4481_v22  ;;  %v4491_v22 = vld [vmem:[%s7748_s0 + $0x188] sm:$0xf0] }
 0x17d   :  { %7753 = vst [vmem:[#allocation2_spill] sm:$0xff] %v6366_v63  ;;  %v1923_v30 = vpack.c.bf16 %v1779_v46, %v1779_v46 }
 0x17e   :  { %v1093_v43 = vpop.f32.mrf.mxu0  ;;  %v2108_v44 = vpop.f32.mrf.mxu2 }
 0x17f   :  { %v1094_v47 = vadd.f32 %v1093_v43, %v5970_v62  ;;  %v1462_v49 = vpop.f32.mrf.mxu1  ;;  %v6369_v39 = vadd.f32 %v2191_v35, %v2108_v44  ;;  %v2324_v11 = vunpack.c.l.b16 %v1923_v30  ;;  %v6393_v43 = vld [vmem:[%s7749_s4] ss:$0 sm:$0xff] }
 0x181   :  { %v1463_v55 = vadd.f32 %v1462_v49, %v1094_v47  ;;  %1132 = vmatmul.bf16.gmra.mxu0 %v4474_v40 }
 0x182   :  { %1501 = vmatmul.bf16.gmra.mxu1 %v4478_v2 }
 0x183   :  { %v1780_v56 = vmax.f32 %v1463_v55, 0.0 }
 0x184   :  { %v2201_v59 = vpop.f32.mrf.mxu3 }
 0x185   :  { %v1924_v5 = vpack.c.bf16 %v1780_v56, %v1780_v56 }
 0x186   :  { %v1095_v8 = vpop.f32.mrf.mxu0  ;;  %v6371_v9 = vpop.f32.mrf.mxu2 }
 0x187   :  { %v2325_v28 = vunpack.c.l.b16 %v1924_v5  ;;  %v1096_v14 = vadd.f32 %v1095_v8, %v5970_v62  ;;  %v1464_v16 = vpop.f32.mrf.mxu1  ;;  %v5441_v62 = vld [vmem:[%s7748_s0 + $0x174] sm:$0xf] }
 0x188   :  { %v4486_v61 = vor.u32 %v5441_v62, %v4483_v31 }
 0x189   :  { %v2333_v35 = vpack.c.b16 %v2325_v28, %v2324_v11  ;;  %v1465_v26 = vadd.f32 %v1464_v16, %v1096_v14  ;;  %v5444_v16 = vld [vmem:[%s7748_s0 + $0x184] sm:$0xf0] }
 0x18b   :  { %4973 = vmatmul.msk.bf16.gmra.mxu2 %vm2083_vm0, %v2241_v19  ;;  %4982 = vmatmul.msk.bf16.vlgmr.msra.gmra.mxu3 %vm2083_vm0, %v2333_v35  ;;  %v1781_v40 = vmax.f32 %v1465_v26, 0.0  ;;  %v5443_v35 = vld [vmem:[%s7748_s0 + $0x184] sm:$0xf] }
 0x18c   :  { %v6388_v32 = vpop.f32.mrf.mxu3 }
 0x18d   :  { %7754 = vst [vmem:[#allocation3_spill] sm:$0xff] %v6388_v32  ;;  %v1925_v49 = vpack.c.bf16 %v1781_v40, %v1781_v40 }
 0x18e   :  { %v1098_v36 = vpop.f32.mrf.mxu0  ;;  %v2113_v37 = vpop.f32.mrf.mxu2 }
 0x18f   :  { %v1099_v44 = vadd.f32 %v6393_v43, %v1098_v36  ;;  %v1467_v2 = vpop.f32.mrf.mxu1  ;;  %v6396_v46 = vadd.f32 %v2196_v18, %v2113_v37  ;;  %v2326_v5 = vunpack.c.l.b16 %v1925_v49  ;;  %v4489_v18 = vld [vmem:[%s7748_s0 + $0x180] sm:$0xf] }
 0x190   :  { %v4490_v26 = vor.u32 %v5444_v16, %v4489_v18  ;;  %v5446_v18 = vld [vmem:[%s7748_s0 + $0x194] sm:$0xf0] }
 0x191   :  { %v1468_v47 = vadd.f32 %v1467_v2, %v1099_v44  ;;  %1137 = vmatmul.bf16.gmra.mxu0 %v4482_v6  ;;  %v4494_v6 = vor.u32 %v5443_v35, %v4491_v22  ;;  %v4499_v35 = vld [vmem:[%s7748_s0 + $0x198] sm:$0xf0]  ;;  %v5564_v22 = vld [vmem:[%s7750_s2 + $0x48] sm:$0xff] }
 0x192   :  { %1506 = vmatmul.bf16.gmra.mxu1 %v4486_v61  ;;  %2467 = vmatpush.bf16.msrb.mxu2 %v5564_v22  ;;  %v5448_v22 = vld [vmem:[%s7748_s0 + $0x1a4] sm:$0xf0] }
 0x193   :  { %v1782_v51 = vmax.f32 %v1468_v47, 0.0 }
 0x194   :  { %v2206_v55 = vpop.f32.mrf.mxu3 }
 0x195   :  { %v1926_v30 = vpack.c.bf16 %v1782_v51, %v1782_v51 }
 0x196   :  { %v1100_v56 = vpop.f32.mrf.mxu0  ;;  %v6398_v1 = vpop.f32.mrf.mxu2 }
 0x197   :  { %v2327_v8 = vunpack.c.l.b16 %v1926_v30  ;;  %v1101_v11 = vadd.f32 %v6393_v43, %v1100_v56  ;;  %v1469_v28 = vpop.f32.mrf.mxu1 }
 0x199   :  { %v2334_v14 = vpack.c.b16 %v2327_v8, %v2326_v5  ;;  %v1470_v19 = vadd.f32 %v1469_v28, %v1101_v11 }
 0x19b   :  { %4983 = vmatmul.msk.bf16.gmra.mxu3 %vm2083_vm0, %v2334_v14  ;;  %v1783_v36 = vmax.f32 %v1470_v19, 0.0  ;;  %v5445_v19 = vld [vmem:[%s7748_s0 + $0x194] sm:$0xf] }
 0x19c   :  { %v6414_v25 = vpop.f32.mrf.mxu3 }
 0x19d   :  { %7755 = vst [vmem:[#allocation4_spill] sm:$0xff] %v6414_v25  ;;  %v1927_v2 = vpack.c.bf16 %v1783_v36, %v1783_v36  ;;  %v4502_v36 = vor.u32 %v5445_v19, %v4499_v35  ;;  %v4505_v35 = vld [vmem:[%s7748_s0 + $0x1a0] sm:$0xf] }
 0x19e   :  { %v1103_v62 = vpop.f32.mrf.mxu0  ;;  %v2118_v31 = vpop.f32.mrf.mxu2 }
 0x19f   :  { %v1104_v37 = vadd.f32 %v6393_v43, %v1103_v62  ;;  %v1472_v61 = vpop.f32.mrf.mxu1  ;;  %v6417_v40 = vadd.f32 %v2201_v59, %v2118_v31  ;;  %v2328_v5 = vunpack.c.l.b16 %v1927_v2  ;;  %v4497_v59 = vld [vmem:[%s7748_s0 + $0x190] sm:$0xf] }
 0x1a0   :  { %v4498_v62 = vor.u32 %v5446_v18, %v4497_v59 }
 0x1a1   :  { %v1473_v44 = vadd.f32 %v1472_v61, %v1104_v37  ;;  %1142 = vmatmul.bf16.gmra.mxu0 %v4490_v26 }
 0x1a2   :  { %1511 = vmatmul.bf16.gmra.mxu1 %v4494_v6 }
 0x1a3   :  { %v1784_v47 = vmax.f32 %v1473_v44, 0.0 }
 0x1a4   :  { %v2211_v49 = vpop.f32.mrf.mxu3 }
 0x1a5   :  { %v1928_v51 = vpack.c.bf16 %v1784_v47, %v1784_v47  ;;  %v5563_v47 = vld [vmem:[%s7750_s2 + $0x40] sm:$0xff] }
 0x1a6   :  { %v1105_v30 = vpop.f32.mrf.mxu0  ;;  %v6419_v56 = vpop.f32.mrf.mxu2  ;;  %2468 = vmatpush.bf16.msrb.mxu2 %v5563_v47 }
 0x1a7   :  { %7756 = vst [vmem:[#allocation5_spill] sm:$0xff] %v6419_v56  ;;  %v2329_v8 = vunpack.c.l.b16 %v1928_v51  ;;  %v1106_v11 = vadd.f32 %v6393_v43, %v1105_v30  ;;  %v1474_v28 = vpop.f32.mrf.mxu1 }
 0x1a9   :  { %v2335_v14 = vpack.c.b16 %v2329_v8, %v2328_v5  ;;  %v1475_v16 = vadd.f32 %v1474_v28, %v1106_v11 }
 0x1ab   :  { %4984 = vmatmul.msk.bf16.gmra.mxu3 %vm2083_vm0, %v2335_v14  ;;  %v1785_v37 = vmax.f32 %v1475_v16, 0.0 }
 0x1ac   :  { %v2213_v26 = vpop.f32.mrf.mxu3 }
 0x1ad   :  { %v1929_v30 = vpack.c.bf16 %v1785_v37, %v1785_v37  ;;  %v5447_v26 = vld [vmem:[%s7748_s0 + $0x1a4] sm:$0xf] }
 0x1ae   :  { %v1108_v31 = vpop.f32.mrf.mxu0  ;;  %v2123_v6 = vpop.f32.mrf.mxu2 }
 0x1af   :  { %v1109_v61 = vadd.f32 %v6393_v43, %v1108_v31  ;;  %v1477_v44 = vpop.f32.mrf.mxu1  ;;  %v6439_v2 = vadd.f32 %v2206_v55, %v2123_v6  ;;  %v2330_v14 = vunpack.c.l.b16 %v1929_v30  ;;  %v4506_v6 = vor.u32 %v5448_v22, %v4505_v35  ;;  %v4513_v35 = vld [vmem:[%s7748_s0 + $0x1b0] sm:$0xf] }
 0x1b1   :  { %v1478_v51 = vadd.f32 %v1477_v44, %v1109_v61  ;;  %1147 = vmatmul.bf16.gmra.mxu0 %v4498_v62  ;;  %v4507_v62 = vld [vmem:[%s7748_s0 + $0x1a8] sm:$0xf0] }
 0x1b2   :  { %1516 = vmatmul.bf16.gmra.mxu1 %v4502_v36  ;;  %v4510_v61 = vor.u32 %v5447_v26, %v4507_v62  ;;  %v5449_v62 = vld [vmem:[%s7748_s0 + $0x1b4] sm:$0xf] }
 0x1b3   :  { %v1786_v5 = vmax.f32 %v1478_v51, 0.0 }
 0x1b5   :  { %v1930_v8 = vpack.c.bf16 %v1786_v5, %v1786_v5 }
 0x1b6   :  { %v1110_v11 = vpop.f32.mrf.mxu0  ;;  %v6444_v28 = vpop.f32.mrf.mxu2 }
 0x1b7   :  { %7757 = vst [vmem:[#allocation6_spill] sm:$0xff] %v6444_v28  ;;  %v2331_v59 = vunpack.c.l.b16 %v1930_v8  ;;  %v1111_v18 = vadd.f32 %v6393_v43, %v1110_v11  ;;  %v1479_v55 = vpop.f32.mrf.mxu1 }
 0x1b9   :  { %v2336_v16 = vpack.c.b16 %v2331_v59, %v2330_v14  ;;  %v1480_v19 = vadd.f32 %v1479_v55, %v1111_v18 }
 0x1bb   :  { %4985 = vmatmul.msk.bf16.gmra.mxu3 %vm2083_vm0, %v2336_v16  ;;  %v1787_v31 = vmax.f32 %v1480_v19, 0.0 }
 0x1bd   :  { %v1931_v30 = vpack.c.bf16 %v1787_v31, %v1787_v31  ;;  %v4515_v31 = vld [vmem:[%s7748_s0 + $0x1b8] sm:$0xf0] }
 0x1be   :  { %v1113_v36 = vpop.f32.mrf.mxu0  ;;  %v2128_v37 = vpop.f32.mrf.mxu2 }
 0x1bf   :  { %v1114_v44 = vadd.f32 %v6393_v43, %v1113_v36  ;;  %v1482_v47 = vpop.f32.mrf.mxu1  ;;  %v6461_v51 = vadd.f32 %v2211_v49, %v2128_v37  ;;  %v2332_v8 = vunpack.c.l.b16 %v1931_v30  ;;  %v5450_v49 = vld [vmem:[%s7748_s0 + $0x1b4] sm:$0xf0] }
 0x1c0   :  { %v4514_v36 = vor.u32 %v5450_v49, %v4513_v35 }
 0x1c1   :  { %1152 = vmatmul.bf16.gmra.mxu0 %v4506_v6  ;;  %v1483_v5 = vadd.f32 %v1482_v47, %v1114_v44  ;;  %v2337_v16 = vpack.c.b16 %v2332_v8, %v2332_v8  ;;  %v4518_v44 = vor.u32 %v5449_v62, %v4515_v31  ;;  %v5451_v31 = vld [vmem:[%s7748_s0 + $0x1c4] sm:$0xf] }
 0x1c2   :  { %1521 = vmatmul.bf16.gmra.mxu1 %v4510_v61 }
 0x1c3   :  { %v1788_v59 = vmax.f32 %v1483_v5, 0.0 }
 0x1c5   :  { %v1932_v22 = vpack.c.bf16 %v1788_v59, %v1788_v59 }
 0x1c6   :  { %v1115_v11 = vpop.f32.mrf.mxu0  ;;  %v2130_v14 = vpop.f32.mrf.mxu2 }
 0x1c7   :  { %v1116_v18 = vadd.f32 %v6393_v43, %v1115_v11  ;;  %v1484_v55 = vpop.f32.mrf.mxu1  ;;  %v2420_v47 = vunpack.c.l.b16 %v1932_v22  ;;  %v4521_v22 = vld [vmem:[%s7748_s0 + $0x1c0] sm:$0xf] }
 0x1c9   :  { %v1485_v19 = vadd.f32 %v1484_v55, %v1116_v18 }
 0x1cb   :  { %v1789_v26 = vmax.f32 %v1485_v19, 0.0  ;;  %4986 = vmatmul.msk.bf16.gmra.mxu3 %vm2083_vm0, %v2337_v16 }
 0x1cd   :  { %v1933_v6 = vpack.c.bf16 %v1789_v26, %v1789_v26 }
 0x1ce   :  { %v1118_v37 = vpop.f32.mrf.mxu0  ;;  %v2278_v61 = vpop.f32.mrf.mxu2 }
 0x1cf   :  { %v2421_v30 = vunpack.c.l.b16 %v1933_v6  ;;  %v1119_v5 = vadd.f32 %v6393_v43, %v1118_v37  ;;  %v1487_v8 = vpop.f32.mrf.mxu1  ;;  %v6479_v11 = vadd.f32 %v2278_v61, %v6369_v39  ;;  %v5452_v39 = vld [vmem:[%s7748_s0 + $0x1c4] sm:$0xf0]  ;;  %v4523_v6 = vld [vmem:[%s7748_s0 + $0x1c8] sm:$0xf0] }
 0x1d0   :  { %v4522_v37 = vor.u32 %v5452_v39, %v4521_v22 }
 0x1d1   :  { %v2429_v14 = vpack.c.b16 %v2421_v30, %v2420_v47  ;;  %1157 = vmatmul.bf16.gmra.mxu0 %v4514_v36  ;;  %v1488_v59 = vadd.f32 %v1487_v8, %v1119_v5  ;;  %v4526_v47 = vor.u32 %v5451_v31, %v4523_v6 }
 0x1d2   :  { %1526 = vmatmul.bf16.gmra.mxu1 %v4518_v44 }
 0x1d3   :  { %4995 = vmatmul.msk.bf16.vlgmr.msrb.gmra.mxu2 %vm2083_vm0, %v2429_v14  ;;  %v1790_v16 = vmax.f32 %v1488_v59, 0.0 }
 0x1d5   :  { %v1934_v26 = vpack.c.bf16 %v1790_v16, %v1790_v16 }
 0x1d6   :  { %v1120_v18 = vpop.f32.mrf.mxu0  ;;  %v6482_v55 = vpop.f32.mrf.mxu2 }
 0x1d7   :  { %v1121_v19 = vadd.f32 %v6393_v43, %v1120_v18  ;;  %v1489_v35 = vpop.f32.mrf.mxu1  ;;  %v2422_v30 = vunpack.c.l.b16 %v1934_v26 }
 0x1d9   :  { %v1490_v49 = vadd.f32 %v1489_v35, %v1121_v19 }
 0x1db   :  { %v1791_v62 = vmax.f32 %v1490_v49, 0.0 }
 0x1dd   :  { %v1935_v36 = vpack.c.bf16 %v1791_v62, %v1791_v62  ;;  %v4529_v62 = vld [vmem:[%s7748_s0 + $0x1d0] sm:$0xf] }
 0x1de   :  { %v1123_v61 = vpop.f32.mrf.mxu0  ;;  %v2283_v44 = vpop.f32.mrf.mxu2 }
 0x1df   :  { %v2423_v5 = vunpack.c.l.b16 %v1935_v36  ;;  %v1124_v8 = vadd.f32 %v6393_v43, %v1123_v61  ;;  %v1492_v14 = vpop.f32.mrf.mxu1  ;;  %v6499_v59 = vadd.f32 %v2283_v44, %v6396_v46  ;;  %v5454_v46 = vld [vmem:[%s7748_s0 + $0x1d4] sm:$0xf0]  ;;  %v5453_v36 = vld [vmem:[%s7748_s0 + $0x1d4] sm:$0xf] }
 0x1e0   :  { %v4530_v44 = vor.u32 %v5454_v46, %v4529_v62 }
 0x1e1   :  { %v2430_v18 = vpack.c.b16 %v2423_v5, %v2422_v30  ;;  %1162 = vmatmul.bf16.gmra.mxu0 %v4522_v37  ;;  %v1493_v16 = vadd.f32 %v1492_v14, %v1124_v8  ;;  %v4531_v37 = vld [vmem:[%s7748_s0 + $0x1d8] sm:$0xf0] }
 0x1e2   :  { %1531 = vmatmul.bf16.gmra.mxu1 %v4526_v47  ;;  %v4534_v5 = vor.u32 %v5453_v36, %v4531_v37  ;;  %v4537_v37 = vld [vmem:[%s7748_s0 + $0x1e0] sm:$0xf] }
 0x1e3   :  { %4996 = vmatmul.msk.bf16.gmra.mxu2 %vm2083_vm0, %v2430_v18  ;;  %v1792_v49 = vmax.f32 %v1493_v16, 0.0 }
 0x1e5   :  { %v1936_v31 = vpack.c.bf16 %v1792_v49, %v1792_v49 }
 0x1e6   :  { %v1125_v19 = vpop.f32.mrf.mxu0  ;;  %v6502_v35 = vpop.f32.mrf.mxu2 }
 0x1e7   :  { %7758 = vst [vmem:[#allocation7_spill] sm:$0xff] %v6502_v35  ;;  %v1126_v22 = vadd.f32 %v6393_v43, %v1125_v19  ;;  %v1494_v39 = vpop.f32.mrf.mxu1  ;;  %v2424_v8 = vunpack.c.l.b16 %v1936_v31 }
 0x1e9   :  { %v1495_v26 = vadd.f32 %v1494_v39, %v1126_v22  ;;  %v5566_v39 = vld [vmem:[%s7750_s2 + $0x58] sm:$0xff] }
 0x1ea   :  { %2563 = vmatpush.bf16.msrb.mxu3 %v5566_v39 }
 0x1eb   :  { %v1793_v6 = vmax.f32 %v1495_v26, 0.0 }
 0x1ed   :  { %v1937_v61 = vpack.c.bf16 %v1793_v6, %v1793_v6 }
 0x1ee   :  { %v1128_v47 = vpop.f32.mrf.mxu0  ;;  %v2288_v30 = vpop.f32.mrf.mxu2 }
 0x1ef   :  { %v2425_v14 = vunpack.c.l.b16 %v1937_v61  ;;  %v1129_v18 = vadd.f32 %v6393_v43, %v1128_v47  ;;  %v1497_v16 = vpop.f32.mrf.mxu1  ;;  %v6519_v19 = vadd.f32 %v2288_v30, %v6417_v40  ;;  %v5565_v40 = vld [vmem:[%s7750_s2 + $0x50] sm:$0xff]  ;;  %v5456_v61 = vld [vmem:[%s7748_s0 + $0x1e4] sm:$0xf0]  ;;  %v5455_v30 = vld [vmem:[%s7748_s0 + $0x1e4] sm:$0xf] }
 0x1f0   :  { %2564 = vmatpush.bf16.msrb.mxu3 %v5565_v40 }
 0x1f1   :  { %v2431_v49 = vpack.c.b16 %v2425_v14, %v2424_v8  ;;  %1167 = vmatmul.bf16.gmra.mxu0 %v4530_v44  ;;  %v1498_v22 = vadd.f32 %v1497_v16, %v1129_v18  ;;  %v4538_v14 = vor.u32 %v5456_v61, %v4537_v37 }
 0x1f2   :  { %1536 = vmatmul.bf16.gmra.mxu1 %v4534_v5  ;;  %v4539_v5 = vld [vmem:[%s7748_s0 + $0x1e8] sm:$0xf0] }
 0x1f3   :  { %4997 = vmatmul.msk.bf16.gmra.mxu2 %vm2083_vm0, %v2431_v49  ;;  %v1794_v46 = vmax.f32 %v1498_v22, 0.0  ;;  %v4542_v49 = vor.u32 %v5455_v30, %v4539_v5  ;;  %v4545_v5 = vld [vmem:[%s7748_s0 + $0x1f0] sm:$0xf] }
 0x1f5   :  { %v1938_v44 = vpack.c.bf16 %v1794_v46, %v1794_v46 }
 0x1f6   :  { %v1130_v26 = vpop.f32.mrf.mxu0  ;;  %v6525_v62 = vpop.f32.mrf.mxu2 }
 0x1f7   :  { %7759 = vst [vmem:[#allocation8_spill] sm:$0xff] %v6525_v62  ;;  %v1131_v31 = vadd.f32 %v6393_v43, %v1130_v26  ;;  %v1499_v6 = vpop.f32.mrf.mxu1  ;;  %v2426_v22 = vunpack.c.l.b16 %v1938_v44 }
 0x1f9   :  { %v1500_v36 = vadd.f32 %v1499_v6, %v1131_v31 }
 0x1fb   :  { %v1795_v47 = vmax.f32 %v1500_v36, 0.0 }
 0x1fd   :  { %v1939_v8 = vpack.c.bf16 %v1795_v47, %v1795_v47 }
 0x1fe   :  { %v1133_v18 = vpop.f32.mrf.mxu0  ;;  %v2293_v16 = vpop.f32.mrf.mxu2 }
 0x1ff   :  { %v2427_v39 = vunpack.c.l.b16 %v1939_v8  ;;  %v1134_v26 = vadd.f32 %v6393_v43, %v1133_v18  ;;  %v1502_v31 = vpop.f32.mrf.mxu1  ;;  %v6545_v46 = vadd.f32 %v2293_v16, %v6439_v2  ;;  %v5458_v2 = vld [vmem:[%s7748_s0 + $0x1f4] sm:$0xf0]  ;;  %v4547_v18 = vld [vmem:[%s7748_s0 + $0x1f8] sm:$0xf0] }
 0x201   :  { %v2432_v6 = vpack.c.b16 %v2427_v39, %v2426_v22  ;;  %v1503_v40 = vadd.f32 %v1502_v31, %v1134_v26  ;;  %1172 = vmatmul.bf16.gmra.mxu0 %v4538_v14  ;;  %v5457_v14 = vld [vmem:[%s7748_s0 + $0x1f4] sm:$0xf] }
 0x202   :  { %1541 = vmatmul.bf16.gmra.mxu1 %v4542_v49  ;;  %v4546_v49 = vor.u32 %v5458_v2, %v4545_v5  ;;  %v4550_v26 = vor.u32 %v5457_v14, %v4547_v18 }
 0x203   :  { %4998 = vmatmul.msk.bf16.gmra.mxu2 %vm2083_vm0, %v2432_v6  ;;  %v1796_v36 = vmax.f32 %v1503_v40, 0.0 }
 0x205   :  { %v1940_v30 = vpack.c.bf16 %v1796_v36, %v1796_v36 }
 0x206   :  { %v1135_v47 = vpop.f32.mrf.mxu0  ;;  %v6548_v37 = vpop.f32.mrf.mxu2 }
 0x207   :  { %7760 = vst [vmem:[#allocation9_spill] sm:$0xff] %v6548_v37  ;;  %v1136_v61 = vadd.f32 %v6393_v43, %v1135_v47  ;;  %v1504_v44 = vpop.f32.mrf.mxu1  ;;  %v2428_v16 = vunpack.c.l.b16 %v1940_v30 }
 0x209   :  { %v1505_v8 = vadd.f32 %v1504_v44, %v1136_v61  ;;  %v2433_v44 = vpack.c.b16 %v2428_v16, %v2428_v16  ;;  %v4553_v16 = vld [vmem:[%s7748_s0 + $0x200] sm:$0xf] }
 0x20b   :  { %v1797_v31 = vmax.f32 %v1505_v8, 0.0 }
 0x20d   :  { %v1941_v30 = vpack.c.bf16 %v1797_v31, %v1797_v31  ;;  %v4555_v31 = vld [vmem:[%s7748_s0 + $0x208] sm:$0xf0] }
 0x20e   :  { %v1138_v22 = vpop.f32.mrf.mxu0  ;;  %v2298_v39 = vpop.f32.mrf.mxu2 }
 0x20f   :  { %v1139_v6 = vadd.f32 %v6393_v43, %v1138_v22  ;;  %v1507_v40 = vpop.f32.mrf.mxu1  ;;  %v6565_v36 = vadd.f32 %v2298_v39, %v6461_v51  ;;  %v2374_v47 = vpop.f32.mrf.mxu3  ;;  %v2516_v18 = vunpack.c.l.b16 %v1941_v30 }
 0x210   :  { %v6568_v61 = vadd.f32 %v2374_v47, %v6479_v11 }
 0x211   :  { %v1508_v37 = vadd.f32 %v1507_v40, %v1139_v6  ;;  %1177 = vmatmul.bf16.gmra.mxu0 %v4546_v49 }
 0x212   :  { %1546 = vmatmul.bf16.gmra.mxu1 %v4550_v26  ;;  %v5459_v26 = vld [vmem:[%s7748_s0 + $0x204] sm:$0xf] }
 0x213   :  { %v1798_v5 = vmax.f32 %v1508_v37, 0.0  ;;  %4999 = vmatmul.msk.bf16.gmra.mxu2 %vm2083_vm0, %v2433_v44  ;;  %v5460_v37 = vld [vmem:[%s7748_s0 + $0x204] sm:$0xf0]  ;;  %v4558_v47 = vor.u32 %v5459_v26, %v4555_v31  ;;  %v5462_v31 = vld [vmem:[%s7748_s0 + $0x214] sm:$0xf0] }
 0x214   :  { %v4554_v6 = vor.u32 %v5460_v37, %v4553_v16 }
 0x215   :  { %v1942_v2 = vpack.c.bf16 %v1798_v5, %v1798_v5 }
 0x216   :  { %v1140_v8 = vpop.f32.mrf.mxu0  ;;  %v2300_v14 = vpop.f32.mrf.mxu2 }
 0x217   :  { %v2517_v22 = vunpack.c.l.b16 %v1942_v2  ;;  %v1141_v51 = vadd.f32 %v6393_v43, %v1140_v8  ;;  %v1509_v39 = vpop.f32.mrf.mxu1  ;;  %v6572_v25 = vpop.f32.mrf.mxu3 }
 0x219   :  { %v2525_v11 = vpack.c.b16 %v2517_v22, %v2516_v18  ;;  %v1510_v49 = vadd.f32 %v1509_v39, %v1141_v51 }
 0x21b   :  { %5008 = vmatmul.msk.bf16.vlgmr.msrb.gmra.mxu3 %vm2083_vm0, %v2525_v11  ;;  %v1799_v44 = vmax.f32 %v1510_v49, 0.0 }
 0x21d   :  { %v1943_v18 = vpack.c.bf16 %v1799_v44, %v1799_v44 }
 0x21e   :  { %v1143_v40 = vpop.f32.mrf.mxu0 }
 0x21f   :  { %v1144_v30 = vadd.f32 %v6393_v43, %v1143_v40  ;;  %v1512_v5 = vpop.f32.mrf.mxu1  ;;  %v2379_v2 = vpop.f32.mrf.mxu3  ;;  %v2518_v11 = vunpack.c.l.b16 %v1943_v18  ;;  %v5461_v40 = vld [vmem:[%s7748_s0 + $0x214] sm:$0xf] }
 0x220   :  { %v6589_v8 = vadd.f32 %v2379_v2, %v6499_v59  ;;  %v4561_v59 = vld [vmem:[%s7748_s0 + $0x210] sm:$0xf] }
 0x221   :  { %v1513_v14 = vadd.f32 %v1512_v5, %v1144_v30  ;;  %1182 = vmatmul.bf16.gmra.mxu0 %v4554_v6 }
 0x222   :  { %1551 = vmatmul.bf16.gmra.mxu1 %v4558_v47  ;;  %v4563_v47 = vld [vmem:[%s7748_s0 + $0x218] sm:$0xf0] }
 0x223   :  { %v1800_v22 = vmax.f32 %v1513_v14, 0.0  ;;  %v4566_v30 = vor.u32 %v5461_v40, %v4563_v47  ;;  %v5464_v47 = vld [vmem:[%s7748_s0 + $0x224] sm:$0xf0] }
 0x225   :  { %v1944_v51 = vpack.c.bf16 %v1800_v22, %v1800_v22 }
 0x226   :  { %v1145_v39 = vpop.f32.mrf.mxu0 }
 0x227   :  { %v2519_v28 = vunpack.c.l.b16 %v1944_v51  ;;  %v1146_v16 = vadd.f32 %v6393_v43, %v1145_v39  ;;  %v1514_v37 = vpop.f32.mrf.mxu1  ;;  %v6592_v49 = vpop.f32.mrf.mxu3 }
 0x228   :  { %7761 = vst [vmem:[#allocation10_spill] sm:$0xff] %v6592_v49 }
 0x229   :  { %v2526_v26 = vpack.c.b16 %v2519_v28, %v2518_v11  ;;  %v1515_v6 = vadd.f32 %v1514_v37, %v1146_v16  ;;  %v4562_v28 = vor.u32 %v5462_v31, %v4561_v59 }
 0x22b   :  { %5009 = vmatmul.msk.bf16.gmra.mxu3 %vm2083_vm0, %v2526_v26  ;;  %v1801_v5 = vmax.f32 %v1515_v6, 0.0 }
 0x22d   :  { %v1945_v39 = vpack.c.bf16 %v1801_v5, %v1801_v5 }
 0x22e   :  { %v1148_v44 = vpop.f32.mrf.mxu0 }
 0x22f   :  { %v1149_v2 = vadd.f32 %v6393_v43, %v1148_v44  ;;  %v1517_v14 = vpop.f32.mrf.mxu1  ;;  %v2384_v18 = vpop.f32.mrf.mxu3  ;;  %v2520_v26 = vunpack.c.l.b16 %v1945_v39  ;;  %v5463_v44 = vld [vmem:[%s7748_s0 + $0x224] sm:$0xf] }
 0x230   :  { %v6609_v22 = vadd.f32 %v2384_v18, %v6519_v19  ;;  %v4569_v19 = vld [vmem:[%s7748_s0 + $0x220] sm:$0xf] }
 0x231   :  { %v1518_v51 = vadd.f32 %v1517_v14, %v1149_v2  ;;  %1187 = vmatmul.bf16.gmra.mxu0 %v4562_v28  ;;  %v4570_v5 = vor.u32 %v5464_v47, %v4569_v19 }
 0x232   :  { %1556 = vmatmul.bf16.gmra.mxu1 %v4566_v30  ;;  %v4571_v30 = vld [vmem:[%s7748_s0 + $0x228] sm:$0xf0] }
 0x233   :  { %v1802_v11 = vmax.f32 %v1518_v51, 0.0  ;;  %v4574_v14 = vor.u32 %v5463_v44, %v4571_v30 }
 0x235   :  { %v1946_v16 = vpack.c.bf16 %v1802_v11, %v1802_v11 }
 0x236   :  { %v1150_v37 = vpop.f32.mrf.mxu0 }
 0x237   :  { %v2521_v62 = vunpack.c.l.b16 %v1946_v16  ;;  %v1151_v59 = vadd.f32 %v6393_v43, %v1150_v37  ;;  %v1519_v31 = vpop.f32.mrf.mxu1  ;;  %v6612_v6 = vpop.f32.mrf.mxu3  ;;  %v5567_v16 = vld [vmem:[%s7750_s2 + $0x60] sm:$0xff] }
 0x238   :  { %7762 = vst [vmem:[#allocation11_spill] sm:$0xff] %v6612_v6 }
 0x239   :  { %v2527_v40 = vpack.c.b16 %v2521_v62, %v2520_v26  ;;  %v1520_v28 = vadd.f32 %v1519_v31, %v1151_v59  ;;  %v5568_v62 = vld [vmem:[%s7750_s2 + $0x68] sm:$0xff] }
 0x23a   :  { %2659 = vmatpush.bf16.msra.mxu2 %v5568_v62 }
 0x23b   :  { %5010 = vmatmul.msk.bf16.gmra.mxu3 %vm2083_vm0, %v2527_v40  ;;  %v1803_v18 = vmax.f32 %v1520_v28, 0.0 }
 0x23d   :  { %v1947_v59 = vpack.c.bf16 %v1803_v18, %v1803_v18  ;;  %v4579_v18 = vld [vmem:[%s7748_s0 + $0x238] sm:$0xf0] }
 0x23e   :  { %v1153_v2 = vpop.f32.mrf.mxu0  ;;  %2660 = vmatpush.bf16.msra.mxu2 %v5567_v16 }
 0x23f   :  { %v1154_v51 = vadd.f32 %v6393_v43, %v1153_v2  ;;  %v1522_v39 = vpop.f32.mrf.mxu1  ;;  %v2389_v11 = vpop.f32.mrf.mxu3  ;;  %v2522_v47 = vunpack.c.l.b16 %v1947_v59 }
 0x240   :  { %v6635_v37 = vadd.f32 %v2389_v11, %v6545_v46  ;;  %v4577_v46 = vld [vmem:[%s7748_s0 + $0x230] sm:$0xf] }
 0x241   :  { %v1523_v26 = vadd.f32 %v1522_v39, %v1154_v51  ;;  %1192 = vmatmul.bf16.gmra.mxu0 %v4570_v5  ;;  %v5466_v5 = vld [vmem:[%s7748_s0 + $0x234] sm:$0xf0] }
 0x242   :  { %1561 = vmatmul.bf16.gmra.mxu1 %v4574_v14  ;;  %v5465_v14 = vld [vmem:[%s7748_s0 + $0x234] sm:$0xf]  ;;  %v4578_v39 = vor.u32 %v5466_v5, %v4577_v46 }
 0x243   :  { %v1804_v31 = vmax.f32 %v1523_v26, 0.0  ;;  %v4582_v16 = vor.u32 %v5465_v14, %v4579_v18 }
 0x245   :  { %v1948_v40 = vpack.c.bf16 %v1804_v31, %v1804_v31 }
 0x246   :  { %v1155_v19 = vpop.f32.mrf.mxu0 }
 0x247   :  { %v2523_v28 = vunpack.c.l.b16 %v1948_v40  ;;  %v1156_v44 = vadd.f32 %v6393_v43, %v1155_v19  ;;  %v1524_v30 = vpop.f32.mrf.mxu1  ;;  %v6638_v62 = vpop.f32.mrf.mxu3 }
 0x248   :  { %7763 = vst [vmem:[#allocation12_spill] sm:$0xff] %v6638_v62 }
 0x249   :  { %v2528_v2 = vpack.c.b16 %v2523_v28, %v2522_v47  ;;  %v1525_v6 = vadd.f32 %v1524_v30, %v1156_v44 }
 0x24b   :  { %5011 = vmatmul.msk.bf16.gmra.mxu3 %vm2083_vm0, %v2528_v2  ;;  %v1805_v51 = vmax.f32 %v1525_v6, 0.0 }
 0x24d   :  { %v1949_v19 = vpack.c.bf16 %v1805_v51, %v1805_v51  ;;  %v5468_v51 = vld [vmem:[%s7748_s0 + $0x244] sm:$0xf0] }
 0x24e   :  { %v1158_v11 = vpop.f32.mrf.mxu0 }
 0x24f   :  { %v1159_v26 = vadd.f32 %v6393_v43, %v1158_v11  ;;  %v1527_v59 = vpop.f32.mrf.mxu1  ;;  %v2394_v31 = vpop.f32.mrf.mxu3  ;;  %v2524_v28 = vunpack.c.l.b16 %v1949_v19 }
 0x250   :  { %v6655_v40 = vadd.f32 %v2394_v31, %v6565_v36  ;;  %v4585_v36 = vld [vmem:[%s7748_s0 + $0x240] sm:$0xf] }
 0x251   :  { %1197 = vmatmul.bf16.gmra.mxu0 %v4578_v39  ;;  %v1528_v47 = vadd.f32 %v1527_v59, %v1159_v26  ;;  %v2529_v18 = vpack.c.b16 %v2524_v28, %v2524_v28  ;;  %v5467_v26 = vld [vmem:[%s7748_s0 + $0x244] sm:$0xf]  ;;  %v4586_v31 = vor.u32 %v5468_v51, %v4585_v36 }
 0x252   :  { %1566 = vmatmul.bf16.gmra.mxu1 %v4582_v16 }
 0x253   :  { %v1806_v2 = vmax.f32 %v1528_v47, 0.0 }
 0x255   :  { %v1950_v39 = vpack.c.bf16 %v1806_v2, %v1806_v2 }
 0x256   :  { %v1160_v44 = vpop.f32.mrf.mxu0  ;;  %v2470_v30 = vpop.f32.mrf.mxu2 }
 0x257   :  { %v1161_v6 = vadd.f32 %v6393_v43, %v1160_v44  ;;  %v1529_v46 = vpop.f32.mrf.mxu1  ;;  %v2396_v5 = vpop.f32.mrf.mxu3  ;;  %v6659_v14 = vadd.f32 %v2470_v30, %v6568_v61  ;;  %v4587_v61 = vld [vmem:[%s7748_s0 + $0x248] sm:$0xf0]  ;;  %v2612_v44 = vunpack.c.l.b16 %v1950_v39 }
 0x258   :  { %v4590_v28 = vor.u32 %v5467_v26, %v4587_v61  ;;  %v4593_v26 = vld [vmem:[%s7748_s0 + $0x250] sm:$0xf]  ;;  %v5470_v61 = vld [vmem:[%s7748_s0 + $0x254] sm:$0xf0] }
 0x259   :  { %v1530_v11 = vadd.f32 %v1529_v46, %v1161_v6 }
 0x25b   :  { %v1807_v16 = vmax.f32 %v1530_v11, 0.0  ;;  %5012 = vmatmul.msk.bf16.gmra.mxu3 %vm2083_vm0, %v2529_v18 }
 0x25d   :  { %v1951_v59 = vpack.c.bf16 %v1807_v16, %v1807_v16 }
 0x25e   :  { %v1163_v19 = vpop.f32.mrf.mxu0  ;;  %v6674_v47 = vpop.f32.mrf.mxu2 }
 0x25f   :  { %v2613_v30 = vunpack.c.l.b16 %v1951_v59  ;;  %v1164_v2 = vadd.f32 %v6393_v43, %v1163_v19  ;;  %v1532_v6 = vpop.f32.mrf.mxu1  ;;  %v5469_v19 = vld [vmem:[%s7748_s0 + $0x254] sm:$0xf] }
 0x261   :  { %v2621_v46 = vpack.c.b16 %v2613_v30, %v2612_v44  ;;  %1202 = vmatmul.bf16.gmra.mxu0 %v4586_v31  ;;  %v1533_v5 = vadd.f32 %v1532_v6, %v1164_v2  ;;  %v4594_v44 = vor.u32 %v5470_v61, %v4593_v26 }
 0x262   :  { %1571 = vmatmul.bf16.gmra.mxu1 %v4590_v28 }
 0x263   :  { %5021 = vmatmul.msk.bf16.vlgmr.msra.gmra.mxu2 %vm2083_vm0, %v2621_v46  ;;  %v1808_v62 = vmax.f32 %v1533_v5, 0.0 }
 0x265   :  { %v1952_v59 = vpack.c.bf16 %v1808_v62, %v1808_v62 }
 0x266   :  { %v1165_v18 = vpop.f32.mrf.mxu0  ;;  %v2475_v11 = vpop.f32.mrf.mxu2 }
 0x267   :  { %v1166_v36 = vadd.f32 %v6393_v43, %v1165_v18  ;;  %v1534_v51 = vpop.f32.mrf.mxu1  ;;  %v6680_v16 = vadd.f32 %v2475_v11, %v6589_v8  ;;  %v4595_v8 = vld [vmem:[%s7748_s0 + $0x258] sm:$0xf0]  ;;  %v2614_v46 = vunpack.c.l.b16 %v1952_v59 }
 0x268   :  { %v4598_v6 = vor.u32 %v5469_v19, %v4595_v8  ;;  %v4601_v19 = vld [vmem:[%s7748_s0 + $0x260] sm:$0xf]  ;;  %v5472_v8 = vld [vmem:[%s7748_s0 + $0x264] sm:$0xf0] }
 0x269   :  { %v1535_v39 = vadd.f32 %v1534_v51, %v1166_v36 }
 0x26b   :  { %v1809_v31 = vmax.f32 %v1535_v39, 0.0 }
 0x26d   :  { %v1953_v28 = vpack.c.bf16 %v1809_v31, %v1809_v31 }
 0x26e   :  { %v1168_v30 = vpop.f32.mrf.mxu0  ;;  %v6694_v2 = vpop.f32.mrf.mxu2 }
 0x26f   :  { %7764 = vst [vmem:[#allocation13_spill] sm:$0xff] %v6694_v2  ;;  %v2615_v5 = vunpack.c.l.b16 %v1953_v28  ;;  %v1169_v18 = vadd.f32 %v6393_v43, %v1168_v30  ;;  %v1537_v62 = vpop.f32.mrf.mxu1  ;;  %v5471_v30 = vld [vmem:[%s7748_s0 + $0x264] sm:$0xf] }
 0x271   :  { %v2622_v11 = vpack.c.b16 %v2615_v5, %v2614_v46  ;;  %1207 = vmatmul.bf16.gmra.mxu0 %v4594_v44  ;;  %v1538_v36 = vadd.f32 %v1537_v62, %v1169_v18  ;;  %v4602_v46 = vor.u32 %v5472_v8, %v4601_v19 }
 0x272   :  { %1576 = vmatmul.bf16.gmra.mxu1 %v4598_v6 }
 0x273   :  { %5022 = vmatmul.msk.bf16.gmra.mxu2 %vm2083_vm0, %v2622_v11  ;;  %v1810_v32 = vmax.f32 %v1538_v36, 0.0 }
 0x275   :  { %v1954_v28 = vpack.c.bf16 %v1810_v32, %v1810_v32 }
 0x276   :  { %v1170_v51 = vpop.f32.mrf.mxu0  ;;  %v2480_v39 = vpop.f32.mrf.mxu2 }
 0x277   :  { %v1171_v26 = vadd.f32 %v6393_v43, %v1170_v51  ;;  %v1539_v61 = vpop.f32.mrf.mxu1  ;;  %v6700_v31 = vadd.f32 %v2480_v39, %v6609_v22  ;;  %v4603_v22 = vld [vmem:[%s7748_s0 + $0x268] sm:$0xf0]  ;;  %v2616_v11 = vunpack.c.l.b16 %v1954_v28 }
 0x278   :  { %v4606_v62 = vor.u32 %v5471_v30, %v4603_v22  ;;  %v5569_v22 = vld [vmem:[%s7750_s2 + $0x70] sm:$0xff] }
 0x279   :  { %v1540_v59 = vadd.f32 %v1539_v61, %v1171_v26  ;;  %v5570_v61 = vld [vmem:[%s7750_s2 + $0x78] sm:$0xff] }
 0x27a   :  { %2755 = vmatpush.bf16.msra.mxu3 %v5570_v61 }
 0x27b   :  { %v1811_v44 = vmax.f32 %v1540_v59, 0.0 }
 0x27d   :  { %v1955_v6 = vpack.c.bf16 %v1811_v44, %v1811_v44 }
 0x27e   :  { %v1173_v5 = vpop.f32.mrf.mxu0  ;;  %v6714_v18 = vpop.f32.mrf.mxu2  ;;  %2756 = vmatpush.bf16.msra.mxu3 %v5569_v22 }
 0x27f   :  { %7765 = vst [vmem:[#allocation14_spill] sm:$0xff] %v6714_v18  ;;  %v2617_v36 = vunpack.c.l.b16 %v1955_v6  ;;  %v1174_v51 = vadd.f32 %v6393_v43, %v1173_v5  ;;  %v1542_v32 = vpop.f32.mrf.mxu1  ;;  %v5474_v5 = vld [vmem:[%s7748_s0 + $0x274] sm:$0xf0] }
 0x281   :  { %v2623_v39 = vpack.c.b16 %v2617_v36, %v2616_v11  ;;  %1212 = vmatmul.bf16.gmra.mxu0 %v4602_v46  ;;  %v1543_v26 = vadd.f32 %v1542_v32, %v1174_v51  ;;  %v4609_v46 = vld [vmem:[%s7748_s0 + $0x270] sm:$0xf]  ;;  %v4611_v36 = vld [vmem:[%s7748_s0 + $0x278] sm:$0xf0] }
 0x282   :  { %1581 = vmatmul.bf16.gmra.mxu1 %v4606_v62  ;;  %v4610_v32 = vor.u32 %v5474_v5, %v4609_v46 }
 0x283   :  { %5023 = vmatmul.msk.bf16.gmra.mxu2 %vm2083_vm0, %v2623_v39  ;;  %v1812_v8 = vmax.f32 %v1543_v26, 0.0 }
 0x285   :  { %v1956_v62 = vpack.c.bf16 %v1812_v8, %v1812_v8 }
 0x286   :  { %v1175_v59 = vpop.f32.mrf.mxu0  ;;  %v2485_v19 = vpop.f32.mrf.mxu2 }
 0x287   :  { %v1176_v28 = vadd.f32 %v6393_v43, %v1175_v59  ;;  %v1544_v44 = vpop.f32.mrf.mxu1  ;;  %v6723_v30 = vadd.f32 %v2485_v19, %v6635_v37  ;;  %v5473_v37 = vld [vmem:[%s7748_s0 + $0x274] sm:$0xf]  ;;  %v2618_v59 = vunpack.c.l.b16 %v1956_v62 }
 0x288   :  { %v4614_v61 = vor.u32 %v5473_v37, %v4611_v36  ;;  %v4617_v37 = vld [vmem:[%s7748_s0 + $0x280] sm:$0xf]  ;;  %v5476_v36 = vld [vmem:[%s7748_s0 + $0x284] sm:$0xf0] }
 0x289   :  { %v1545_v6 = vadd.f32 %v1544_v44, %v1176_v28 }
 0x28b   :  { %v1813_v11 = vmax.f32 %v1545_v6, 0.0 }
 0x28d   :  { %v1957_v51 = vpack.c.bf16 %v1813_v11, %v1813_v11 }
 0x28e   :  { %v1178_v39 = vpop.f32.mrf.mxu0  ;;  %v6740_v26 = vpop.f32.mrf.mxu2 }
 0x28f   :  { %7766 = vst [vmem:[#allocation15_spill] sm:$0xff] %v6740_v26  ;;  %v2619_v19 = vunpack.c.l.b16 %v1957_v51  ;;  %v1179_v28 = vadd.f32 %v6393_v43, %v1178_v39  ;;  %v1547_v8 = vpop.f32.mrf.mxu1 }
 0x291   :  { %v2624_v44 = vpack.c.b16 %v2619_v19, %v2618_v59  ;;  %v1548_v22 = vadd.f32 %v1547_v8, %v1179_v28  ;;  %1217 = vmatmul.bf16.gmra.mxu0 %v4610_v32  ;;  %v5475_v32 = vld [vmem:[%s7748_s0 + $0x284] sm:$0xf] }
 0x292   :  { %1586 = vmatmul.bf16.gmra.mxu1 %v4614_v61 }
 0x293   :  { %5024 = vmatmul.msk.bf16.gmra.mxu2 %vm2083_vm0, %v2624_v44  ;;  %v1814_v6 = vmax.f32 %v1548_v22, 0.0 }
 0x295   :  { %v1958_v62 = vpack.c.bf16 %v1814_v6, %v1814_v6 }
 0x296   :  { %v1180_v18 = vpop.f32.mrf.mxu0  ;;  %v2490_v56 = vpop.f32.mrf.mxu2 }
 0x297   :  { %v1181_v46 = vadd.f32 %v6393_v43, %v1180_v18  ;;  %v1549_v5 = vpop.f32.mrf.mxu1  ;;  %v6746_v11 = vadd.f32 %v2490_v56, %v6655_v40  ;;  %v4619_v18 = vld [vmem:[%s7748_s0 + $0x288] sm:$0xf0]  ;;  %v2620_v56 = vunpack.c.l.b16 %v1958_v62  ;;  %v4618_v40 = vor.u32 %v5476_v36, %v4617_v37 }
 0x298   :  { %v4622_v59 = vor.u32 %v5475_v32, %v4619_v18 }
 0x299   :  { %v1550_v51 = vadd.f32 %v1549_v5, %v1181_v46  ;;  %v2625_v6 = vpack.c.b16 %v2620_v56, %v2620_v56  ;;  %v5478_v56 = vld [vmem:[%s7748_s0 + $0x294] sm:$0xf0] }
 0x29b   :  { %v1815_v19 = vmax.f32 %v1550_v51, 0.0 }
 0x29d   :  { %v1959_v5 = vpack.c.bf16 %v1815_v19, %v1815_v19 }
 0x29e   :  { %v1183_v39 = vpop.f32.mrf.mxu0  ;;  %v2492_v61 = vpop.f32.mrf.mxu2 }
 0x29f   :  { %v1184_v28 = vadd.f32 %v6393_v43, %v1183_v39  ;;  %v1552_v8 = vpop.f32.mrf.mxu1  ;;  %v2566_v44 = vpop.f32.mrf.mxu3  ;;  %v2708_v36 = vunpack.c.l.b16 %v1959_v5 }
 0x2a0   :  { %v6762_v22 = vadd.f32 %v2566_v44, %v6659_v14  ;;  %v4625_v14 = vld [vmem:[%s7748_s0 + $0x290] sm:$0xf]  ;;  %v6784_v44 = vld [vmem:[%s7749_s4] ss:$0 sm:$0xff] }
 0x2a1   :  { %v1553_v46 = vadd.f32 %v1552_v8, %v1184_v28  ;;  %1222 = vmatmul.bf16.gmra.mxu0 %v4618_v40 }
 0x2a2   :  { %1591 = vmatmul.bf16.gmra.mxu1 %v4622_v59  ;;  %v4626_v59 = vor.u32 %v5478_v56, %v4625_v14 }
 0x2a3   :  { %v1816_v26 = vmax.f32 %v1553_v46, 0.0  ;;  %5025 = vmatmul.msk.bf16.gmra.mxu2 %vm2083_vm0, %v2625_v6 }
 0x2a5   :  { %v1960_v62 = vpack.c.bf16 %v1816_v26, %v1816_v26  ;;  %v5477_v26 = vld [vmem:[%s7748_s0 + $0x294] sm:$0xf] }
 0x2a6   :  { %v1185_v37 = vpop.f32.mrf.mxu0 }
 0x2a7   :  { %v2709_v32 = vunpack.c.l.b16 %v1960_v62  ;;  %v1186_v51 = vadd.f32 %v6393_v43, %v1185_v37  ;;  %v1554_v18 = vpop.f32.mrf.mxu1  ;;  %v6766_v39 = vpop.f32.mrf.mxu3  ;;  %v4627_v43 = vld [vmem:[%s7748_s0 + $0x298] sm:$0xf0] }
 0x2a8   :  { %v4630_v28 = vor.u32 %v5477_v26, %v4627_v43 }
 0x2a9   :  { %v2717_v61 = vpack.c.b16 %v2709_v32, %v2708_v36  ;;  %v1555_v40 = vadd.f32 %v1554_v18, %v1186_v51 }
 0x2ab   :  { %5034 = vmatmul.msk.bf16.vlgmr.msra.gmra.mxu3 %vm2083_vm0, %v2717_v61  ;;  %v1817_v8 = vmax.f32 %v1555_v40, 0.0 }
 0x2ad   :  { %v1961_v36 = vpack.c.bf16 %v1817_v8, %v1817_v8  ;;  %v4635_v8 = vld [vmem:[%s7748_s0 + $0x2a8] sm:$0xf0] }
 0x2ae   :  { %v1188_v19 = vpop.f32.mrf.mxu0 }
 0x2af   :  { %v1189_v6 = vadd.f32 %v6784_v44, %v1188_v19  ;;  %v1557_v46 = vpop.f32.mrf.mxu1  ;;  %v2571_v5 = vpop.f32.mrf.mxu3  ;;  %v2710_v61 = vunpack.c.l.b16 %v1961_v36 }
 0x2b0   :  { %v6788_v62 = vadd.f32 %v2571_v5, %v6680_v16  ;;  %v4633_v16 = vld [vmem:[%s7748_s0 + $0x2a0] sm:$0xf] }
 0x2b1   :  { %v1558_v37 = vadd.f32 %v1557_v46, %v1189_v6  ;;  %1227 = vmatmul.bf16.gmra.mxu0 %v4626_v59  ;;  %v5480_v59 = vld [vmem:[%s7748_s0 + $0x2a4] sm:$0xf0] }
 0x2b2   :  { %1596 = vmatmul.bf16.gmra.mxu1 %v4630_v28  ;;  %v5479_v28 = vld [vmem:[%s7748_s0 + $0x2a4] sm:$0xf]  ;;  %v4634_v6 = vor.u32 %v5480_v59, %v4633_v16 }
 0x2b3   :  { %v1818_v32 = vmax.f32 %v1558_v37, 0.0  ;;  %v4638_v5 = vor.u32 %v5479_v28, %v4635_v8  ;;  %v5482_v8 = vld [vmem:[%s7748_s0 + $0x2b4] sm:$0xf0] }
 0x2b5   :  { %v1962_v51 = vpack.c.bf16 %v1818_v32, %v1818_v32 }
 0x2b6   :  { %v1190_v18 = vpop.f32.mrf.mxu0 }
 0x2b7   :  { %v2711_v14 = vunpack.c.l.b16 %v1962_v51  ;;  %v1191_v56 = vadd.f32 %v6784_v44, %v1190_v18  ;;  %v1559_v40 = vpop.f32.mrf.mxu1  ;;  %v6791_v26 = vpop.f32.mrf.mxu3 }
 0x2b8   :  { %7767 = vst [vmem:[#allocation16_spill] sm:$0xff] %v6791_v26 }
 0x2b9   :  { %v2718_v43 = vpack.c.b16 %v2711_v14, %v2710_v61  ;;  %v1560_v19 = vadd.f32 %v1559_v40, %v1191_v56 }
 0x2bb   :  { %5035 = vmatmul.msk.bf16.gmra.mxu3 %vm2083_vm0, %v2718_v43  ;;  %v1819_v37 = vmax.f32 %v1560_v19, 0.0 }
 0x2bd   :  { %v1963_v14 = vpack.c.bf16 %v1819_v37, %v1819_v37 }
 0x2be   :  { %v1193_v46 = vpop.f32.mrf.mxu0 }
 0x2bf   :  { %v1194_v36 = vadd.f32 %v6784_v44, %v1193_v46  ;;  %v1562_v32 = vpop.f32.mrf.mxu1  ;;  %v2576_v51 = vpop.f32.mrf.mxu3  ;;  %v2712_v26 = vunpack.c.l.b16 %v1963_v14  ;;  %v5481_v46 = vld [vmem:[%s7748_s0 + $0x2b4] sm:$0xf] }
 0x2c0   :  { %v6808_v18 = vadd.f32 %v2576_v51, %v6700_v31  ;;  %v4641_v31 = vld [vmem:[%s7748_s0 + $0x2b0] sm:$0xf] }
 0x2c1   :  { %v1563_v61 = vadd.f32 %v1562_v32, %v1194_v36  ;;  %1232 = vmatmul.bf16.gmra.mxu0 %v4634_v6 }
 0x2c2   :  { %1601 = vmatmul.bf16.gmra.mxu1 %v4638_v5  ;;  %v4643_v5 = vld [vmem:[%s7748_s0 + $0x2b8] sm:$0xf0] }
 0x2c3   :  { %v1820_v56 = vmax.f32 %v1563_v61, 0.0  ;;  %v4646_v36 = vor.u32 %v5481_v46, %v4643_v5 }
 0x2c5   :  { %v1964_v40 = vpack.c.bf16 %v1820_v56, %v1820_v56  ;;  %v5571_v56 = vld [vmem:[%s7750_s2 + $0x80] sm:$0xff] }
 0x2c6   :  { %v1195_v43 = vpop.f32.mrf.mxu0 }
 0x2c7   :  { %v2713_v2 = vunpack.c.l.b16 %v1964_v40  ;;  %v1196_v16 = vadd.f32 %v6784_v44, %v1195_v43  ;;  %v1564_v59 = vpop.f32.mrf.mxu1  ;;  %v6811_v19 = vpop.f32.mrf.mxu3 }
 0x2c8   :  { %7768 = vst [vmem:[#allocation17_spill] sm:$0xff] %v6811_v19 }
 0x2c9   :  { %v2719_v28 = vpack.c.b16 %v2713_v2, %v2712_v26  ;;  %v1565_v6 = vadd.f32 %v1564_v59, %v1196_v16  ;;  %v5572_v2 = vld [vmem:[%s7750_s2 + $0x88] sm:$0xff]  ;;  %v4642_v26 = vor.u32 %v5482_v8, %v4641_v31 }
 0x2ca   :  { %2851 = vmatpush.bf16.msrb.mxu2 %v5572_v2 }
 0x2cb   :  { %5036 = vmatmul.msk.bf16.gmra.mxu3 %vm2083_vm0, %v2719_v28  ;;  %v1821_v32 = vmax.f32 %v1565_v6, 0.0 }
 0x2cd   :  { %v1965_v16 = vpack.c.bf16 %v1821_v32, %v1821_v32  ;;  %v4651_v32 = vld [vmem:[%s7748_s0 + $0x2c8] sm:$0xf0] }
 0x2ce   :  { %v1198_v37 = vpop.f32.mrf.mxu0  ;;  %2852 = vmatpush.bf16.msrb.mxu2 %v5571_v56 }
 0x2cf   :  { %v1199_v51 = vadd.f32 %v6784_v44, %v1198_v37  ;;  %v1567_v61 = vpop.f32.mrf.mxu1  ;;  %v2581_v14 = vpop.f32.mrf.mxu3  ;;  %v2714_v8 = vunpack.c.l.b16 %v1965_v16 }
 0x2d0   :  { %v6834_v40 = vadd.f32 %v2581_v14, %v6723_v30  ;;  %v4649_v30 = vld [vmem:[%s7748_s0 + $0x2c0] sm:$0xf] }
 0x2d1   :  { %v1568_v43 = vadd.f32 %v1567_v61, %v1199_v51  ;;  %1237 = vmatmul.bf16.gmra.mxu0 %v4642_v26  ;;  %v5484_v26 = vld [vmem:[%s7748_s0 + $0x2c4] sm:$0xf0] }
 0x2d2   :  { %1606 = vmatmul.bf16.gmra.mxu1 %v4646_v36  ;;  %v5483_v36 = vld [vmem:[%s7748_s0 + $0x2c4] sm:$0xf]  ;;  %v4650_v61 = vor.u32 %v5484_v26, %v4649_v30 }
 0x2d3   :  { %v1822_v59 = vmax.f32 %v1568_v43, 0.0  ;;  %v4654_v56 = vor.u32 %v5483_v36, %v4651_v32 }
 0x2d5   :  { %v1966_v28 = vpack.c.bf16 %v1822_v59, %v1822_v59 }
 0x2d6   :  { %v1200_v31 = vpop.f32.mrf.mxu0 }
 0x2d7   :  { %v2715_v6 = vunpack.c.l.b16 %v1966_v28  ;;  %v1201_v46 = vadd.f32 %v6784_v44, %v1200_v31  ;;  %v1569_v5 = vpop.f32.mrf.mxu1  ;;  %v6837_v2 = vpop.f32.mrf.mxu3 }
 0x2d8   :  { %7769 = vst [vmem:[#allocation18_spill] sm:$0xff] %v6837_v2 }
 0x2d9   :  { %v2720_v37 = vpack.c.b16 %v2715_v6, %v2714_v8  ;;  %v1570_v19 = vadd.f32 %v1569_v5, %v1201_v46 }
 0x2db   :  { %5037 = vmatmul.msk.bf16.gmra.mxu3 %vm2083_vm0, %v2720_v37  ;;  %v1823_v51 = vmax.f32 %v1570_v19, 0.0 }
 0x2dd   :  { %v1967_v31 = vpack.c.bf16 %v1823_v51, %v1823_v51  ;;  %v5486_v51 = vld [vmem:[%s7748_s0 + $0x2d4] sm:$0xf0] }
 0x2de   :  { %v1203_v14 = vpop.f32.mrf.mxu0 }
 0x2df   :  { %v1204_v43 = vadd.f32 %v6784_v44, %v1203_v14  ;;  %v1572_v16 = vpop.f32.mrf.mxu1  ;;  %v2586_v59 = vpop.f32.mrf.mxu3  ;;  %v2716_v6 = vunpack.c.l.b16 %v1967_v31 }
 0x2e0   :  { %v6854_v28 = vadd.f32 %v2586_v59, %v6746_v11  ;;  %v4657_v11 = vld [vmem:[%s7748_s0 + $0x2d0] sm:$0xf] }
 0x2e1   :  { %1242 = vmatmul.bf16.gmra.mxu0 %v4650_v61  ;;  %v1573_v8 = vadd.f32 %v1572_v16, %v1204_v43  ;;  %v2721_v32 = vpack.c.b16 %v2716_v6, %v2716_v6  ;;  %v5485_v43 = vld [vmem:[%s7748_s0 + $0x2d4] sm:$0xf]  ;;  %v4658_v59 = vor.u32 %v5486_v51, %v4657_v11 }
 0x2e2   :  { %1611 = vmatmul.bf16.gmra.mxu1 %v4654_v56 }
 0x2e3   :  { %v1824_v37 = vmax.f32 %v1573_v8, 0.0 }
 0x2e5   :  { %v1968_v61 = vpack.c.bf16 %v1824_v37, %v1824_v37 }
 0x2e6   :  { %v1205_v46 = vpop.f32.mrf.mxu0  ;;  %v2662_v5 = vpop.f32.mrf.mxu2 }
 0x2e7   :  { %v1206_v19 = vadd.f32 %v6784_v44, %v1205_v46  ;;  %v1574_v30 = vpop.f32.mrf.mxu1  ;;  %v2588_v26 = vpop.f32.mrf.mxu3  ;;  %v6858_v36 = vadd.f32 %v2662_v5, %v6762_v22  ;;  %v4659_v22 = vld [vmem:[%s7748_s0 + $0x2d8] sm:$0xf0]  ;;  %v2804_v46 = vunpack.c.l.b16 %v1968_v61 }
 0x2e8   :  { %v4662_v6 = vor.u32 %v5485_v43, %v4659_v22  ;;  %v4665_v43 = vld [vmem:[%s7748_s0 + $0x2e0] sm:$0xf]  ;;  %v5488_v22 = vld [vmem:[%s7748_s0 + $0x2e4] sm:$0xf0] }
 0x2e9   :  { %v1575_v14 = vadd.f32 %v1574_v30, %v1206_v19 }
 0x2eb   :  { %v1825_v56 = vmax.f32 %v1575_v14, 0.0  ;;  %5038 = vmatmul.msk.bf16.gmra.mxu3 %vm2083_vm0, %v2721_v32 }
 0x2ed   :  { %v1969_v16 = vpack.c.bf16 %v1825_v56, %v1825_v56 }
 0x2ee   :  { %v1208_v31 = vpop.f32.mrf.mxu0  ;;  %v6873_v8 = vpop.f32.mrf.mxu2 }
 0x2ef   :  { %v2805_v5 = vunpack.c.l.b16 %v1969_v16  ;;  %v1209_v37 = vadd.f32 %v6784_v44, %v1208_v31  ;;  %v1577_v19 = vpop.f32.mrf.mxu1  ;;  %v5487_v31 = vld [vmem:[%s7748_s0 + $0x2e4] sm:$0xf] }
 0x2f1   :  { %v2813_v30 = vpack.c.b16 %v2805_v5, %v2804_v46  ;;  %1247 = vmatmul.bf16.gmra.mxu0 %v4658_v59  ;;  %v1578_v26 = vadd.f32 %v1577_v19, %v1209_v37  ;;  %v4666_v46 = vor.u32 %v5488_v22, %v4665_v43 }
 0x2f2   :  { %1616 = vmatmul.bf16.gmra.mxu1 %v4662_v6 }
 0x2f3   :  { %5047 = vmatmul.msk.bf16.vlgmr.msrb.gmra.mxu2 %vm2083_vm0, %v2813_v30  ;;  %v1826_v2 = vmax.f32 %v1578_v26, 0.0 }
 0x2f5   :  { %v1970_v16 = vpack.c.bf16 %v1826_v2, %v1826_v2 }
 0x2f6   :  { %v1210_v32 = vpop.f32.mrf.mxu0  ;;  %v2667_v14 = vpop.f32.mrf.mxu2 }
 0x2f7   :  { %v1211_v11 = vadd.f32 %v6784_v44, %v1210_v32  ;;  %v1579_v51 = vpop.f32.mrf.mxu1  ;;  %v6879_v56 = vadd.f32 %v2667_v14, %v6788_v62  ;;  %v4667_v62 = vld [vmem:[%s7748_s0 + $0x2e8] sm:$0xf0]  ;;  %v2806_v30 = vunpack.c.l.b16 %v1970_v16 }
 0x2f8   :  { %v4670_v19 = vor.u32 %v5487_v31, %v4667_v62  ;;  %v4673_v31 = vld [vmem:[%s7748_s0 + $0x2f0] sm:$0xf]  ;;  %v5490_v62 = vld [vmem:[%s7748_s0 + $0x2f4] sm:$0xf0] }
 0x2f9   :  { %v1580_v61 = vadd.f32 %v1579_v51, %v1211_v11 }
 0x2fb   :  { %v1827_v59 = vmax.f32 %v1580_v61, 0.0 }
 0x2fd   :  { %v1971_v6 = vpack.c.bf16 %v1827_v59, %v1827_v59 }
 0x2fe   :  { %v1213_v5 = vpop.f32.mrf.mxu0  ;;  %v6893_v37 = vpop.f32.mrf.mxu2 }
 0x2ff   :  { %7770 = vst [vmem:[#allocation19_spill] sm:$0xff] %v6893_v37  ;;  %v2807_v26 = vunpack.c.l.b16 %v1971_v6  ;;  %v1214_v32 = vadd.f32 %v6784_v44, %v1213_v5  ;;  %v1582_v2 = vpop.f32.mrf.mxu1  ;;  %v5489_v5 = vld [vmem:[%s7748_s0 + $0x2f4] sm:$0xf] }
 0x301   :  { %v2814_v14 = vpack.c.b16 %v2807_v26, %v2806_v30  ;;  %1252 = vmatmul.bf16.gmra.mxu0 %v4666_v46  ;;  %v1583_v11 = vadd.f32 %v1582_v2, %v1214_v32  ;;  %v4674_v30 = vor.u32 %v5490_v62, %v4673_v31 }
 0x302   :  { %1621 = vmatmul.bf16.gmra.mxu1 %v4670_v19 }
 0x303   :  { %5048 = vmatmul.msk.bf16.gmra.mxu2 %vm2083_vm0, %v2814_v14  ;;  %v1828_v49 = vmax.f32 %v1583_v11, 0.0 }
 0x305   :  { %v1972_v6 = vpack.c.bf16 %v1828_v49, %v1828_v49 }
 0x306   :  { %v1215_v51 = vpop.f32.mrf.mxu0  ;;  %v2672_v61 = vpop.f32.mrf.mxu2 }
 0x307   :  { %v1216_v43 = vadd.f32 %v6784_v44, %v1215_v51  ;;  %v1584_v22 = vpop.f32.mrf.mxu1  ;;  %v6899_v59 = vadd.f32 %v2672_v61, %v6808_v18  ;;  %v4675_v18 = vld [vmem:[%s7748_s0 + $0x2f8] sm:$0xf0]  ;;  %v2808_v14 = vunpack.c.l.b16 %v1972_v6 }
 0x308   :  { %v4678_v2 = vor.u32 %v5489_v5, %v4675_v18  ;;  %v5573_v18 = vld [vmem:[%s7750_s2 + $0x90] sm:$0xff] }
 0x309   :  { %v1585_v16 = vadd.f32 %v1584_v22, %v1216_v43  ;;  %v5574_v22 = vld [vmem:[%s7750_s2 + $0x98] sm:$0xff] }
 0x30a   :  { %2947 = vmatpush.bf16.msrb.mxu3 %v5574_v22 }
 0x30b   :  { %v1829_v46 = vmax.f32 %v1585_v16, 0.0 }
 0x30d   :  { %v1973_v19 = vpack.c.bf16 %v1829_v46, %v1829_v46 }
 0x30e   :  { %v1218_v26 = vpop.f32.mrf.mxu0  ;;  %v6913_v32 = vpop.f32.mrf.mxu2  ;;  %2948 = vmatpush.bf16.msrb.mxu3 %v5573_v18 }
 0x30f   :  { %7771 = vst [vmem:[#allocation20_spill] sm:$0xff] %v6913_v32  ;;  %v2809_v11 = vunpack.c.l.b16 %v1973_v19  ;;  %v1219_v51 = vadd.f32 %v6784_v44, %v1218_v26  ;;  %v1587_v49 = vpop.f32.mrf.mxu1  ;;  %v5492_v26 = vld [vmem:[%s7748_s0 + $0x304] sm:$0xf0] }
 0x311   :  { %v2815_v61 = vpack.c.b16 %v2809_v11, %v2808_v14  ;;  %1257 = vmatmul.bf16.gmra.mxu0 %v4674_v30  ;;  %v1588_v43 = vadd.f32 %v1587_v49, %v1219_v51  ;;  %v4681_v30 = vld [vmem:[%s7748_s0 + $0x300] sm:$0xf]  ;;  %v4683_v11 = vld [vmem:[%s7748_s0 + $0x308] sm:$0xf0] }
 0x312   :  { %1626 = vmatmul.bf16.gmra.mxu1 %v4678_v2  ;;  %v4682_v49 = vor.u32 %v5492_v26, %v4681_v30 }
 0x313   :  { %5049 = vmatmul.msk.bf16.gmra.mxu2 %vm2083_vm0, %v2815_v61  ;;  %v1830_v62 = vmax.f32 %v1588_v43, 0.0 }
 0x315   :  { %v1974_v2 = vpack.c.bf16 %v1830_v62, %v1830_v62 }
 0x316   :  { %v1220_v16 = vpop.f32.mrf.mxu0  ;;  %v2677_v31 = vpop.f32.mrf.mxu2 }
 0x317   :  { %v1221_v6 = vadd.f32 %v6784_v44, %v1220_v16  ;;  %v1589_v46 = vpop.f32.mrf.mxu1  ;;  %v6922_v5 = vadd.f32 %v2677_v31, %v6834_v40  ;;  %v5491_v40 = vld [vmem:[%s7748_s0 + $0x304] sm:$0xf]  ;;  %v2810_v16 = vunpack.c.l.b16 %v1974_v2 }
 0x318   :  { %v4686_v22 = vor.u32 %v5491_v40, %v4683_v11  ;;  %v4689_v40 = vld [vmem:[%s7748_s0 + $0x310] sm:$0xf]  ;;  %v5494_v11 = vld [vmem:[%s7748_s0 + $0x314] sm:$0xf0] }
 0x319   :  { %v1590_v19 = vadd.f32 %v1589_v46, %v1221_v6 }
 0x31b   :  { %v1831_v14 = vmax.f32 %v1590_v19, 0.0 }
 0x31d   :  { %v1975_v51 = vpack.c.bf16 %v1831_v14, %v1831_v14 }
 0x31e   :  { %v1223_v61 = vpop.f32.mrf.mxu0  ;;  %v6939_v43 = vpop.f32.mrf.mxu2 }
 0x31f   :  { %7772 = vst [vmem:[#allocation21_spill] sm:$0xff] %v6939_v43  ;;  %v2811_v31 = vunpack.c.l.b16 %v1975_v51  ;;  %v1224_v6 = vadd.f32 %v6784_v44, %v1223_v61  ;;  %v1592_v62 = vpop.f32.mrf.mxu1 }
 0x321   :  { %v2816_v46 = vpack.c.b16 %v2811_v31, %v2810_v16  ;;  %v1593_v18 = vadd.f32 %v1592_v62, %v1224_v6  ;;  %1262 = vmatmul.bf16.gmra.mxu0 %v4682_v49  ;;  %v5493_v49 = vld [vmem:[%s7748_s0 + $0x314] sm:$0xf] }
 0x322   :  { %1631 = vmatmul.bf16.gmra.mxu1 %v4686_v22 }
 0x323   :  { %5050 = vmatmul.msk.bf16.gmra.mxu2 %vm2083_vm0, %v2816_v46  ;;  %v1832_v19 = vmax.f32 %v1593_v18, 0.0 }
 0x325   :  { %v1976_v2 = vpack.c.bf16 %v1832_v19, %v1832_v19 }
 0x326   :  { %v1225_v32 = vpop.f32.mrf.mxu0  ;;  %v2682_v37 = vpop.f32.mrf.mxu2 }
 0x327   :  { %v1226_v30 = vadd.f32 %v6784_v44, %v1225_v32  ;;  %v1594_v26 = vpop.f32.mrf.mxu1  ;;  %v6945_v14 = vadd.f32 %v2682_v37, %v6854_v28  ;;  %v4691_v32 = vld [vmem:[%s7748_s0 + $0x318] sm:$0xf0]  ;;  %v2812_v28 = vunpack.c.l.b16 %v1976_v2  ;;  %v4690_v37 = vor.u32 %v5494_v11, %v4689_v40 }
 0x328   :  { %v4694_v16 = vor.u32 %v5493_v49, %v4691_v32 }
 0x329   :  { %v1595_v51 = vadd.f32 %v1594_v26, %v1226_v30  ;;  %v2817_v19 = vpack.c.b16 %v2812_v28, %v2812_v28  ;;  %v5496_v28 = vld [vmem:[%s7748_s0 + $0x324] sm:$0xf0] }
 0x32b   :  { %v1833_v31 = vmax.f32 %v1595_v51, 0.0 }
 0x32d   :  { %v1977_v26 = vpack.c.bf16 %v1833_v31, %v1833_v31 }
 0x32e   :  { %v1228_v61 = vpop.f32.mrf.mxu0  ;;  %v2684_v22 = vpop.f32.mrf.mxu2 }
 0x32f   :  { %v1229_v6 = vadd.f32 %v6784_v44, %v1228_v61  ;;  %v1597_v62 = vpop.f32.mrf.mxu1  ;;  %v2758_v46 = vpop.f32.mrf.mxu3  ;;  %v2900_v11 = vunpack.c.l.b16 %v1977_v26 }
 0x330   :  { %v6961_v18 = vadd.f32 %v2758_v46, %v6858_v36  ;;  %v4697_v36 = vld [vmem:[%s7748_s0 + $0x320] sm:$0xf] }
 0x331   :  { %v1598_v30 = vadd.f32 %v1597_v62, %v1229_v6  ;;  %1267 = vmatmul.bf16.gmra.mxu0 %v4690_v37  ;;  %v4698_v31 = vor.u32 %v5496_v28, %v4697_v36 }
 0x332   :  { %1636 = vmatmul.bf16.gmra.mxu1 %v4694_v16  ;;  %v4699_v16 = vld [vmem:[%s7748_s0 + $0x328] sm:$0xf0] }
 0x333   :  { %v1834_v43 = vmax.f32 %v1598_v30, 0.0  ;;  %5051 = vmatmul.msk.bf16.gmra.mxu2 %vm2083_vm0, %v2817_v19 }
 0x335   :  { %v1978_v2 = vpack.c.bf16 %v1834_v43, %v1834_v43  ;;  %v5495_v43 = vld [vmem:[%s7748_s0 + $0x324] sm:$0xf] }
 0x336   :  { %v1230_v40 = vpop.f32.mrf.mxu0  ;;  %v4702_v62 = vor.u32 %v5495_v43, %v4699_v16  ;;  %v5498_v16 = vld [vmem:[%s7748_s0 + $0x334] sm:$0xf0] }
 0x337   :  { %v2901_v49 = vunpack.c.l.b16 %v1978_v2  ;;  %v1231_v51 = vadd.f32 %v6784_v44, %v1230_v40  ;;  %v1599_v32 = vpop.f32.mrf.mxu1  ;;  %v6965_v61 = vpop.f32.mrf.mxu3 }
 0x339   :  { %v2909_v22 = vpack.c.b16 %v2901_v49, %v2900_v11  ;;  %v1600_v37 = vadd.f32 %v1599_v32, %v1231_v51 }
 0x33b   :  { %5060 = vmatmul.msk.bf16.vlgmr.msrb.gmra.mxu3 %vm2083_vm0, %v2909_v22  ;;  %v1835_v46 = vmax.f32 %v1600_v37, 0.0 }
 0x33d   :  { %v1979_v11 = vpack.c.bf16 %v1835_v46, %v1835_v46 }
 0x33e   :  { %v1233_v6 = vpop.f32.mrf.mxu0 }
 0x33f   :  { %v1234_v19 = vadd.f32 %v6784_v44, %v1233_v6  ;;  %v1602_v30 = vpop.f32.mrf.mxu1  ;;  %v2763_v26 = vpop.f32.mrf.mxu3  ;;  %v2902_v22 = vunpack.c.l.b16 %v1979_v11  ;;  %v5497_v6 = vld [vmem:[%s7748_s0 + $0x334] sm:$0xf] }
 0x340   :  { %v6982_v2 = vadd.f32 %v2763_v26, %v6879_v56  ;;  %v4705_v56 = vld [vmem:[%s7748_s0 + $0x330] sm:$0xf] }
 0x341   :  { %v1603_v40 = vadd.f32 %v1602_v30, %v1234_v19  ;;  %1272 = vmatmul.bf16.gmra.mxu0 %v4698_v31 }
 0x342   :  { %1641 = vmatmul.bf16.gmra.mxu1 %v4702_v62  ;;  %v4707_v62 = vld [vmem:[%s7748_s0 + $0x338] sm:$0xf0] }
 0x343   :  { %v1836_v49 = vmax.f32 %v1603_v40, 0.0  ;;  %v4710_v19 = vor.u32 %v5497_v6, %v4707_v62  ;;  %v5500_v62 = vld [vmem:[%s7748_s0 + $0x344] sm:$0xf0] }
 0x345   :  { %v1980_v51 = vpack.c.bf16 %v1836_v49, %v1836_v49 }
 0x346   :  { %v1235_v32 = vpop.f32.mrf.mxu0 }
 0x347   :  { %v2903_v35 = vunpack.c.l.b16 %v1980_v51  ;;  %v1236_v36 = vadd.f32 %v6784_v44, %v1235_v32  ;;  %v1604_v28 = vpop.f32.mrf.mxu1  ;;  %v6985_v37 = vpop.f32.mrf.mxu3 }
 0x348   :  { %7773 = vst [vmem:[#allocation22_spill] sm:$0xff] %v6985_v37 }
 0x349   :  { %v2910_v43 = vpack.c.b16 %v2903_v35, %v2902_v22  ;;  %v1605_v31 = vadd.f32 %v1604_v28, %v1236_v36  ;;  %v4706_v35 = vor.u32 %v5498_v16, %v4705_v56 }
 0x34b   :  { %5061 = vmatmul.msk.bf16.gmra.mxu3 %vm2083_vm0, %v2910_v43  ;;  %v1837_v30 = vmax.f32 %v1605_v31, 0.0 }
 0x34d   :  { %v1981_v32 = vpack.c.bf16 %v1837_v30, %v1837_v30 }
 0x34e   :  { %v1238_v46 = vpop.f32.mrf.mxu0 }
 0x34f   :  { %v1239_v26 = vadd.f32 %v6784_v44, %v1238_v46  ;;  %v1607_v40 = vpop.f32.mrf.mxu1  ;;  %v2768_v11 = vpop.f32.mrf.mxu3  ;;  %v2904_v43 = vunpack.c.l.b16 %v1981_v32  ;;  %v5499_v46 = vld [vmem:[%s7748_s0 + $0x344] sm:$0xf] }
 0x350   :  { %v7002_v49 = vadd.f32 %v2768_v11, %v6899_v59  ;;  %v4713_v59 = vld [vmem:[%s7748_s0 + $0x340] sm:$0xf] }
 0x351   :  { %v1608_v51 = vadd.f32 %v1607_v40, %v1239_v26  ;;  %1277 = vmatmul.bf16.gmra.mxu0 %v4706_v35  ;;  %v4714_v30 = vor.u32 %v5500_v62, %v4713_v59 }
 0x352   :  { %1646 = vmatmul.bf16.gmra.mxu1 %v4710_v19  ;;  %v4715_v19 = vld [vmem:[%s7748_s0 + $0x348] sm:$0xf0] }
 0x353   :  { %v1838_v22 = vmax.f32 %v1608_v51, 0.0  ;;  %v4718_v40 = vor.u32 %v5499_v46, %v4715_v19 }
 0x355   :  { %v1982_v36 = vpack.c.bf16 %v1838_v22, %v1838_v22 }
 0x356   :  { %v1240_v28 = vpop.f32.mrf.mxu0 }
 0x357   :  { %v2905_v37 = vunpack.c.l.b16 %v1982_v36  ;;  %v1241_v56 = vadd.f32 %v6784_v44, %v1240_v28  ;;  %v1609_v16 = vpop.f32.mrf.mxu1  ;;  %v7005_v31 = vpop.f32.mrf.mxu3  ;;  %v5575_v36 = vld [vmem:[%s7750_s2 + $0xa0] sm:$0xff] }
 0x358   :  { %7774 = vst [vmem:[#allocation23_spill] sm:$0xff] %v7005_v31 }
 0x359   :  { %v2911_v6 = vpack.c.b16 %v2905_v37, %v2904_v43  ;;  %v1610_v35 = vadd.f32 %v1609_v16, %v1241_v56  ;;  %v5576_v37 = vld [vmem:[%s7750_s2 + $0xa8] sm:$0xff] }
 0x35a   :  { %3043 = vmatpush.bf16.msra.mxu2 %v5576_v37 }
 0x35b   :  { %5062 = vmatmul.msk.bf16.gmra.mxu3 %vm2083_vm0, %v2911_v6  ;;  %v1839_v11 = vmax.f32 %v1610_v35, 0.0 }
 0x35d   :  { %v1983_v56 = vpack.c.bf16 %v1839_v11, %v1839_v11  ;;  %v4723_v11 = vld [vmem:[%s7748_s0 + $0x358] sm:$0xf0] }
 0x35e   :  { %v1243_v26 = vpop.f32.mrf.mxu0  ;;  %3044 = vmatpush.bf16.msra.mxu2 %v5575_v36 }
 0x35f   :  { %v1244_v51 = vadd.f32 %v6784_v44, %v1243_v26  ;;  %v1612_v32 = vpop.f32.mrf.mxu1  ;;  %v2773_v22 = vpop.f32.mrf.mxu3  ;;  %v2906_v62 = vunpack.c.l.b16 %v1983_v56 }
 0x360   :  { %v7028_v28 = vadd.f32 %v2773_v22, %v6922_v5  ;;  %v4721_v5 = vld [vmem:[%s7748_s0 + $0x350] sm:$0xf] }
 0x361   :  { %v1613_v43 = vadd.f32 %v1612_v32, %v1244_v51  ;;  %1282 = vmatmul.bf16.gmra.mxu0 %v4714_v30  ;;  %v5502_v30 = vld [vmem:[%s7748_s0 + $0x354] sm:$0xf0] }
 0x362   :  { %1651 = vmatmul.bf16.gmra.mxu1 %v4718_v40  ;;  %v5501_v40 = vld [vmem:[%s7748_s0 + $0x354] sm:$0xf]  ;;  %v4722_v32 = vor.u32 %v5502_v30, %v4721_v5 }
 0x363   :  { %v1840_v16 = vmax.f32 %v1613_v43, 0.0  ;;  %v4726_v36 = vor.u32 %v5501_v40, %v4723_v11 }
 0x365   :  { %v1984_v6 = vpack.c.bf16 %v1840_v16, %v1840_v16 }
 0x366   :  { %v1245_v59 = vpop.f32.mrf.mxu0 }
 0x367   :  { %v2907_v35 = vunpack.c.l.b16 %v1984_v6  ;;  %v1246_v46 = vadd.f32 %v6784_v44, %v1245_v59  ;;  %v1614_v19 = vpop.f32.mrf.mxu1  ;;  %v7031_v37 = vpop.f32.mrf.mxu3 }
 0x368   :  { %7775 = vst [vmem:[#allocation24_spill] sm:$0xff] %v7031_v37 }
 0x369   :  { %v2912_v26 = vpack.c.b16 %v2907_v35, %v2906_v62  ;;  %v1615_v31 = vadd.f32 %v1614_v19, %v1246_v46 }
 0x36b   :  { %5063 = vmatmul.msk.bf16.gmra.mxu3 %vm2083_vm0, %v2912_v26  ;;  %v1841_v51 = vmax.f32 %v1615_v31, 0.0 }
 0x36d   :  { %v1985_v59 = vpack.c.bf16 %v1841_v51, %v1841_v51  ;;  %v5504_v51 = vld [vmem:[%s7748_s0 + $0x364] sm:$0xf0] }
 0x36e   :  { %v1248_v22 = vpop.f32.mrf.mxu0 }
 0x36f   :  { %v1249_v43 = vadd.f32 %v6784_v44, %v1248_v22  ;;  %v1617_v56 = vpop.f32.mrf.mxu1  ;;  %v2778_v16 = vpop.f32.mrf.mxu3  ;;  %v2908_v35 = vunpack.c.l.b16 %v1985_v59 }
 0x370   :  { %v7048_v6 = vadd.f32 %v2778_v16, %v6945_v14  ;;  %v4729_v14 = vld [vmem:[%s7748_s0 + $0x360] sm:$0xf] }
 0x371   :  { %1287 = vmatmul.bf16.gmra.mxu0 %v4722_v32  ;;  %v1618_v62 = vadd.f32 %v1617_v56, %v1249_v43  ;;  %v2913_v11 = vpack.c.b16 %v2908_v35, %v2908_v35  ;;  %v5503_v43 = vld [vmem:[%s7748_s0 + $0x364] sm:$0xf]  ;;  %v4730_v16 = vor.u32 %v5504_v51, %v4729_v14 }
 0x372   :  { %1656 = vmatmul.bf16.gmra.mxu1 %v4726_v36 }
 0x373   :  { %v1842_v26 = vmax.f32 %v1618_v62, 0.0 }
 0x375   :  { %v1986_v32 = vpack.c.bf16 %v1842_v26, %v1842_v26 }
 0x376   :  { %v1250_v46 = vpop.f32.mrf.mxu0  ;;  %v2854_v19 = vpop.f32.mrf.mxu2 }
 0x377   :  { %v1251_v31 = vadd.f32 %v6784_v44, %v1250_v46  ;;  %v1619_v5 = vpop.f32.mrf.mxu1  ;;  %v2780_v30 = vpop.f32.mrf.mxu3  ;;  %v7052_v40 = vadd.f32 %v2854_v19, %v6961_v18  ;;  %v4731_v18 = vld [vmem:[%s7748_s0 + $0x368] sm:$0xf0]  ;;  %v2996_v46 = vunpack.c.l.b16 %v1986_v32 }
 0x378   :  { %v4734_v35 = vor.u32 %v5503_v43, %v4731_v18  ;;  %v4737_v43 = vld [vmem:[%s7748_s0 + $0x370] sm:$0xf]  ;;  %v5506_v18 = vld [vmem:[%s7748_s0 + $0x374] sm:$0xf0] }
 0x379   :  { %v1620_v22 = vadd.f32 %v1619_v5, %v1251_v31 }
 0x37b   :  { %v1843_v36 = vmax.f32 %v1620_v22, 0.0  ;;  %5064 = vmatmul.msk.bf16.gmra.mxu3 %vm2083_vm0, %v2913_v11 }
 0x37d   :  { %v1987_v56 = vpack.c.bf16 %v1843_v36, %v1843_v36 }
 0x37e   :  { %v1253_v59 = vpop.f32.mrf.mxu0  ;;  %v7067_v62 = vpop.f32.mrf.mxu2 }
 0x37f   :  { %v2997_v19 = vunpack.c.l.b16 %v1987_v56  ;;  %v1254_v26 = vadd.f32 %v6784_v44, %v1253_v59  ;;  %v1622_v31 = vpop.f32.mrf.mxu1  ;;  %v5505_v59 = vld [vmem:[%s7748_s0 + $0x374] sm:$0xf] }
 0x381   :  { %v3005_v5 = vpack.c.b16 %v2997_v19, %v2996_v46  ;;  %1292 = vmatmul.bf16.gmra.mxu0 %v4730_v16  ;;  %v1623_v30 = vadd.f32 %v1622_v31, %v1254_v26  ;;  %v4738_v46 = vor.u32 %v5506_v18, %v4737_v43 }
 0x382   :  { %1661 = vmatmul.bf16.gmra.mxu1 %v4734_v35 }
 0x383   :  { %5073 = vmatmul.msk.bf16.vlgmr.msra.gmra.mxu2 %vm2083_vm0, %v3005_v5  ;;  %v1844_v37 = vmax.f32 %v1623_v30, 0.0 }
 0x385   :  { %v1988_v56 = vpack.c.bf16 %v1844_v37, %v1844_v37 }
 0x386   :  { %v1255_v11 = vpop.f32.mrf.mxu0  ;;  %v2859_v22 = vpop.f32.mrf.mxu2 }
 0x387   :  { %v1256_v14 = vadd.f32 %v6784_v44, %v1255_v11  ;;  %v1624_v51 = vpop.f32.mrf.mxu1  ;;  %v7073_v36 = vadd.f32 %v2859_v22, %v6982_v2  ;;  %v4739_v2 = vld [vmem:[%s7748_s0 + $0x378] sm:$0xf0]  ;;  %v2998_v5 = vunpack.c.l.b16 %v1988_v56 }
 0x388   :  { %v4742_v31 = vor.u32 %v5505_v59, %v4739_v2  ;;  %v4745_v59 = vld [vmem:[%s7748_s0 + $0x380] sm:$0xf]  ;;  %v5508_v2 = vld [vmem:[%s7748_s0 + $0x384] sm:$0xf0] }
 0x389   :  { %v1625_v32 = vadd.f32 %v1624_v51, %v1256_v14 }
 0x38b   :  { %v1845_v16 = vmax.f32 %v1625_v32, 0.0 }
 0x38d   :  { %v1989_v35 = vpack.c.bf16 %v1845_v16, %v1845_v16 }
 0x38e   :  { %v1258_v19 = vpop.f32.mrf.mxu0  ;;  %v7087_v26 = vpop.f32.mrf.mxu2 }
 0x38f   :  { %7776 = vst [vmem:[#allocation25_spill] sm:$0xff] %v7087_v26  ;;  %v2999_v30 = vunpack.c.l.b16 %v1989_v35  ;;  %v1259_v11 = vadd.f32 %v6784_v44, %v1258_v19  ;;  %v1627_v37 = vpop.f32.mrf.mxu1  ;;  %v5507_v19 = vld [vmem:[%s7748_s0 + $0x384] sm:$0xf] }
 0x391   :  { %v3006_v22 = vpack.c.b16 %v2999_v30, %v2998_v5  ;;  %1297 = vmatmul.bf16.gmra.mxu0 %v4738_v46  ;;  %v1628_v14 = vadd.f32 %v1627_v37, %v1259_v11  ;;  %v4746_v5 = vor.u32 %v5508_v2, %v4745_v59 }
 0x392   :  { %1666 = vmatmul.bf16.gmra.mxu1 %v4742_v31 }
 0x393   :  { %5074 = vmatmul.msk.bf16.gmra.mxu2 %vm2083_vm0, %v3006_v22  ;;  %v1846_v63 = vmax.f32 %v1628_v14, 0.0 }
 0x395   :  { %v1990_v35 = vpack.c.bf16 %v1846_v63, %v1846_v63 }
 0x396   :  { %v1260_v51 = vpop.f32.mrf.mxu0  ;;  %v2864_v32 = vpop.f32.mrf.mxu2 }
 0x397   :  { %v1261_v43 = vadd.f32 %v6784_v44, %v1260_v51  ;;  %v1629_v18 = vpop.f32.mrf.mxu1  ;;  %v7093_v16 = vadd.f32 %v2864_v32, %v7002_v49  ;;  %v4747_v49 = vld [vmem:[%s7748_s0 + $0x388] sm:$0xf0]  ;;  %v3000_v22 = vunpack.c.l.b16 %v1990_v35  ;;  %v5578_v32 = vld [vmem:[%s7750_s2 + $0xb8] sm:$0xff] }
 0x398   :  { %v4750_v37 = vor.u32 %v5507_v19, %v4747_v49  ;;  %3139 = vmatpush.bf16.msra.mxu3 %v5578_v32  ;;  %v5577_v49 = vld [vmem:[%s7750_s2 + $0xb0] sm:$0xff] }
 0x399   :  { %v1630_v56 = vadd.f32 %v1629_v18, %v1261_v43 }
 0x39b   :  { %v1847_v46 = vmax.f32 %v1630_v56, 0.0 }
 0x39c   :  { %3140 = vmatpush.bf16.msra.mxu3 %v5577_v49 }
 0x39d   :  { %v1991_v31 = vpack.c.bf16 %v1847_v46, %v1847_v46 }
 0x39e   :  { %v1263_v30 = vpop.f32.mrf.mxu0  ;;  %v7107_v11 = vpop.f32.mrf.mxu2 }
 0x39f   :  { %7777 = vst [vmem:[#allocation26_spill] sm:$0xff] %v7107_v11  ;;  %v3001_v14 = vunpack.c.l.b16 %v1991_v31  ;;  %v1264_v51 = vadd.f32 %v6784_v44, %v1263_v30  ;;  %v1632_v63 = vpop.f32.mrf.mxu1  ;;  %v5510_v30 = vld [vmem:[%s7748_s0 + $0x394] sm:$0xf0] }
 0x3a1   :  { %v3007_v43 = vpack.c.b16 %v3001_v14, %v3000_v22  ;;  %1302 = vmatmul.bf16.gmra.mxu0 %v4746_v5  ;;  %v1633_v18 = vadd.f32 %v1632_v63, %v1264_v51  ;;  %v4753_v5 = vld [vmem:[%s7748_s0 + $0x390] sm:$0xf]  ;;  %v4755_v14 = vld [vmem:[%s7748_s0 + $0x398] sm:$0xf0] }
 0x3a2   :  { %1671 = vmatmul.bf16.gmra.mxu1 %v4750_v37  ;;  %v4754_v63 = vor.u32 %v5510_v30, %v4753_v5 }
 0x3a3   :  { %5075 = vmatmul.msk.bf16.gmra.mxu2 %vm2083_vm0, %v3007_v43  ;;  %v1848_v2 = vmax.f32 %v1633_v18, 0.0 }
 0x3a5   :  { %v1992_v37 = vpack.c.bf16 %v1848_v2, %v1848_v2 }
 0x3a6   :  { %v1265_v56 = vpop.f32.mrf.mxu0  ;;  %v2869_v59 = vpop.f32.mrf.mxu2 }
 0x3a7   :  { %v1266_v35 = vadd.f32 %v6784_v44, %v1265_v56  ;;  %v1634_v46 = vpop.f32.mrf.mxu1  ;;  %v7116_v19 = vadd.f32 %v2869_v59, %v7028_v28  ;;  %v5509_v28 = vld [vmem:[%s7748_s0 + $0x394] sm:$0xf]  ;;  %v3002_v56 = vunpack.c.l.b16 %v1992_v37 }
 0x3a8   :  { %v4758_v18 = vor.u32 %v5509_v28, %v4755_v14  ;;  %v4761_v28 = vld [vmem:[%s7748_s0 + $0x3a0] sm:$0xf]  ;;  %v5512_v14 = vld [vmem:[%s7748_s0 + $0x3a4] sm:$0xf0] }
 0x3a9   :  { %v1635_v31 = vadd.f32 %v1634_v46, %v1266_v35 }
 0x3ab   :  { %v1849_v22 = vmax.f32 %v1635_v31, 0.0 }
 0x3ad   :  { %v1993_v51 = vpack.c.bf16 %v1849_v22, %v1849_v22 }
 0x3ae   :  { %v1268_v32 = vpop.f32.mrf.mxu0  ;;  %v7133_v43 = vpop.f32.mrf.mxu2 }
 0x3af   :  { %7778 = vst [vmem:[#allocation27_spill] sm:$0xff] %v7133_v43  ;;  %v3003_v59 = vunpack.c.l.b16 %v1993_v51  ;;  %v1269_v35 = vadd.f32 %v6784_v44, %v1268_v32  ;;  %v1637_v2 = vpop.f32.mrf.mxu1 }
 0x3b1   :  { %v3008_v46 = vpack.c.b16 %v3003_v59, %v3002_v56  ;;  %v1638_v49 = vadd.f32 %v1637_v2, %v1269_v35  ;;  %1307 = vmatmul.bf16.gmra.mxu0 %v4754_v63  ;;  %v5511_v63 = vld [vmem:[%s7748_s0 + $0x3a4] sm:$0xf] }
 0x3b2   :  { %1676 = vmatmul.bf16.gmra.mxu1 %v4758_v18 }
 0x3b3   :  { %5076 = vmatmul.msk.bf16.gmra.mxu2 %vm2083_vm0, %v3008_v46  ;;  %v1850_v31 = vmax.f32 %v1638_v49, 0.0 }
 0x3b5   :  { %v1994_v37 = vpack.c.bf16 %v1850_v31, %v1850_v31 }
 0x3b6   :  { %v1270_v11 = vpop.f32.mrf.mxu0  ;;  %v2874_v26 = vpop.f32.mrf.mxu2 }
 0x3b7   :  { %v1271_v5 = vadd.f32 %v6784_v44, %v1270_v11  ;;  %v1639_v30 = vpop.f32.mrf.mxu1  ;;  %v7139_v22 = vadd.f32 %v2874_v26, %v7048_v6  ;;  %v4763_v11 = vld [vmem:[%s7748_s0 + $0x3a8] sm:$0xf0]  ;;  %v3004_v6 = vunpack.c.l.b16 %v1994_v37  ;;  %v4762_v26 = vor.u32 %v5512_v14, %v4761_v28 }
 0x3b8   :  { %v4766_v56 = vor.u32 %v5511_v63, %v4763_v11 }
 0x3b9   :  { %v1640_v51 = vadd.f32 %v1639_v30, %v1271_v5  ;;  %v3009_v31 = vpack.c.b16 %v3004_v6, %v3004_v6  ;;  %v5514_v6 = vld [vmem:[%s7748_s0 + $0x3b4] sm:$0xf0] }
 0x3bb   :  { %v1851_v59 = vmax.f32 %v1640_v51, 0.0 }
 0x3bd   :  { %v1995_v30 = vpack.c.bf16 %v1851_v59, %v1851_v59 }
 0x3be   :  { %v1273_v32 = vpop.f32.mrf.mxu0  ;;  %v2876_v18 = vpop.f32.mrf.mxu2 }
 0x3bf   :  { %v1274_v35 = vadd.f32 %v6784_v44, %v1273_v32  ;;  %v1642_v2 = vpop.f32.mrf.mxu1  ;;  %v2950_v46 = vpop.f32.mrf.mxu3  ;;  %v3092_v14 = vunpack.c.l.b16 %v1995_v30 }
 0x3c0   :  { %v7155_v49 = vadd.f32 %v2950_v46, %v7052_v40  ;;  %v4769_v40 = vld [vmem:[%s7748_s0 + $0x3b0] sm:$0xf]  ;;  %v7177_v46 = vld [vmem:[%s7749_s4] ss:$0 sm:$0xff] }
 0x3c1   :  { %v1643_v5 = vadd.f32 %v1642_v2, %v1274_v35  ;;  %1312 = vmatmul.bf16.gmra.mxu0 %v4762_v26 }
 0x3c2   :  { %1681 = vmatmul.bf16.gmra.mxu1 %v4766_v56  ;;  %v4770_v56 = vor.u32 %v5514_v6, %v4769_v40 }
 0x3c3   :  { %v1852_v43 = vmax.f32 %v1643_v5, 0.0  ;;  %5077 = vmatmul.msk.bf16.gmra.mxu2 %vm2083_vm0, %v3009_v31 }
 0x3c5   :  { %v1996_v37 = vpack.c.bf16 %v1852_v43, %v1852_v43  ;;  %v5513_v43 = vld [vmem:[%s7748_s0 + $0x3b4] sm:$0xf] }
 0x3c6   :  { %v1275_v28 = vpop.f32.mrf.mxu0 }
 0x3c7   :  { %v3093_v63 = vunpack.c.l.b16 %v1996_v37  ;;  %v1276_v51 = vadd.f32 %v6784_v44, %v1275_v28  ;;  %v1644_v11 = vpop.f32.mrf.mxu1  ;;  %v7159_v32 = vpop.f32.mrf.mxu3  ;;  %v4771_v44 = vld [vmem:[%s7748_s0 + $0x3b8] sm:$0xf0] }
 0x3c8   :  { %v4774_v35 = vor.u32 %v5513_v43, %v4771_v44 }
 0x3c9   :  { %v3101_v18 = vpack.c.b16 %v3093_v63, %v3092_v14  ;;  %v1645_v26 = vadd.f32 %v1644_v11, %v1276_v51 }
 0x3cb   :  { %5086 = vmatmul.msk.bf16.vlgmr.msra.gmra.mxu3 %vm2083_vm0, %v3101_v18  ;;  %v1853_v2 = vmax.f32 %v1645_v26, 0.0 }
 0x3cd   :  { %v1997_v14 = vpack.c.bf16 %v1853_v2, %v1853_v2 }
 0x3ce   :  { %v1278_v59 = vpop.f32.mrf.mxu0 }
 0x3cf   :  { %v1279_v31 = vadd.f32 %v7177_v46, %v1278_v59  ;;  %v1647_v5 = vpop.f32.mrf.mxu1  ;;  %v2955_v30 = vpop.f32.mrf.mxu3  ;;  %v3094_v18 = vunpack.c.l.b16 %v1997_v14 }
 0x3d0   :  { %v7181_v37 = vadd.f32 %v2955_v30, %v7073_v36 }
 0x3d1   :  { %v1648_v28 = vadd.f32 %v1647_v5, %v1279_v31  ;;  %1317 = vmatmul.bf16.gmra.mxu0 %v4770_v56 }
 0x3d2   :  { %1686 = vmatmul.bf16.gmra.mxu1 %v4774_v35 }
 0x3d3   :  { %v1854_v63 = vmax.f32 %v1648_v28, 0.0 }
 0x3d5   :  { %v1998_v51 = vpack.c.bf16 %v1854_v63, %v1854_v63 }
 0x3d6   :  { %v1280_v11 = vpop.f32.mrf.mxu0 }
 0x3d7   :  { %v3095_v40 = vunpack.c.l.b16 %v1998_v51  ;;  %v1281_v6 = vadd.f32 %v7177_v46, %v1280_v11  ;;  %v1649_v26 = vpop.f32.mrf.mxu1  ;;  %v7184_v43 = vpop.f32.mrf.mxu3 }
 0x3d8   :  { %7779 = vst [vmem:[#allocation28_spill] sm:$0xff] %v7184_v43 }
 0x3d9   :  { %v3102_v44 = vpack.c.b16 %v3095_v40, %v3094_v18  ;;  %v1650_v59 = vadd.f32 %v1649_v26, %v1281_v6 }
 0x3db   :  { %5087 = vmatmul.msk.bf16.gmra.mxu3 %vm2083_vm0, %v3102_v44  ;;  %v1855_v30 = vmax.f32 %v1650_v59, 0.0 }
 0x3dd   :  { %v1999_v28 = vpack.c.bf16 %v1855_v30, %v1855_v30 }
 0x3de   :  { %v1283_v36 = vpop.f32.mrf.mxu0 }
 0x3df   :  { %v1284_v56 = vadd.f32 %v7177_v46, %v1283_v36  ;;  %v1652_v35 = vpop.f32.mrf.mxu1  ;;  %v2960_v2 = vpop.f32.mrf.mxu3  ;;  %v3096_v11 = vunpack.c.l.b16 %v1999_v28  ;;  %v5582_v28 = vld [vmem:[%s7750_s2 + $0xd8] sm:$0xff] }
 0x3e0   :  { %v7189_v31 = vadd.f32 %v2960_v2, %v7093_v16  ;;  %v5580_v16 = vld [vmem:[%s7750_s2 + $0xc8] sm:$0xff]  ;;  %v5579_v2 = vld [vmem:[%s7750_s2 + $0xc0] sm:$0xff]  ;;  %3331 = vmatpush.bf16.msrb.mxu3 %v5582_v28 }
 0x3e1   :  { %v1653_v5 = vadd.f32 %v1652_v35, %v1284_v56  ;;  %3235 = vmatpush.bf16.msrb.mxu2 %v5580_v16 }
 0x3e3   :  { %v1856_v14 = vmax.f32 %v1653_v5, 0.0 }
 0x3e5   :  { %v2000_v63 = vpack.c.bf16 %v1856_v14, %v1856_v14  ;;  %3236 = vmatpush.bf16.msrb.mxu2 %v5579_v2 }
 0x3e6   :  { %v1285_v51 = vpop.f32.mrf.mxu0 }
 0x3e7   :  { %v3097_v43 = vunpack.c.l.b16 %v2000_v63  ;;  %v1286_v18 = vadd.f32 %v7177_v46, %v1285_v51  ;;  %v1654_v40 = vpop.f32.mrf.mxu1  ;;  %v7192_v6 = vpop.f32.mrf.mxu3 }
 0x3e8   :  { %7780 = vst [vmem:[#allocation29_spill] sm:$0xff] %v7192_v6 }
 0x3e9   :  { %v3103_v26 = vpack.c.b16 %v3097_v43, %v3096_v11  ;;  %v1655_v44 = vadd.f32 %v1654_v40, %v1286_v18 }
 0x3eb   :  { %5088 = vmatmul.msk.bf16.gmra.mxu3 %vm2083_vm0, %v3103_v26  ;;  %v1857_v36 = vmax.f32 %v1655_v44, 0.0 }
 0x3ed   :  { %v2001_v14 = vpack.c.bf16 %v1857_v36, %v1857_v36 }
 0x3ee   :  { %v1288_v59 = vpop.f32.mrf.mxu0 }
 0x3ef   :  { %v1289_v30 = vadd.f32 %v7177_v46, %v1288_v59  ;;  %v1657_v56 = vpop.f32.mrf.mxu1  ;;  %v2965_v35 = vpop.f32.mrf.mxu3  ;;  %v3098_v18 = vunpack.c.l.b16 %v2001_v14 }
 0x3f0   :  { %v7203_v43 = vadd.f32 %v2965_v35, %v7116_v19 }
 0x3f1   :  { %v1658_v5 = vadd.f32 %v1657_v56, %v1289_v30 }
 0x3f3   :  { %v1858_v63 = vmax.f32 %v1658_v5, 0.0 }
 0x3f5   :  { %v2002_v51 = vpack.c.bf16 %v1858_v63, %v1858_v63 }
 0x3f6   :  { %v1290_v11 = vpop.f32.mrf.mxu0 }
 0x3f7   :  { %v3099_v40 = vunpack.c.l.b16 %v2002_v51  ;;  %v1291_v26 = vadd.f32 %v7177_v46, %v1290_v11  ;;  %v1659_v44 = vpop.f32.mrf.mxu1  ;;  %v7209_v16 = vpop.f32.mrf.mxu3 }
 0x3f8   :  { %7781 = vst [vmem:[#allocation30_spill] sm:$0xff] %v7209_v16 }
 0x3f9   :  { %v3104_v19 = vpack.c.b16 %v3099_v40, %v3098_v18  ;;  %v1660_v59 = vadd.f32 %v1659_v44, %v1291_v26 }
 0x3fb   :  { %5089 = vmatmul.msk.bf16.gmra.mxu3 %vm2083_vm0, %v3104_v19  ;;  %v1859_v30 = vmax.f32 %v1660_v59, 0.0 }
 0x3fd   :  { %v2003_v28 = vpack.c.bf16 %v1859_v30, %v1859_v30 }
 0x3fe   :  { %v1293_v56 = vpop.f32.mrf.mxu0 }
 0x3ff   :  { %v1294_v35 = vadd.f32 %v7177_v46, %v1293_v56  ;;  %v1662_v36 = vpop.f32.mrf.mxu1  ;;  %v2970_v2 = vpop.f32.mrf.mxu3  ;;  %v3100_v63 = vunpack.c.l.b16 %v2003_v28 }
 0x400   :  { %v7214_v5 = vadd.f32 %v2970_v2, %v7139_v22 }
 0x401   :  { %v1663_v14 = vadd.f32 %v1662_v36, %v1294_v35  ;;  %v3105_v19 = vpack.c.b16 %v3100_v63, %v3100_v63 }
 0x403   :  { %v1860_v6 = vmax.f32 %v1663_v14, 0.0 }
 0x405   :  { %v2004_v56 = vpack.c.bf16 %v1860_v6, %v1860_v6 }
 0x406   :  { %v1295_v51 = vpop.f32.mrf.mxu0  ;;  %v3046_v11 = vpop.f32.mrf.mxu2 }
 0x407   :  { %v1296_v18 = vadd.f32 %v7177_v46, %v1295_v51  ;;  %v1664_v40 = vpop.f32.mrf.mxu1  ;;  %v2972_v26 = vpop.f32.mrf.mxu3  ;;  %v7218_v44 = vadd.f32 %v3046_v11, %v7155_v49  ;;  %v3188_v36 = vunpack.c.l.b16 %v2004_v56 }
 0x409   :  { %v1665_v59 = vadd.f32 %v1664_v40, %v1296_v18  ;;  %v5581_v40 = vld [vmem:[%s7750_s2 + $0xd0] sm:$0xff] }
 0x40a   :  { %3332 = vmatpush.bf16.msrb.mxu3 %v5581_v40 }
 0x40b   :  { %v1861_v16 = vmax.f32 %v1665_v59, 0.0  ;;  %5090 = vmatmul.msk.bf16.gmra.mxu3 %vm2083_vm0, %v3105_v19 }
 0x40d   :  { %v2005_v22 = vpack.c.bf16 %v1861_v16, %v1861_v16 }
 0x40e   :  { %v1298_v30 = vpop.f32.mrf.mxu0  ;;  %v7221_v35 = vpop.f32.mrf.mxu2 }
 0x40f   :  { %7782 = vst [vmem:[#allocation31_spill] sm:$0xff] %v7221_v35  ;;  %v3189_v2 = vunpack.c.l.b16 %v2005_v22  ;;  %v1299_v28 = vadd.f32 %v7177_v46, %v1298_v30  ;;  %v1667_v14 = vpop.f32.mrf.mxu1 }
 0x411   :  { %v3197_v51 = vpack.c.b16 %v3189_v2, %v3188_v36  ;;  %v1668_v26 = vadd.f32 %v1667_v14, %v1299_v28 }
 0x413   :  { %5099 = vmatmul.msk.bf16.vlgmr.msrb.gmra.mxu2 %vm2083_vm0, %v3197_v51  ;;  %v1862_v11 = vmax.f32 %v1668_v26, 0.0 }
 0x415   :  { %v2006_v59 = vpack.c.bf16 %v1862_v11, %v1862_v11 }
 0x416   :  { %v1300_v49 = vpop.f32.mrf.mxu0  ;;  %v3051_v63 = vpop.f32.mrf.mxu2 }
 0x417   :  { %v1301_v6 = vadd.f32 %v7177_v46, %v1300_v49  ;;  %v1669_v18 = vpop.f32.mrf.mxu1  ;;  %v7227_v16 = vadd.f32 %v3051_v63, %v7181_v37  ;;  %v3190_v2 = vunpack.c.l.b16 %v2006_v59 }
 0x419   :  { %v1670_v19 = vadd.f32 %v1669_v18, %v1301_v6 }
 0x41b   :  { %v1863_v56 = vmax.f32 %v1670_v19, 0.0 }
 0x41d   :  { %v2007_v22 = vpack.c.bf16 %v1863_v56, %v1863_v56 }
 0x41e   :  { %v1303_v30 = vpop.f32.mrf.mxu0  ;;  %v7232_v36 = vpop.f32.mrf.mxu2 }
 0x41f   :  { %7783 = vst [vmem:[#allocation32_spill] sm:$0xff] %v7232_v36  ;;  %v3191_v28 = vunpack.c.l.b16 %v2007_v22  ;;  %v1304_v14 = vadd.f32 %v7177_v46, %v1303_v30  ;;  %v1672_v51 = vpop.f32.mrf.mxu1 }
 0x421   :  { %v3198_v26 = vpack.c.b16 %v3191_v28, %v3190_v2  ;;  %v1673_v37 = vadd.f32 %v1672_v51, %v1304_v14 }
 0x423   :  { %5100 = vmatmul.msk.bf16.gmra.mxu2 %vm2083_vm0, %v3198_v26  ;;  %v1864_v35 = vmax.f32 %v1673_v37, 0.0 }
 0x425   :  { %v2008_v19 = vpack.c.bf16 %v1864_v35, %v1864_v35 }
 0x426   :  { %v1305_v49 = vpop.f32.mrf.mxu0  ;;  %v3056_v63 = vpop.f32.mrf.mxu2 }
 0x427   :  { %v1306_v6 = vadd.f32 %v7177_v46, %v1305_v49  ;;  %v1674_v11 = vpop.f32.mrf.mxu1  ;;  %v7238_v18 = vadd.f32 %v3056_v63, %v7189_v31  ;;  %v3192_v2 = vunpack.c.l.b16 %v2008_v19 }
 0x429   :  { %v1675_v40 = vadd.f32 %v1674_v11, %v1306_v6 }
 0x42b   :  { %v1865_v59 = vmax.f32 %v1675_v40, 0.0 }
 0x42d   :  { %v2009_v56 = vpack.c.bf16 %v1865_v59, %v1865_v59  ;;  %v5584_v59 = vld [vmem:[%s7750_s2 + $0xe8] sm:$0xff] }
 0x42e   :  { %v1308_v22 = vpop.f32.mrf.mxu0  ;;  %v7240_v30 = vpop.f32.mrf.mxu2  ;;  %3427 = vmatpush.bf16.msra.mxu2 %v5584_v59 }
 0x42f   :  { %7784 = vst [vmem:[#allocation33_spill] sm:$0xff] %v7240_v30  ;;  %v3193_v28 = vunpack.c.l.b16 %v2009_v56  ;;  %v1309_v14 = vadd.f32 %v7177_v46, %v1308_v22  ;;  %v1677_v51 = vpop.f32.mrf.mxu1 }
 0x431   :  { %v3199_v26 = vpack.c.b16 %v3193_v28, %v3192_v2  ;;  %v1678_v37 = vadd.f32 %v1677_v51, %v1309_v14 }
 0x433   :  { %5101 = vmatmul.msk.bf16.gmra.mxu2 %vm2083_vm0, %v3199_v26  ;;  %v1866_v31 = vmax.f32 %v1678_v37, 0.0 }
 0x435   :  { %v2010_v40 = vpack.c.bf16 %v1866_v31, %v1866_v31 }
 0x436   :  { %v1310_v49 = vpop.f32.mrf.mxu0  ;;  %v3061_v36 = vpop.f32.mrf.mxu2 }
 0x437   :  { %v1311_v63 = vadd.f32 %v7177_v46, %v1310_v49  ;;  %v1679_v35 = vpop.f32.mrf.mxu1  ;;  %v7246_v6 = vadd.f32 %v3061_v36, %v7203_v43  ;;  %v3194_v28 = vunpack.c.l.b16 %v2010_v40  ;;  %v5583_v43 = vld [vmem:[%s7750_s2 + $0xe0] sm:$0xff]  ;;  %v5586_v49 = vld [vmem:[%s7750_s2 + $0xf8] sm:$0xff] }
 0x438   :  { %3428 = vmatpush.bf16.msra.mxu2 %v5583_v43  ;;  %3523 = vmatpush.bf16.msra.mxu3 %v5586_v49 }
 0x439   :  { %v1680_v11 = vadd.f32 %v1679_v35, %v1311_v63 }
 0x43b   :  { %v1867_v19 = vmax.f32 %v1680_v11, 0.0 }
 0x43d   :  { %v2011_v56 = vpack.c.bf16 %v1867_v19, %v1867_v19 }
 0x43e   :  { %v1313_v22 = vpop.f32.mrf.mxu0  ;;  %v7251_v2 = vpop.f32.mrf.mxu2 }
 0x43f   :  { %7785 = vst [vmem:[#allocation34_spill] sm:$0xff] %v7251_v2  ;;  %v3195_v14 = vunpack.c.l.b16 %v2011_v56  ;;  %v1314_v51 = vadd.f32 %v7177_v46, %v1313_v22  ;;  %v1682_v26 = vpop.f32.mrf.mxu1 }
 0x441   :  { %v3200_v36 = vpack.c.b16 %v3195_v14, %v3194_v28  ;;  %v1683_v37 = vadd.f32 %v1682_v26, %v1314_v51 }
 0x443   :  { %5102 = vmatmul.msk.bf16.gmra.mxu2 %vm2083_vm0, %v3200_v36  ;;  %v1868_v31 = vmax.f32 %v1683_v37, 0.0 }
 0x445   :  { %v2012_v59 = vpack.c.bf16 %v1868_v31, %v1868_v31 }
 0x446   :  { %v1315_v63 = vpop.f32.mrf.mxu0  ;;  %v3066_v35 = vpop.f32.mrf.mxu2 }
 0x447   :  { %v1316_v11 = vadd.f32 %v7177_v46, %v1315_v63  ;;  %v1684_v40 = vpop.f32.mrf.mxu1  ;;  %v7263_v19 = vadd.f32 %v3066_v35, %v7214_v5  ;;  %v3196_v22 = vunpack.c.l.b16 %v2012_v59 }
 0x449   :  { %v1685_v56 = vadd.f32 %v1684_v40, %v1316_v11  ;;  %v3201_v49 = vpack.c.b16 %v3196_v22, %v3196_v22  ;;  %v1872_v22 = vmax.f32 %v5977_v4, 0.0  ;;  %v1351_v4 = vadd.f32 %v7177_v46, %v6176_v33 }
 0x44a   :  { %v1356_v33 = vadd.f32 %v7177_v46, %v6205_v10 }
 0x44b   :  { %v1869_v51 = vmax.f32 %v1685_v56, 0.0 }
 0x44d   :  { %v2013_v63 = vpack.c.bf16 %v1869_v51, %v1869_v51 }
 0x44e   :  { %v1318_v28 = vpop.f32.mrf.mxu0  ;;  %v3068_v14 = vpop.f32.mrf.mxu2 }
 0x44f   :  { %v1319_v26 = vadd.f32 %v7177_v46, %v1318_v28  ;;  %v1687_v43 = vpop.f32.mrf.mxu1  ;;  %v3142_v36 = vpop.f32.mrf.mxu3  ;;  %v3284_v35 = vunpack.c.l.b16 %v2013_v63 }
 0x450   :  { %v7267_v37 = vadd.f32 %v3142_v36, %v7218_v44 }
 0x451   :  { %v1688_v2 = vadd.f32 %v1687_v43, %v1319_v26  ;;  %v2016_v26 = vpack.c.bf16 %v1872_v22, %v1872_v22  ;;  %v5585_v43 = vld [vmem:[%s7750_s2 + $0xf0] sm:$0xff]  ;;  %v1336_v22 = vadd.f32 %v7177_v46, %v6083_v17 }
 0x452   :  { %3524 = vmatpush.bf16.msra.mxu3 %v5585_v43 }
 0x453   :  { %v1870_v30 = vmax.f32 %v1688_v2, 0.0  ;;  %5103 = vmatmul.msk.bf16.gmra.mxu2 %vm2083_vm0, %v3201_v49  ;;  %v3287_v49 = vunpack.c.l.b16 %v2016_v26  ;;  %v1705_v10 = vadd.f32 %v6085_v24, %v1336_v22  ;;  %v1361_v24 = vadd.f32 %v7177_v46, %v6229_v48 }
 0x455   :  { %v2014_v5 = vpack.c.bf16 %v1870_v30, %v1870_v30 }
 0x456   :  { %v1320_v31 = vpop.f32.mrf.mxu0 }
 0x457   :  { %v3285_v11 = vunpack.c.l.b16 %v2014_v5  ;;  %v1321_v40 = vadd.f32 %v7177_v46, %v1320_v31  ;;  %v7271_v59 = vpop.f32.mrf.mxu3  ;;  %v1689_v56 = vpop.f32.mrf.mxu1 }
 0x459   :  { %v3293_v28 = vpack.c.b16 %v3285_v11, %v3284_v35  ;;  %v1690_v14 = vadd.f32 %v1689_v56, %v1321_v40  ;;  %v1882_v35 = vmax.f32 %v6159_v20, 0.0  ;;  %v1725_v20 = vadd.f32 %v6207_v12, %v1356_v33 }
 0x45b   :  { %5112 = vmatmul.msk.bf16.vlgmr.msrb.gmra.mxu3 %vm2083_vm0, %v3293_v28  ;;  %v1871_v44 = vmax.f32 %v1690_v14, 0.0  ;;  %v2026_v56 = vpack.c.bf16 %v1882_v35, %v1882_v35 }
 0x45d   :  { %v2015_v30 = vpack.c.bf16 %v1871_v44, %v1871_v44 }
 0x45f   :  { %v3147_v51 = vpop.f32.mrf.mxu3  ;;  %v3286_v36 = vunpack.c.l.b16 %v2015_v30 }
 0x460   :  { %v7276_v2 = vadd.f32 %v3147_v51, %v7227_v16  ;;  %v1884_v51 = vmax.f32 %v6188_v0, 0.0 }
 0x461   :  { %v3294_v5 = vpack.c.b16 %v3287_v49, %v3286_v36 }
 0x462   :  { %v2028_v26 = vpack.c.bf16 %v1884_v51, %v1884_v51 }
 0x463   :  { %5125 = vmatmul.msk.bf16.vlgmr.msra.gmra.mxu2 %vm2083_vm0, %v6132_v21  ;;  %v1720_v21 = vadd.f32 %v6180_v3, %v1351_v4 }
 0x464   :  { %v3386_v36 = vunpack.c.l.b16 %v2028_v26 }
 0x465   :  { %v1883_v11 = vmax.f32 %v1720_v21, 0.0 }
 0x467   :  { %v7283_v63 = vpop.f32.mrf.mxu3  ;;  %v2027_v28 = vpack.c.bf16 %v1883_v11, %v1883_v11 }
 0x469   :  { %v3385_v14 = vunpack.c.l.b16 %v2027_v28 }
 0x46b   :  { %5113 = vmatmul.msk.bf16.gmra.mxu3 %vm2083_vm0, %v3294_v5 }
 0x46f   :  { %v3152_v16 = vpop.f32.mrf.mxu3 }
 0x470   :  { %v7289_v31 = vadd.f32 %v3152_v16, %v7238_v18  ;;  %v3384_v18 = vunpack.c.l.b16 %v2026_v56  ;;  %v1886_v16 = vmax.f32 %v6214_v41, 0.0 }
 0x472   :  { %v2030_v56 = vpack.c.bf16 %v1886_v16, %v1886_v16 }
 0x473   :  { %5126 = vmatmul.msk.bf16.gmra.mxu2 %vm2083_vm0, %v6157_v15  ;;  %v3391_v15 = vpack.c.b16 %v3385_v14, %v3384_v18  ;;  %v1888_v18 = vmax.f32 %v6240_v13, 0.0 }
 0x474   :  { %v3388_v28 = vunpack.c.l.b16 %v2030_v56 }
 0x475   :  { %v2032_v41 = vpack.c.bf16 %v1888_v18, %v1888_v18 }
 0x476   :  { %v3393_v48 = vpack.c.b16 %v3388_v28, %v3388_v28 }
 0x477   :  { %v7295_v40 = vpop.f32.mrf.mxu3 }
 0x47b   :  { %5114 = vmatmul.msk.bf16.gmra.mxu3 %vm2083_vm0, %v6048_v54  ;;  %v1885_v54 = vmax.f32 %v1725_v20, 0.0  ;;  %v3477_v20 = vunpack.c.l.b16 %v2032_v41 }
 0x47d   :  { %v2029_v43 = vpack.c.bf16 %v1885_v54, %v1885_v54 }
 0x47f   :  { %v3157_v44 = vpop.f32.mrf.mxu3  ;;  %v3387_v12 = vunpack.c.l.b16 %v2029_v43 }
 0x480   :  { %v7302_v3 = vadd.f32 %v3157_v44, %v7246_v6  ;;  %v1877_v6 = vmax.f32 %v1705_v10, 0.0  ;;  %v1890_v10 = vmax.f32 %v6265_v45, 0.0  ;;  %v1892_v45 = vmax.f32 %v6287_v23, 0.0 }
 0x481   :  { %v3392_v4 = vpack.c.b16 %v3387_v12, %v3386_v36  ;;  %v1894_v23 = vmax.f32 %v6309_v7, 0.0  ;;  %v5590_v7 = vld [vmem:[%s7750_s2 + $0x118] sm:$0xff] }
 0x482   :  { %v2021_v17 = vpack.c.bf16 %v1877_v6, %v1877_v6  ;;  %v2034_v6 = vpack.c.bf16 %v1890_v10, %v1890_v10  ;;  %v2036_v16 = vpack.c.bf16 %v1892_v45, %v1892_v45  ;;  %3675 = vmatpush.bf16.msrb.mxu3 %v5590_v7  ;;  %v5602_v7 = vld [vmem:[%s7750_s2 + $0x178] sm:$0xff] }
 0x483   :  { %5127 = vmatmul.msk.bf16.gmra.mxu2 %vm2083_vm0, %v3391_v15  ;;  %v2038_v18 = vpack.c.bf16 %v1894_v23, %v1894_v23 }
 0x484   :  { %v3292_v0 = vunpack.c.l.b16 %v2021_v17  ;;  %v3479_v12 = vunpack.c.l.b16 %v2034_v6 }
 0x486   :  { %v3297_v11 = vpack.c.b16 %v3292_v0, %v3292_v0 }
 0x487   :  { %v7309_v30 = vpop.f32.mrf.mxu3 }
 0x48b   :  { %5115 = vmatmul.msk.bf16.gmra.mxu3 %vm2083_vm0, %v6093_v58 }
 0x48f   :  { %v3162_v49 = vpop.f32.mrf.mxu3 }
 0x490   :  { %v7315_v5 = vadd.f32 %v3162_v49, %v7263_v19  ;;  %v1730_v19 = vadd.f32 %v6231_v27, %v1361_v24 }
 0x492   :  { %v1887_v33 = vmax.f32 %v1730_v19, 0.0 }
 0x493   :  { %5128 = vmatmul.msk.bf16.gmra.mxu2 %vm2083_vm0, %v3392_v4 }
 0x494   :  { %v2031_v44 = vpack.c.bf16 %v1887_v33, %v1887_v33  ;;  %v5594_v33 = vld [vmem:[%s7750_s2 + $0x138] sm:$0xff] }
 0x495   :  { %3635 = vmatpush.bf16.msrb.mxu2 %v5594_v33 }
 0x496   :  { %v3238_v21 = vpop.f32.mrf.mxu2  ;;  %v3476_v15 = vunpack.c.l.b16 %v2031_v44  ;;  %v3483_v44 = vunpack.c.l.b16 %v2038_v18 }
 0x497   :  { %v3164_v35 = vpop.f32.mrf.mxu3  ;;  %v7322_v58 = vadd.f32 %v3238_v21, %v7267_v37  ;;  %v1366_v37 = vadd.f32 %v7177_v46, %v6258_v29  ;;  %v1371_v29 = vadd.f32 %v7177_v46, %v6280_v50  ;;  %v1376_v50 = vadd.f32 %v7177_v46, %v6302_v38 }
 0x498   :  { %v3485_v51 = vpack.c.b16 %v3477_v20, %v3476_v15  ;;  %v3481_v35 = vunpack.c.l.b16 %v2036_v16 }
 0x499   :  { %v1735_v54 = vadd.f32 %v6260_v34, %v1366_v37  ;;  %v1740_v34 = vadd.f32 %v6282_v57, %v1371_v29  ;;  %v1745_v57 = vadd.f32 %v6304_v42, %v1376_v50 }
 0x49b   :  { %5116 = vmatmul.msk.bf16.gmra.mxu3 %vm2083_vm0, %v3297_v11  ;;  %v1889_v13 = vmax.f32 %v1735_v54, 0.0  ;;  %v1891_v4 = vmax.f32 %v1740_v34, 0.0  ;;  %v1893_v19 = vmax.f32 %v1745_v57, 0.0  ;;  %v5592_v34 = vld [vmem:[%s7750_s2 + $0x128] sm:$0xff] }
 0x49d   :  { %v2033_v43 = vpack.c.bf16 %v1889_v13, %v1889_v13  ;;  %v2035_v24 = vpack.c.bf16 %v1891_v4, %v1891_v4  ;;  %v2037_v38 = vpack.c.bf16 %v1893_v19, %v1893_v19 }
 0x49e   :  { %v7327_v14 = vpop.f32.mrf.mxu2 }
 0x49f   :  { %v3478_v36 = vunpack.c.l.b16 %v2033_v43  ;;  %v3480_v21 = vunpack.c.l.b16 %v2035_v24 }
 0x4a1   :  { %v3486_v17 = vpack.c.b16 %v3479_v12, %v3478_v36  ;;  %v3487_v56 = vpack.c.b16 %v3481_v35, %v3480_v21  ;;  %v5591_v35 = vld [vmem:[%s7750_s2 + $0x120] sm:$0xff] }
 0x4a3   :  { %5129 = vmatmul.msk.bf16.gmra.mxu2 %vm2083_vm0, %v3393_v48  ;;  %v3482_v48 = vunpack.c.l.b16 %v2037_v38  ;;  %v2194_v38 = vadd.f32 %v6347_v52, %v6371_v9  ;;  %v5597_v9 = vld [vmem:[%s7750_s2 + $0x150] sm:$0xff] }
 0x4a5   :  { %v3488_v37 = vpack.c.b16 %v3483_v44, %v3482_v48  ;;  %v2303_v18 = vadd.f32 %v6482_v55, %v2194_v38  ;;  %v7792_v38 = vld [vmem:[#allocation19_spill] sm:$0xff] }
 0x4a6   :  { %v3243_v22 = vpop.f32.mrf.mxu2 }
 0x4a7   :  { %v3264_v27 = vadd.f32 %v3243_v22, %v7276_v2 }
 0x4ab   :  { %5138 = vmatmul.msk.bf16.vlgmr.msra.gmra.mxu3 %vm2083_vm0, %v3485_v51 }
 0x4ae   :  { %v7336_v26 = vpop.f32.mrf.mxu2 }
 0x4b6   :  { %v3248_v49 = vpop.f32.mrf.mxu2 }
 0x4b7   :  { %v3266_v2 = vadd.f32 %v3248_v49, %v7289_v31 }
 0x4bb   :  { %5139 = vmatmul.msk.bf16.gmra.mxu3 %vm2083_vm0, %v3486_v17 }
 0x4be   :  { %v7344_v0 = vpop.f32.mrf.mxu2 }
 0x4c6   :  { %v3253_v11 = vpop.f32.mrf.mxu2 }
 0x4c7   :  { %v3268_v31 = vadd.f32 %v3253_v11, %v7302_v3  ;;  %v1381_v3 = vadd.f32 %v7177_v46, %v6324_v53  ;;  %v5593_v46 = vld [vmem:[%s7750_s2 + $0x130] sm:$0xff] }
 0x4c8   :  { %3636 = vmatpush.bf16.msrb.mxu2 %v5593_v46 }
 0x4c9   :  { %v1750_v15 = vadd.f32 %v6349_v60, %v1381_v3 }
 0x4cb   :  { %5140 = vmatmul.msk.bf16.gmra.mxu3 %vm2083_vm0, %v3487_v56  ;;  %v1895_v20 = vmax.f32 %v1750_v15, 0.0 }
 0x4cc   :  { %3637 = vmatpush.bf16.msrb.mxu2 %v5592_v34 }
 0x4ce   :  { %v7352_v28 = vpop.f32.mrf.mxu2 }
 0x4d0   :  { %3638 = vmatpush.bf16.msrb.mxu2 %v5591_v35  ;;  %v7791_v35 = vld [vmem:[#allocation16_spill] sm:$0xff] }
 0x4d6   :  { %v3258_v42 = vpop.f32.mrf.mxu2 }
 0x4d7   :  { %v3270_v41 = vadd.f32 %v3258_v42, %v7315_v5  ;;  %v2039_v5 = vpack.c.bf16 %v1895_v20, %v1895_v20  ;;  %v5598_v42 = vld [vmem:[%s7750_s2 + $0x158] sm:$0xff] }
 0x4d8   :  { %3723 = vmatpush.bf16.msra.mxu2 %v5598_v42  ;;  %v7794_v42 = vld [vmem:[#allocation25_spill] sm:$0xff] }
 0x4d9   :  { %v3484_v54 = vunpack.c.l.b16 %v2039_v5  ;;  %v5599_v5 = vld [vmem:[%s7750_s2 + $0x160] sm:$0xff] }
 0x4db   :  { %5141 = vmatmul.msk.bf16.gmra.mxu3 %vm2083_vm0, %v3488_v37  ;;  %v3489_v60 = vpack.c.b16 %v3484_v54, %v3484_v54  ;;  %v7787_v54 = vld [vmem:[#allocation7_spill] sm:$0xff] }
 0x4dc   :  { %3724 = vmatpush.bf16.msra.mxu2 %v5597_v9  ;;  %v7796_v9 = vld [vmem:[#allocation3_spill] sm:$0xff] }
 0x4de   :  { %v3260_v22 = vpop.f32.mrf.mxu2  ;;  %v3334_v51 = vpop.f32.mrf.mxu3 }
 0x4df   :  { %v3358_v53 = vadd.f32 %v3334_v51, %v7322_v58  ;;  %v5589_v58 = vld [vmem:[%s7750_s2 + $0x110] sm:$0xff]  ;;  %v5600_v22 = vld [vmem:[%s7750_s2 + $0x168] sm:$0xff] }
 0x4e0   :  { %3676 = vmatpush.bf16.msrb.mxu3 %v5589_v58 }
 0x4e6   :  { %v7369_v13 = vpop.f32.mrf.mxu3  ;;  %v3430_v10 = vpop.f32.mrf.mxu2 }
 0x4e7   :  { %v7371_v43 = vadd.f32 %v3430_v10, %v3358_v53 }
 0x4eb   :  { %5142 = vmatmul.msk.bf16.gmra.mxu3 %vm2083_vm0, %v3489_v60  ;;  %v7788_v60 = vld [vmem:[#allocation31_spill] sm:$0xff] }
 0x4ee   :  { %v3339_v6 = vpop.f32.mrf.mxu3  ;;  %v7374_v29 = vpop.f32.mrf.mxu2 }
 0x4ef   :  { %v3360_v36 = vadd.f32 %v3339_v6, %v3264_v27  ;;  %v5588_v27 = vld [vmem:[%s7750_s2 + $0x108] sm:$0xff] }
 0x4f0   :  { %3677 = vmatpush.bf16.msrb.mxu3 %v5588_v27 }
 0x4f6   :  { %v7379_v12 = vpop.f32.mrf.mxu3  ;;  %v3435_v49 = vpop.f32.mrf.mxu2 }
 0x4f7   :  { %v7381_v17 = vadd.f32 %v3435_v49, %v3360_v36 }
 0x4fe   :  { %v3344_v4 = vpop.f32.mrf.mxu3  ;;  %v7386_v45 = vpop.f32.mrf.mxu2 }
 0x4ff   :  { %v3362_v24 = vadd.f32 %v3344_v4, %v3266_v2  ;;  %v5587_v2 = vld [vmem:[%s7750_s2 + $0x100] sm:$0xff]  ;;  %v7790_v4 = vld [vmem:[#allocation13_spill] sm:$0xff] }
 0x500   :  { %3678 = vmatpush.bf16.msrb.mxu3 %v5587_v2 }
 0x504   :  { %3772 = vmatpush.bf16.msra.mxu3 %v5602_v7 }
 0x506   :  { %v7391_v16 = vpop.f32.mrf.mxu3  ;;  %v3440_v50 = vpop.f32.mrf.mxu2 }
 0x507   :  { %v7393_v21 = vadd.f32 %v3440_v50, %v3362_v24 }
 0x50e   :  { %v3349_v11 = vpop.f32.mrf.mxu3  ;;  %v7398_v56 = vpop.f32.mrf.mxu2 }
 0x50f   :  { %v3364_v57 = vadd.f32 %v3349_v11, %v3268_v31  ;;  %v2399_v31 = vadd.f32 %v6572_v25, %v2303_v18  ;;  %v5601_v25 = vld [vmem:[%s7750_s2 + $0x170] sm:$0xff] }
 0x510   :  { %3773 = vmatpush.bf16.msra.mxu3 %v5601_v25 }
 0x511   :  { %v2495_v37 = vadd.f32 %v6674_v47, %v2399_v31  ;;  %v7793_v31 = vld [vmem:[#allocation22_spill] sm:$0xff] }
 0x513   :  { %v2591_v52 = vadd.f32 %v6766_v39, %v2495_v37  ;;  %v5596_v39 = vld [vmem:[%s7750_s2 + $0x148] sm:$0xff] }
 0x514   :  { %3725 = vmatpush.bf16.msra.mxu2 %v5596_v39  ;;  %3774 = vmatpush.bf16.msra.mxu3 %v5600_v22  ;;  %v7798_v39 = vld [vmem:[#allocation8_spill] sm:$0xff] }
 0x515   :  { %v2687_v55 = vadd.f32 %v6873_v8, %v2591_v52  ;;  %v7786_v8 = vld [vmem:[#allocation2_spill] sm:$0xff]  ;;  %v7795_v52 = vld [vmem:[#allocation5_spill] sm:$0xff] }
 0x516   :  { %v7403_v19 = vpop.f32.mrf.mxu3  ;;  %v3445_v23 = vpop.f32.mrf.mxu2  ;;  %v2199_v53 = vadd.f32 %v7786_v8, %v6398_v1  ;;  %v7452_v1 = vld [vmem:[%s7749_s4 + $0x1] ss:$0 sm:$0xff]  ;;  %v2204_v25 = vadd.f32 %v7796_v9, %v7795_v52 }
 0x517   :  { %v7405_v33 = vadd.f32 %v3445_v23, %v3364_v57  ;;  %v2783_v47 = vadd.f32 %v6965_v61, %v2687_v55  ;;  %v5595_v61 = vld [vmem:[%s7750_s2 + $0x140] sm:$0xff]  ;;  %v5610_v23 = vld [vmem:[%s7750_s2 + $0x1b8] sm:$0xff] }
 0x518   :  { %v2305_v10 = vadd.f32 %v7787_v54, %v2199_v53  ;;  %3726 = vmatpush.bf16.msra.mxu2 %v5595_v61  ;;  %3775 = vmatpush.bf16.msra.mxu3 %v5599_v5  ;;  %v2307_v22 = vadd.f32 %v7798_v39, %v2204_v25  ;;  %v7800_v61 = vld [vmem:[#allocation11_spill] sm:$0xff] }
 0x519   :  { %v2879_v51 = vadd.f32 %v7067_v62, %v2783_v47  ;;  %v5608_v47 = vld [vmem:[%s7750_s2 + $0x1a8] sm:$0xff] }
 0x51a   :  { %v2403_v5 = vadd.f32 %v7800_v61, %v2307_v22  ;;  %v7812_v39 = vld [vmem:[#allocation15_spill] sm:$0xff] }
 0x51b   :  { %v2975_v46 = vadd.f32 %v7159_v32, %v2879_v51  ;;  %v7789_v32 = vld [vmem:[#allocation10_spill] sm:$0xff]  ;;  %v7799_v51 = vld [vmem:[#allocation32_spill] sm:$0xff]  ;;  %v5612_v61 = vld [vmem:[%s7750_s2 + $0x1c8] sm:$0xff] }
 0x51c   :  { %v2401_v58 = vadd.f32 %v7789_v32, %v2305_v10  ;;  %v5605_v10 = vld [vmem:[%s7750_s2 + $0x190] sm:$0xff] }
 0x51d   :  { %v3071_v6 = vadd.f32 %v7788_v60, %v2975_v46  ;;  %v5607_v60 = vld [vmem:[%s7750_s2 + $0x1a0] sm:$0xff] }
 0x51e   :  { %v3354_v3 = vpop.f32.mrf.mxu3  ;;  %v7410_v48 = vpop.f32.mrf.mxu2  ;;  %v2497_v24 = vadd.f32 %v7790_v4, %v2401_v58  ;;  %v7802_v58 = vld [vmem:[#allocation17_spill] sm:$0xff]  ;;  %v7803_v4 = vld [vmem:[#allocation20_spill] sm:$0xff] }
 0x51f   :  { %v3366_v44 = vadd.f32 %v3354_v3, %v3270_v41  ;;  %v3167_v49 = vadd.f32 %v7271_v59, %v3071_v6  ;;  %v7801_v6 = vld [vmem:[#allocation14_spill] sm:$0xff] }
 0x520   :  { %v2593_v11 = vadd.f32 %v7791_v35, %v2497_v24 }
 0x521   :  { %v3263_v27 = vadd.f32 %v7327_v14, %v3167_v49 }
 0x522   :  { %v2689_v59 = vadd.f32 %v7792_v38, %v2593_v11 }
 0x523   :  { %v3359_v57 = vadd.f32 %v7369_v13, %v3263_v27  ;;  %v5609_v13 = vld [vmem:[%s7750_s2 + $0x1b0] sm:$0xff] }
 0x524   :  { %v2785_v14 = vadd.f32 %v7793_v31, %v2689_v59  ;;  %v7806_v59 = vld [vmem:[#allocation6_spill] sm:$0xff] }
 0x526   :  { %v3356_v41 = vpop.f32.mrf.mxu3  ;;  %v3450_v15 = vpop.f32.mrf.mxu2  ;;  %v2881_v7 = vadd.f32 %v7794_v42, %v2785_v14  ;;  %v5614_v14 = vld [vmem:[%s7750_s2 + $0x1d8] sm:$0xff] }
 0x527   :  { %v7429_v20 = vadd.f32 %v3450_v15, %v3366_v44  ;;  %v5606_v15 = vld [vmem:[%s7750_s2 + $0x198] sm:$0xff] }
 0x52e   :  { %v3452_v62 = vpop.f32.mrf.mxu2  ;;  %v3526_v36 = vpop.f32.mrf.mxu3 }
 0x52f   :  { %v3550_v34 = vadd.f32 %v3526_v36, %v7371_v43  ;;  %v3455_v43 = vadd.f32 %v7374_v29, %v3359_v57  ;;  %v7797_v29 = vld [vmem:[#allocation28_spill] sm:$0xff]  ;;  %v2499_v62 = vadd.f32 %v7801_v6, %v2403_v5  ;;  %v7805_v57 = vld [vmem:[#allocation26_spill] sm:$0xff]  ;;  %v5616_v5 = vld [vmem:[%s7750_s2 + $0x1e8] sm:$0xff] }
 0x530   :  { %v2977_v55 = vadd.f32 %v7797_v29, %v2881_v7  ;;  %v7810_v7 = vld [vmem:[#allocation33_spill] sm:$0xff]  ;;  %v7811_v29 = vld [vmem:[#allocation12_spill] sm:$0xff] }
 0x531   :  { %v3560_v50 = vadd.f32 %v7452_v1, %v3550_v34  ;;  %v5604_v34 = vld [vmem:[%s7750_s2 + $0x188] sm:$0xff]  ;;  %v7815_v6 = vld [vmem:[#allocation24_spill] sm:$0xff] }
 0x532   :  { %v3073_v8 = vadd.f32 %v7799_v51, %v2977_v55 }
 0x533   :  { %v3569_v2 = vmax.f32 %v3560_v50, 0.0 }
 0x534   :  { %v3169_v54 = vadd.f32 %v7283_v63, %v3073_v8  ;;  %v2595_v63 = vadd.f32 %v7802_v58, %v2499_v62  ;;  %v7813_v8 = vld [vmem:[#allocation18_spill] sm:$0xff]  ;;  %v7816_v58 = vld [vmem:[#allocation27_spill] sm:$0xff] }
 0x535   :  { %v3578_v18 = vpack.c.bf16 %v3569_v2, %v3569_v2 }
 0x536   :  { %v3528_v3 = vpop.f32.mrf.mxu3  ;;  %v3265_v36 = vadd.f32 %v7336_v26, %v3169_v54  ;;  %v2691_v24 = vadd.f32 %v7803_v4, %v2595_v63  ;;  %v7804_v26 = vld [vmem:[#allocation23_spill] sm:$0xff]  ;;  %v7814_v54 = vld [vmem:[#allocation21_spill] sm:$0xff] }
 0x537   :  { %v3551_v44 = vadd.f32 %v3528_v3, %v3455_v43  ;;  %5176 = vmatmul.msk.bf16.vlgmr.msrb.gmra.mxu3 %vm3627_vm1, %v3578_v18  ;;  %v7807_v43 = vld [vmem:[#allocation4_spill] sm:$0xff] }
 0x538   :  { %3870 = vmatpush.bf16.msrb.mxu3 %v5610_v23  ;;  %v3361_v49 = vadd.f32 %v7379_v12, %v3265_v36  ;;  %v2787_v11 = vadd.f32 %v7804_v26, %v2691_v24  ;;  %v5603_v12 = vld [vmem:[%s7750_s2 + $0x180] sm:$0xff]  ;;  %v2209_v18 = vadd.f32 %v7807_v43, %v7806_v59 }
 0x539   :  { %v3561_v37 = vadd.f32 %v7452_v1, %v3551_v44  ;;  %v5618_v44 = vld [vmem:[%s7750_s2 + $0x1f8] sm:$0xff]  ;;  %v5611_v36 = vld [vmem:[%s7750_s2 + $0x1c0] sm:$0xff] }
 0x53a   :  { %v3457_v27 = vadd.f32 %v7386_v45, %v3361_v49  ;;  %v2883_v2 = vadd.f32 %v7805_v57, %v2787_v11  ;;  %v7808_v45 = vld [vmem:[#allocation29_spill] sm:$0xff]  ;;  %v5621_v57 = vld [vmem:[%s7750_s2 + $0x210] sm:$0xff] }
 0x53b   :  { %v3570_v41 = vmax.f32 %v3561_v37, 0.0 }
 0x53c   :  { %3871 = vmatpush.bf16.msrb.mxu3 %v5609_v13  ;;  %v2979_v3 = vadd.f32 %v7808_v45, %v2883_v2  ;;  %v7809_v13 = vld [vmem:[#allocation9_spill] sm:$0xff] }
 0x53d   :  { %v3579_v53 = vpack.c.bf16 %v3570_v41, %v3570_v41  ;;  %v2309_v42 = vadd.f32 %v7809_v13, %v2209_v18 }
 0x53e   :  { %v3531_v46 = vpop.f32.mrf.mxu3  ;;  %v3075_v37 = vadd.f32 %v7810_v7, %v2979_v3 }
 0x53f   :  { %5159 = vmatmul.msk.bf16.vlgmr.msrb.gmra.mxu2 %vm3627_vm1, %v3579_v53  ;;  %v3552_v32 = vadd.f32 %v3531_v46, %v7381_v17  ;;  %v2405_v55 = vadd.f32 %v7811_v29, %v2309_v42 }
 0x540   :  { %3821 = vmatpush.bf16.msrb.mxu2 %v5606_v15  ;;  %3872 = vmatpush.bf16.msrb.mxu3 %v5608_v47  ;;  %v3171_v41 = vadd.f32 %v7295_v40, %v3075_v37  ;;  %v5613_v15 = vld [vmem:[%s7750_s2 + $0x1d0] sm:$0xff] }
 0x541   :  { %v3562_v50 = vadd.f32 %v7452_v1, %v3552_v32  ;;  %v5617_v47 = vld [vmem:[%s7750_s2 + $0x1f0] sm:$0xff]  ;;  %v2501_v22 = vadd.f32 %v7812_v39, %v2405_v55  ;;  %v5615_v32 = vld [vmem:[%s7750_s2 + $0x1e0] sm:$0xff] }
 0x542   :  { %v3267_v51 = vadd.f32 %v7344_v0, %v3171_v41  ;;  %v5629_v39 = vld [vmem:[%s7751_s3 + $0x34] sm:$0xf] }
 0x543   :  { %v3571_v23 = vmax.f32 %v3562_v50, 0.0  ;;  %v2597_v53 = vadd.f32 %v7813_v8, %v2501_v22  ;;  %v7818_v50 = vld [vmem:[#allocation34_spill] sm:$0xff]  ;;  %v5628_v8 = vld [vmem:[%s7751_s3 + $0x24] sm:$0xf0] }
 0x544   :  { %3822 = vmatpush.bf16.msrb.mxu2 %v5605_v10  ;;  %3873 = vmatpush.bf16.msrb.mxu3 %v5607_v60  ;;  %v3363_v46 = vadd.f32 %v7391_v16, %v3267_v51  ;;  %v5325_v51 = vld [vmem:[%s7751_s3 + $0x38] sm:$0xf0] }
 0x545   :  { %v3580_v52 = vpack.c.bf16 %v3571_v23, %v3571_v23  ;;  %v2693_v10 = vadd.f32 %v7814_v54, %v2597_v53  ;;  %v5328_v53 = vor.u32 %v5629_v39, %v5325_v51  ;;  %v5633_v51 = vld [vmem:[%s7751_s3 + $0x64] sm:$0xf0] }
 0x546   :  { %v3533_v35 = vpop.f32.mrf.mxu3  ;;  %v3459_v0 = vadd.f32 %v7398_v56, %v3363_v46  ;;  %v5627_v46 = vld [vmem:[%s7751_s3 + $0x24] sm:$0xf] }
 0x547   :  { %v3553_v17 = vadd.f32 %v3533_v35, %v3457_v27  ;;  %v2789_v62 = vadd.f32 %v7815_v6, %v2693_v10  ;;  %v5622_v27 = vld [vmem:[%s7750_s2 + $0x218] sm:$0xff]  ;;  %v5625_v6 = vld [vmem:[%s7751_s3 + $0x14] sm:$0xf] }
 0x548   :  { %3823 = vmatpush.bf16.msrb.mxu2 %v5604_v34  ;;  %v7817_v34 = vld [vmem:[#allocation30_spill] sm:$0xff] }
 0x549   :  { %v3563_v38 = vadd.f32 %v7452_v1, %v3553_v17  ;;  %v2885_v63 = vadd.f32 %v7816_v58, %v2789_v62  ;;  %v5624_v58 = vld [vmem:[%s7751_s3 + $0x4] sm:$0xf0] }
 0x54b   :  { %v3572_v31 = vmax.f32 %v3563_v38, 0.0  ;;  %v2981_v4 = vadd.f32 %v7817_v34, %v2885_v63  ;;  %v5623_v63 = vld [vmem:[%s7751_s3 + $0x4] sm:$0xf] }
 0x54c   :  { %3824 = vmatpush.bf16.msrb.mxu2 %v5603_v12 }
 0x54d   :  { %v3581_v9 = vpack.c.bf16 %v3572_v31, %v3572_v31  ;;  %v3077_v35 = vadd.f32 %v7818_v50, %v2981_v4  ;;  %v5638_v50 = vld [vmem:[%s7751_s3 + $0xb4] sm:$0xf0] }
 0x54e   :  { %v3536_v25 = vpop.f32.mrf.mxu3 }
 0x54f   :  { %5193 = vmatmul.msk.bf16.vlgmr.msra.gmra.mxu2 %vm3627_vm1, %v3580_v52  ;;  %5210 = vmatmul.msk.bf16.vlgmr.msra.gmra.mxu3 %vm3627_vm1, %v3581_v9  ;;  %v3554_v40 = vadd.f32 %v3536_v25, %v7393_v21  ;;  %v3173_v12 = vadd.f32 %v7309_v30, %v3077_v35  ;;  %v5620_v30 = vld [vmem:[%s7750_s2 + $0x208] sm:$0xff]  ;;  %v5393_v35 = vld [vmem:[%s7751_s3 + $0x130] sm:$0xf] }
 0x550   :  { %3919 = vmatpush.bf16.msra.mxu2 %v5614_v14  ;;  %3968 = vmatpush.bf16.msra.mxu3 %v5618_v44 }
 0x551   :  { %v3564_v21 = vadd.f32 %v7452_v1, %v3554_v40  ;;  %v3269_v2 = vadd.f32 %v7352_v28, %v3173_v12  ;;  %v5619_v28 = vld [vmem:[%s7750_s2 + $0x200] sm:$0xff]  ;;  %v5637_v12 = vld [vmem:[%s7751_s3 + $0xa4] sm:$0xf0] }
 0x552   :  { %v5315_v40 = vld [vmem:[%s7751_s3 + $0x20] sm:$0xf] }
 0x553   :  { %v3573_v49 = vmax.f32 %v3564_v21, 0.0  ;;  %v3365_v38 = vadd.f32 %v7403_v19, %v3269_v2  ;;  %v5307_v21 = vld [vmem:[%s7751_s3 + $0x10] sm:$0xf]  ;;  %v5389_v2 = vld [vmem:[%s7751_s3 + $0x120] sm:$0xf] }
 0x554   :  { %3920 = vmatpush.bf16.msra.mxu2 %v5613_v15  ;;  %3969 = vmatpush.bf16.msra.mxu3 %v5617_v47  ;;  %v5323_v47 = vld [vmem:[%s7751_s3 + $0x30] sm:$0xf] }
 0x555   :  { %v3582_v26 = vpack.c.bf16 %v3573_v49, %v3573_v49  ;;  %v3461_v59 = vadd.f32 %v7410_v48, %v3365_v38 }
 0x556   :  { %v3538_v60 = vpop.f32.mrf.mxu3 }
 0x557   :  { %v3555_v16 = vadd.f32 %v3538_v60, %v3459_v0  ;;  %v5626_v60 = vld [vmem:[%s7751_s3 + $0x14] sm:$0xf0] }
 0x558   :  { %3921 = vmatpush.bf16.msra.mxu2 %v5612_v61  ;;  %3970 = vmatpush.bf16.msra.mxu3 %v5616_v5  ;;  %v5317_v61 = vld [vmem:[%s7751_s3 + $0x28] sm:$0xf0]  ;;  %v5316_v5 = vor.u32 %v5628_v8, %v5315_v40  ;;  %v5308_v62 = vor.u32 %v5626_v60, %v5307_v21  ;;  %v5373_v40 = vld [vmem:[%s7751_s3 + $0xe0] sm:$0xf]  ;;  %v5641_v8 = vld [vmem:[%s7751_s3 + $0xe4] sm:$0xf0] }
 0x559   :  { %v3565_v56 = vadd.f32 %v7452_v1, %v3555_v16  ;;  %v5320_v54 = vor.u32 %v5627_v46, %v5317_v61  ;;  %v5309_v16 = vld [vmem:[%s7751_s3 + $0x18] sm:$0xf0]  ;;  %v5374_v61 = vor.u32 %v5641_v8, %v5373_v40 }
 0x55b   :  { %v3574_v24 = vmax.f32 %v3565_v56, 0.0  ;;  %v5301_v56 = vld [vmem:[%s7751_s3 + $0x8] sm:$0xf0] }
 0x55c   :  { %3922 = vmatpush.bf16.msra.mxu2 %v5611_v36  ;;  %3971 = vmatpush.bf16.msra.mxu3 %v5615_v32  ;;  %v5312_v36 = vor.u32 %v5625_v6, %v5309_v16  ;;  %v5299_v32 = vld [vmem:[%s7751_s3] sm:$0xf]  ;;  %v5304_v34 = vor.u32 %v5623_v63, %v5301_v56  ;;  %v5337_v16 = vld [vmem:[%s7751_s3 + $0x50] sm:$0xf]  ;;  %v5640_v63 = vld [vmem:[%s7751_s3 + $0xd4] sm:$0xf0] }
 0x55d   :  { %v3583_v11 = vpack.c.bf16 %v3574_v24, %v3574_v24  ;;  %v5300_v49 = vor.u32 %v5624_v58, %v5299_v32  ;;  %v5369_v32 = vld [vmem:[%s7751_s3 + $0xd0] sm:$0xf]  ;;  %v5333_v56 = vld [vmem:[%s7751_s3 + $0x40] sm:$0xf] }
 0x55e   :  { %v3541_v17 = vpop.f32.mrf.mxu3 }
 0x55f   :  { %5227 = vmatmul.msk.bf16.vlgmr.msrb.gmra.mxu2 %vm3627_vm1, %v3582_v26  ;;  %5244 = vmatmul.msk.bf16.vlgmr.msrb.gmra.mxu3 %vm3627_vm1, %v3583_v11  ;;  %v3556_v23 = vadd.f32 %v3541_v17, %v7405_v33  ;;  %v5646_v11 = vld [vmem:[%s7751_s3 + $0x134] sm:$0xf0]  ;;  %v5357_v17 = vld [vmem:[%s7751_s3 + $0xa0] sm:$0xf] }
 0x560   :  { %4017 = vmatpush.bf16.msrb.mxu2 %v5622_v27  ;;  %v5361_v27 = vld [vmem:[%s7751_s3 + $0xb0] sm:$0xf]  ;;  %v5358_v38 = vor.u32 %v5637_v12, %v5357_v17 }
 0x561   :  { %v3566_v43 = vadd.f32 %v7452_v1, %v3556_v23  ;;  %v5362_v26 = vor.u32 %v5638_v50, %v5361_v27  ;;  %v5645_v23 = vld [vmem:[%s7751_s3 + $0x124] sm:$0xf0] }
 0x562   :  { %v5639_v27 = vld [vmem:[%s7751_s3 + $0xc4] sm:$0xf0] }
 0x563   :  { %v3575_v3 = vmax.f32 %v3566_v43, 0.0  ;;  %v5353_v43 = vld [vmem:[%s7751_s3 + $0x90] sm:$0xf] }
 0x564   :  { %4018 = vmatpush.bf16.msrb.mxu2 %v5621_v57  ;;  %v5394_v57 = vor.u32 %v5646_v11, %v5393_v35  ;;  %v5296_v35 = vld [vmem:[%s7749_s4 + $0x3] ss:$8 sm:$0x3] }
 0x565   :  { %v3584_v31 = vpack.c.bf16 %v3575_v3, %v3575_v3  ;;  %v4043_v11 = vperm.slane %v5296_v35, 1 }
 0x566   :  { %v3543_v18 = vpop.f32.mrf.mxu3 }
 0x567   :  { %v3557_v45 = vadd.f32 %v3543_v18, %v3461_v59  ;;  %v5390_v59 = vor.u32 %v5645_v23, %v5389_v2  ;;  %v5636_v18 = vld [vmem:[%s7751_s3 + $0x94] sm:$0xf0] }
 0x568   :  { %4019 = vmatpush.bf16.msrb.mxu2 %v5620_v30 }
 0x569   :  { %v3567_v33 = vadd.f32 %v7452_v1, %v3557_v45  ;;  %v5385_v45 = vld [vmem:[%s7751_s3 + $0x110] sm:$0xf] }
 0x56b   :  { %v3576_v19 = vmax.f32 %v3567_v33, 0.0 }
 0x56c   :  { %4020 = vmatpush.bf16.msrb.mxu2 %v5619_v28  ;;  %v5644_v28 = vld [vmem:[%s7751_s3 + $0x114] sm:$0xf0] }
 0x56d   :  { %v3585_v14 = vpack.c.bf16 %v3576_v19, %v3576_v19 }
 0x56e   :  { %v3546_v44 = vpop.f32.mrf.mxu3 }
 0x56f   :  { %v3558_v13 = vadd.f32 %v3546_v44, %v7429_v20  ;;  %5261 = vmatmul.msk.bf16.vlgmr.msra.gmra.mxu2 %vm3627_vm1, %v3584_v31  ;;  %5278 = vmatmul.msk.bf16.vlgmr.msra.gmra.mxu3 %vm3627_vm1, %v3585_v14  ;;  %v5354_v31 = vor.u32 %v5636_v18, %v5353_v43  ;;  %v5386_v14 = vor.u32 %v5644_v28, %v5385_v45  ;;  %v5349_v44 = vld [vmem:[%s7751_s3 + $0x80] sm:$0xf]  ;;  %v5668_v45 = vmov 0  }
 0x570   :  { %4106 = vmatpush.bf16.msra.mxu2 %v5328_v53  ;;  %5664 = vset.pattern.permute.xlu0 %v5668_v45  ;;  %v4274_v28 = vlaneseq }
 0x571   :  { %v3568_v48 = vadd.f32 %v7452_v1, %v3558_v13  ;;  %v5630_v1 = vld [vmem:[%s7751_s3 + $0x34] sm:$0xf0]  ;;  %v5635_v13 = vld [vmem:[%s7751_s3 + $0x84] sm:$0xf0] }
 0x572   :  { %v5324_v22 = vor.u32 %v5630_v1, %v5323_v47 }
 0x573   :  { %v3577_v7 = vmax.f32 %v3568_v48, 0.0  ;;  %v5381_v48 = vld [vmem:[%s7751_s3 + $0x100] sm:$0xf] }
 0x574   :  { %4093 = vmatpush.bf16.msrb.mxu3 %v5324_v22  ;;  %4107 = vmatpush.bf16.msra.mxu2 %v5320_v54  ;;  %v5341_v22 = vld [vmem:[%s7751_s3 + $0x60] sm:$0xf] }
 0x575   :  { %v3586_v37 = vpack.c.bf16 %v3577_v7, %v3577_v7  ;;  %v5342_v46 = vor.u32 %v5633_v51, %v5341_v22 }
 0x576   :  { %v3548_v42 = vpop.f32.mrf.mxu3 }
 0x577   :  { %v5643_v42 = vld [vmem:[%s7751_s3 + $0x104] sm:$0xf0] }
 0x578   :  { %4094 = vmatpush.bf16.msrb.mxu3 %v5316_v5  ;;  %4108 = vmatpush.bf16.msra.mxu2 %v5312_v36  ;;  %v5632_v36 = vld [vmem:[%s7751_s3 + $0x54] sm:$0xf0] }
 0x579   :  { %v5338_v58 = vor.u32 %v5632_v36, %v5337_v16 }
 0x57c   :  { %4095 = vmatpush.bf16.msrb.mxu3 %v5308_v62  ;;  %4109 = vmatpush.bf16.msra.mxu2 %v5304_v34  ;;  %v5631_v34 = vld [vmem:[%s7751_s3 + $0x44] sm:$0xf0] }
 0x57f   :  { %5295 = vmatmul.msk.bf16.vlgmr.msrb.gmra.mxu2 %vm3627_vm1, %v3586_v37  ;;  %v5350_v37 = vor.u32 %v5635_v13, %v5349_v44 }
 0x580   :  { %4096 = vmatpush.bf16.msrb.mxu3 %v5300_v49  ;;  %4261 = vmatpush.bf16.msrb.mxu2 %v5394_v57  ;;  %v5370_v49 = vor.u32 %v5640_v63, %v5369_v32 }
 0x584   :  { %4248 = vmatpush.bf16.msra.mxu3 %v5362_v26  ;;  %4262 = vmatpush.bf16.msrb.mxu2 %v5390_v59  ;;  %v4042_v26 = vperm.slane %v5296_v35, 0 }
 0x588   :  { %4249 = vmatpush.bf16.msra.mxu3 %v5358_v38  ;;  %4263 = vmatpush.bf16.msrb.mxu2 %v5386_v14 }
 0x58c   :  { %4250 = vmatpush.bf16.msra.mxu3 %v5354_v31 }
 0x590   :  { %4251 = vmatpush.bf16.msra.mxu3 %v5350_v37 }
 0x5ba   :  { %v3680_v52 = vpop.f32.mrf.mxu3 }
 0x5c2   :  { %v3640_v9 = vpop.f32.mrf.mxu2  ;;  %v3682_v25 = vpop.f32.mrf.mxu3 }
 0x5c3   :  { %v3681_v30 = vadd.f32 %v3680_v52, %v3640_v9  ;;  %v5382_v9 = vor.u32 %v5643_v42, %v5381_v48  ;;  %v5345_v25 = vld [vmem:[%s7751_s3 + $0x70] sm:$0xf] }
 0x5c5   :  { %4264 = vmatpush.bf16.msrb.mxu2 %v5382_v9 }
 0x5ca   :  { %v3642_v29 = vpop.f32.mrf.mxu2 }
 0x5cb   :  { %v5634_v29 = vld [vmem:[%s7751_s3 + $0x74] sm:$0xf0] }
 0x5cc   :  { %v5346_v47 = vor.u32 %v5634_v29, %v5345_v25 }
 0x5ce   :  { %4252 = vmatpush.bf16.msra.mxu3 %v5346_v47 }
 0x5d2   :  { %v3728_v55 = vpop.f32.mrf.mxu2  ;;  %v7583_v41 = vpop.f32.mrf.mxu3  ;;  %4253 = vmatpush.bf16.msra.mxu3 %v5342_v46 }
 0x5d3   :  { %v3732_v3 = vadd.f32 %v3728_v55, %v3681_v30  ;;  %v5377_v55 = vld [vmem:[%s7751_s3 + $0xf0] sm:$0xf] }
 0x5d5   :  { %v3781_v7 = vadd.f32 %v7583_v41, %v3732_v3  ;;  %v5642_v41 = vld [vmem:[%s7751_s3 + $0xf4] sm:$0xf0]  ;;  %v4275_v3 = vand.u32 127, %v4274_v28 }
 0x5d6   :  { %v5378_v39 = vor.u32 %v5642_v41, %v5377_v55  ;;  %4254 = vmatpush.bf16.msra.mxu3 %v5338_v58 }
 0x5d7   :  { %vm4276_vm2 = vcmp.ge.s32.totalorder %v4275_v3, 1  ;;  %vm4277_vm3 = vcmp.lt.s32.totalorder %v4275_v3, 7 }
 0x5d8   :  { %4265 = vmatpush.bf16.msrb.mxu2 %v5378_v39  ;;  %vm4278_vm4 = vmand %vm4276_vm2, %vm4277_vm3 }
 0x5da   :  { %v3730_v15 = vpop.f32.mrf.mxu2  ;;  %v3779_v20 = vpop.f32.mrf.mxu3 }
 0x5dc   :  { %4266 = vmatpush.bf16.msrb.mxu2 %v5374_v61 }
 0x5e0   :  { %4267 = vmatpush.bf16.msrb.mxu2 %v5370_v49 }
 0x5e2   :  { %v3826_v10 = vpop.f32.mrf.mxu2  ;;  %v7609_v0 = vpop.f32.mrf.mxu3 }
 0x5e3   :  { %v3830_v52 = vadd.f32 %v3826_v10, %v3781_v7  ;;  %v4027_v10 = vld [vmem:[%s7749_s4 + $0x2] ss:$0 sm:$0xff] }
 0x5e5   :  { %v3879_v1 = vadd.f32 %v7609_v0, %v3830_v52 }
 0x5ea   :  { %v3828_v4 = vpop.f32.mrf.mxu2  ;;  %v3877_v24 = vpop.f32.mrf.mxu3 }
 0x5eb   :  { %v5365_v4 = vld [vmem:[%s7751_s3 + $0xc0] sm:$0xf]  ;;  %v5334_v24 = vor.u32 %v5631_v34, %v5333_v56 }
 0x5ec   :  { %v5366_v50 = vor.u32 %v5639_v27, %v5365_v4 }
 0x5ed   :  { %4255 = vmatpush.bf16.msra.mxu3 %v5334_v24 }
 0x5ee   :  { %4268 = vmatpush.bf16.msrb.mxu2 %v5366_v50 }
 0x5f2   :  { %v3924_v33 = vpop.f32.mrf.mxu2  ;;  %v3973_v19 = vpop.f32.mrf.mxu3 }
 0x5f3   :  { %v3928_v53 = vadd.f32 %v3924_v33, %v3879_v1  ;;  %v4151_v33 = vld [vmem:[%s7749_s4 + $0x4] ss:$0 sm:$0xff] }
 0x5f5   :  { %v3977_v5 = vadd.f32 %v3973_v19, %v3928_v53 }
 0x5fa   :  { %v3926_v15 = vpop.f32.mrf.mxu2  ;;  %v3975_v20 = vpop.f32.mrf.mxu3 }
 0x602   :  { %v4022_v54 = vpop.f32.mrf.mxu2 }
 0x603   :  { %v4026_v0 = vadd.f32 %v4022_v54, %v3977_v5 }
 0x605   :  { %v4028_v21 = vadd.f32 %v4027_v10, %v4026_v0 }
 0x607   :  { %v4029_v60 = vmax.f32 %v4028_v21, 0.0 }
 0x609   :  { %v4030_v6 = vpack.c.bf16 %v4029_v60, %v4029_v60 }
 0x60a   :  { %v4024_v62 = vpop.f32.mrf.mxu2 }
 0x60b   :  { %5329 = vmatmul.msk.bf16.vlgmr.msrb.gmra.mxu3 %vm3627_vm1, %v4030_v6  ;;  %5330 = vmatmul.msk.bf16.vlgmr.msra.gmra.mxu2 %vm3627_vm1, %v4030_v6 }
 0x68e   :  { %v4098_v17 = vpop.f32.mrf.mxu3  ;;  %v4111_v12 = vpop.f32.mrf.mxu2 }
 0x68f   :  { %v4099_v57 = vadd.f32 %v4098_v17, %v4042_v26  ;;  %v4112_v2 = vadd.f32 %v4111_v12, %v4043_v11 }
 0x691   :  { %v4115_v23 = vmax.f32 %v4099_v57, 0.0  ;;  %v4116_v38 = vmax.f32 %v4112_v2, 0.0 }
 0x693   :  { %v4117_v30 = vpack.c.bf16 %v4115_v23, %v4115_v23  ;;  %v4118_v59 = vpack.c.bf16 %v4116_v38, %v4116_v38 }
 0x695   :  { %4256 = vmatmul.bf16.vlgmr.msra.gmra.mxu3 %v4117_v30  ;;  %4269 = vmatmul.bf16.vlgmr.msrb.gmra.mxu2 %v4118_v59 }
 0x696   :  { %v4100_v43 = vpop.f32.mrf.mxu3  ;;  %v4113_v18 = vpop.f32.mrf.mxu2 }
 0x718   :  { %v4257_v19 = vpop.f32.mrf.mxu3  ;;  %v4270_v31 = vpop.f32.mrf.mxu2 }
 0x719   :  { %v4258_v14 = vadd.f32 %v4257_v19, %v4151_v33 }
 0x71b   :  { %v4271_v44 = vadd.f32 %v4270_v31, %v4258_v14 }
 0x71d   :  { %v4279_v13 = vsel %vm4278_vm4, %v4271_v44, 0.0 }
 0x71e   :  { %4280 = vadd.xlane.f32.xlu0 %v4279_v13 }
 0x720   :  { %v4259_v48 = vpop.f32.mrf.mxu3  ;;  %v4272_v42 = vpop.f32.mrf.mxu2 }
 0x732   :  { %4285 = vperm.xlu0 %5664, %v4271_v44  }
 0x791   :  { %v4281_v7 = vpop.xlane.xlu0 %4280 }
 0x792   :  { %v4282_v52 = vmul.f32 0.16666667, %v4281_v7 }
 0x7a4   :  { %v4286_v37 = vpop.permute.xlu0 %4285 }
 0x7a5   :  { %v4288_v9 = vadd.f32 %v4286_v37, %v4271_v44 }
 0x7a7   :  { %v4289_v25 = vsub.f32 %v4288_v9, %v4282_v52 }
 0x7a9   :  { %4290 = vst [vmem:[%s7752_s5] sm:$0xff] %v4289_v25 }

</bundles_post_ra>
